<compile_context>
chip_gen: v7x
topology: tpu7x:2x2x1
jax: 0.10.0
libtpu: 0.0.40
codegen_flags: <defaults>
</compile_context>

<pallas_src>
import functools
import math

import jax
import jax.numpy as jnp
from jax.experimental import pallas as pl
from jax.experimental.pallas import tpu as pltpu

F32 = jnp.float32
BF16 = jnp.bfloat16
VMEM_SPEC = pl.BlockSpec(memory_space=pltpu.MemorySpace.VMEM)

# row order of the "misc" section of the packed row slab (after pos/dep/pe tables)
_MISC_ROWS = ("t_w", "t_b", "sa_q_b", "sa_kv_b", "ra_q_b", "ra_kv_b", "ra_out_b",
              "ln_g", "ln_b", "amlp_b", "ro_q_b", "ro_k_b")
_R = {n: i for i, n in enumerate(_MISC_ROWS)}
_N_FIXED = len(_MISC_ROWS)

# block order of the plain DxD weight slab
_DD = {"sa_q": 0, "ra_q": 1, "ra_out": 2, "amlp": 3, "ro_q": 4, "ro_k": 5}


# --------------------------------------------------------------------------
# Fused forward kernel (single invocation, everything VMEM-resident)
# --------------------------------------------------------------------------
def _fused_kernel(idx_ref, dst_ref, slab_ref, gnn_w_ref, w_dd_ref, w_kv_ref, w_gru_ref,
                  out_ref, cat_e_ref, cat_n_ref, *,
                  N, E, D, S, H, L, Vp, Vd, slot_iters):
    f32 = jnp.float32
    HS = H * S
    hd = D // H
    s_shift = S.bit_length() - 1            # log2(S), S is a power of two
    hd_shift = hd.bit_length() - 1           # log2(hd)
    r0 = Vp + Vd + N                         # first misc row of the packed slab
    R_BM, R_BU, R_SLOTS = _N_FIXED, _N_FIXED + L, _N_FIXED + 2 * L

    def row(i, w=D):                         # [1, w] static window read of a misc row
        return slab_ref[r0 + i:r0 + i + 1, 0:w]

    def leaky(x):                            # nn.LeakyReLU default slope
        return jnp.where(x > 0, x, 0.01 * x)

    def layer_norm(x, g=None, b=None, eps=1e-5):
        mu = jnp.mean(x, axis=-1, keepdims=True)
        var = jnp.mean(jnp.square(x - mu), axis=-1, keepdims=True)
        y = (x - mu) * jax.lax.rsqrt(var + eps)
        if g is not None:
            y = y * g + b
        return y

    def mm(a, b):                            # MXU: bf16 operands, f32 accumulate
        return jnp.dot(a.astype(BF16), b.astype(BF16), preferred_element_type=f32)

    def mm_t(a, b):                          # A[M,K] . B[N,K]^T -> [M,N]
        return jax.lax.dot_general(a.astype(BF16), b.astype(BF16),
                                   (((1,), (1,)), ((), ())),
                                   preferred_element_type=f32)

    # ---- unpack packed index slab / table slab (static VMEM windows) ----
    node_pos = idx_ref[0, 0:N, :]            # [N,1] int32
    src = idx_ref[1, 0:E, :]                 # [E,1]
    tag = idx_ref[2, 0:E, :]                 # [E,1]
    dst = dst_ref[...]                       # [1,E]
    pos_tab = slab_ref[0:Vp, 0:D]
    dep_tab = slab_ref[Vp:Vp + Vd, 0:D]
    pe = slab_ref[Vp + Vd:r0, 0:D]

    # ---- embedding lookups / edge gather / dst scatter-add as one-hot matmuls ----
    pos_oh = (jax.lax.broadcasted_iota(jnp.int32, (N, Vp), 1) == node_pos).astype(f32)
    node_f = mm(pos_oh, pos_tab)                                        # [N, D]
    dep_oh = (jax.lax.broadcasted_iota(jnp.int32, (E, Vd), 1) == tag).astype(f32)
    edge_f = mm(dep_oh, dep_tab)                                        # [E, D]
    src_oh = (jax.lax.broadcasted_iota(jnp.int32, (E, N), 1) == src).astype(f32)
    dst_oh = (jax.lax.broadcasted_iota(jnp.int32, (N, E), 0) == dst).astype(f32)

    # ---- GNN with K=128-stacked message / update matmuls ----
    # TODO(synk): MPNN source unavailable; msg = LeakyReLU([h_src|e] @ [Wm_h;Wm_e] + b),
    # sum-aggregated by destination, h = LeakyReLU([h|agg] @ [Wu_h;Wu_a] + b).
    cat_e_ref[:, D:2 * D] = edge_f           # layer-invariant half, stored once
    h = node_f
    for l in range(L):
        cat_e_ref[:, 0:D] = mm(src_oh, h)                               # gather h[src]
        msg = leaky(mm(cat_e_ref[...], gnn_w_ref[2 * l]) + row(R_BM + l))
        agg = mm(dst_oh, msg)                                           # scatter-add by dst
        cat_n_ref[:, 0:D] = h
        cat_n_ref[:, D:2 * D] = agg
        h = leaky(mm(cat_n_ref[...], gnn_w_ref[2 * l + 1]) + row(R_BU + l))

    # ---- LeakyReLU + positional encoding (dropout = eval-mode identity) ----
    hidden = leaky(h) + pe                                              # [N, D]

    # ---- target_fn + softmax over nodes (lane-dense [1, N]) ----
    t_logit = mm_t(row(_R["t_w"]), hidden) + row(_R["t_b"], 1)          # [1, N]
    t_logit = t_logit - jnp.max(t_logit, axis=-1, keepdims=True)
    t_e = jnp.exp(t_logit)
    t_prob = t_e / jnp.sum(t_e, axis=-1, keepdims=True)

    # ---- SlotAttention (fused K|V projection + fused GRU gates) ----
    # TODO(synk): SlotAttention source unavailable; standard slot-attention
    # stand-in (LayerNorm'd inputs/slots, softmax over slots, GRUCell update).
    x_in = layer_norm(hidden)
    kv_sa = mm(x_in, w_kv_ref[0]) + row(_R["sa_kv_b"], 2 * D)           # [N, 2D]
    k_sa, v_sa = kv_sa[:, 0:D], kv_sa[:, D:2 * D]
    sa_scale = 1.0 / math.sqrt(D)
    slots = slab_ref[r0 + R_SLOTS:r0 + R_SLOTS + S, 0:D]                # [S, D]
    sa_q_w = w_dd_ref[_DD["sa_q"]]
    sa_q_b = row(_R["sa_q_b"])
    gru_wi, gru_wh = w_gru_ref[0], w_gru_ref[1]
    attn = jnp.zeros((S, N), f32)
    for _ in range(slot_iters):
        q_sa = (mm(layer_norm(slots), sa_q_w) + sa_q_b) * sa_scale
        dots = mm_t(q_sa, k_sa)                                         # [S, N]
        dots = dots - jnp.max(dots, axis=0, keepdims=True)
        attn = jnp.exp(dots)
        attn = attn / jnp.sum(attn, axis=0, keepdims=True)              # softmax over slots
        attn_w = attn / (jnp.sum(attn, axis=-1, keepdims=True) + 1e-8)
        upd = mm(attn_w, v_sa)                                          # [S, D]
        gi = mm(upd, gru_wi)                                            # [S, 3D] fused gates
        gh = mm(slots, gru_wh)                                          # [S, 3D]
        r = jax.nn.sigmoid(gi[:, 0:D] + gh[:, 0:D])
        z = jax.nn.sigmoid(gi[:, D:2 * D] + gh[:, D:2 * D])
        n_g = jnp.tanh(gi[:, 2 * D:3 * D] + r * gh[:, 2 * D:3 * D])
        slots = (1.0 - z) * n_g + z * slots
    w_c_embd = slots                                                    # [S, D]

    # ---- stacked-head MHA bookkeeping, built in-kernel (no DMAs) ----
    # Row i of the [H*S, .] layout is (head = i // S, query-slot = i % S).
    rep = ((jax.lax.broadcasted_iota(jnp.int32, (HS, S), 0) & (S - 1))
           == jax.lax.broadcasted_iota(jnp.int32, (HS, S), 1)).astype(f32)
    comb = ((jax.lax.broadcasted_iota(jnp.int32, (S, HS), 1) & (S - 1))
            == jax.lax.broadcasted_iota(jnp.int32, (S, HS), 0)).astype(f32)
    hmask = ((jax.lax.broadcasted_iota(jnp.int32, (HS, D), 1) >> hd_shift)
             == (jax.lax.broadcasted_iota(jnp.int32, (HS, D), 0) >> s_shift)).astype(f32)
    mha_scale = 1.0 / math.sqrt(hd)

    def heads_softmax(q, k):
        qs = mm(rep, q) * hmask                                         # [HS, D]
        logits = mm_t(qs, k) * mha_scale                                # [HS, N]
        logits = logits - jnp.max(logits, axis=-1, keepdims=True)
        p = jnp.exp(logits)
        return p / jnp.sum(p, axis=-1, keepdims=True)                   # one softmax, all heads

    # ---- rel_attn: full MHA, output needed (weights discarded) ----
    q1 = mm(w_c_embd, w_dd_ref[_DD["ra_q"]]) + row(_R["ra_q_b"])
    kv1 = mm(hidden, w_kv_ref[1]) + row(_R["ra_kv_b"], 2 * D)           # fused K|V proj
    k1, v1 = kv1[:, 0:D], kv1[:, D:2 * D]
    a1 = heads_softmax(q1, k1)                                          # [HS, N]
    ctx = mm(a1, v1) * hmask                                            # per-head context
    attn_cat = mm(comb, ctx)                                            # [S, D] heads concat
    w_r_embd = mm(attn_cat, w_dd_ref[_DD["ra_out"]]) + row(_R["ra_out_b"])

    # ---- layer_norm_ + attn_mlp ----
    atten_f = layer_norm(w_r_embd, row(_R["ln_g"]), row(_R["ln_b"]))
    q2_in = mm(atten_f, w_dd_ref[_DD["amlp"]]) + row(_R["amlp_b"])

    # ---- rel_attn_out: only head-averaged attention WEIGHTS needed ----
    q2 = mm(q2_in, w_dd_ref[_DD["ro_q"]]) + row(_R["ro_q_b"])
    k2 = mm(hidden, w_dd_ref[_DD["ro_k"]]) + row(_R["ro_k_b"])
    a2 = heads_softmax(q2, k2)                                          # [HS, N]
    # keep the head-average combine in f32 so each row sums to exactly 1
    rprob = jnp.dot(comb, a2, preferred_element_type=f32) * (1.0 / H)   # [S, N]

    # ---- merged output slab [3, S, N]: one out-DMA ----
    out_ref[0, :, :] = jnp.broadcast_to(t_prob, (S, N)).astype(out_ref.dtype)
    out_ref[1, :, :] = attn.astype(out_ref.dtype)
    out_ref[2, :, :] = rprob.astype(out_ref.dtype)


# --------------------------------------------------------------------------
# Parameters (deterministic, in-script)
# --------------------------------------------------------------------------
def init_params(key, *, embd_dim=64, slot_num=4, layer_num=2,
                pos_vocab=32, dep_vocab=48, max_len=64):
    D = embd_dim
    keys = iter(jax.random.split(key, 48))

    def w(shape, fan_in=None):
        if fan_in is None:
            fan_in = shape[-2] if len(shape) >= 2 else shape[-1]
        s = 1.0 / math.sqrt(fan_in)
        return jax.random.uniform(next(keys), shape, F32, -s, s)

    p = {}
    p["pos_embd"] = jax.random.normal(next(keys), (pos_vocab, D), F32)
    p["dep_embd"] = jax.random.normal(next(keys), (dep_vocab, D), F32)

    # TODO(synk): MPNN source unavailable; split message/update weights.
    p["gnn_wm_h"] = w((layer_num, D, D))
    p["gnn_wm_e"] = w((layer_num, D, D))
    p["gnn_bm"] = w((layer_num, 1, D), fan_in=D)
    p["gnn_wu_h"] = w((layer_num, D, D))
    p["gnn_wu_a"] = w((layer_num, D, D))
    p["gnn_bu"] = w((layer_num, 1, D), fan_in=D)

    p["target_w"] = w((1, D), fan_in=D)            # Linear(D, 1) as a row vector
    p["target_b"] = w((1, 1), fan_in=D)

    # TODO(synk): SlotAttention source unavailable; standard slot-attention parameters.
    p["sa_slots"] = jax.random.normal(next(keys), (slot_num, D), F32) * 0.1
    p["sa_qkv_w"] = w((3, D, D))                   # (q, k, v)
    p["sa_qkv_b"] = w((3, 1, D), fan_in=D)
    p["sa_gru_w"] = w((6, D, D))                   # (W_ir, W_iz, W_in, W_hr, W_hz, W_hn)

    p["ra_in_w"] = w((3, D, D))                    # rel_attn in-proj (q, k, v)
    p["ra_in_b"] = w((3, 1, D), fan_in=D)
    p["ra_out_w"] = w((D, D))                      # rel_attn out_proj
    p["ra_out_b"] = w((1, D), fan_in=D)

    p["ln_g"] = jnp.ones((1, D), F32)              # nn.LayerNorm default init
    p["ln_b"] = jnp.zeros((1, D), F32)
    p["amlp_w"] = w((D, D))
    p["amlp_b"] = w((1, D), fan_in=D)

    p["ro_in_w"] = w((2, D, D))                    # rel_attn_out in-proj (q, k); v unused
    p["ro_in_b"] = w((2, 1, D), fan_in=D)

    # PositionalEncoding table (sin/cos), precomputed once
    position = jnp.arange(max_len, dtype=F32)[:, None]
    div_term = jnp.exp(jnp.arange(0, D, 2, dtype=F32) * (-math.log(10000.0) / D))
    pe = jnp.zeros((max_len, D), F32)
    pe = pe.at[:, 0::2].set(jnp.sin(position * div_term))
    pe = pe.at[:, 1::2].set(jnp.cos(position * div_term))
    p["pe"] = pe
    return p


# --------------------------------------------------------------------------
# Host-side packing into a handful of slabs (single-shot, outside the kernel)
# --------------------------------------------------------------------------
def _pack_params(params, n_nodes):
    # NOTE: the kernel computes x @ W.  If real PyTorch checkpoint weights
    # ([out, in]) are ever loaded, transpose them right here during packing.
    D = params["pos_embd"].shape[1]
    L = params["gnn_wm_h"].shape[0]

    gw = []
    for l in range(L):
        gw.append(jnp.concatenate([params["gnn_wm_h"][l], params["gnn_wm_e"][l]], axis=0))
        gw.append(jnp.concatenate([params["gnn_wu_h"][l], params["gnn_wu_a"][l]], axis=0))
    gnn_w = jnp.stack(gw)                                               # [2L, 2D, D]

    w_dd = jnp.stack([params["sa_qkv_w"][0], params["ra_in_w"][0],
                      params["ra_out_w"], params["amlp_w"],
                      params["ro_in_w"][0], params["ro_in_w"][1]])      # [6, D, D]

    w_kv = jnp.stack([
        jnp.concatenate([params["sa_qkv_w"][1], params["sa_qkv_w"][2]], axis=1),
        jnp.concatenate([params["ra_in_w"][1], params["ra_in_w"][2]], axis=1)])   # [2, D, 2D]

    w_gru = jnp.stack([
        jnp.concatenate([params["sa_gru_w"][0], params["sa_gru_w"][1],
                         params["sa_gru_w"][2]], axis=1),
        jnp.concatenate([params["sa_gru_w"][3], params["sa_gru_w"][4],
                         params["sa_gru_w"][5]], axis=1)])              # [2, D, 3D]

    def pad_w(x):                                   # pad a row block to 2D lanes
        return jnp.pad(x, ((0, 0), (0, 2 * D - x.shape[1])))

    misc = {
        "t_w": params["target_w"],
        "t_b": jnp.broadcast_to(params["target_b"], (1, 2 * D)),
        "sa_q_b": params["sa_qkv_b"][0],
        "sa_kv_b": jnp.concatenate([params["sa_qkv_b"][1], params["sa_qkv_b"][2]], axis=1),
        "ra_q_b": params["ra_in_b"][0],
        "ra_kv_b": jnp.concatenate([params["ra_in_b"][1], params["ra_in_b"][2]], axis=1),
        "ra_out_b": params["ra_out_b"],
        "ln_g": params["ln_g"],
        "ln_b": params["ln_b"],
        "amlp_b": params["amlp_b"],
        "ro_q_b": params["ro_in_b"][0],
        "ro_k_b": params["ro_in_b"][1],
    }
    rows = [params["pos_embd"], params["dep_embd"], params["pe"][:n_nodes]]
    rows += [misc[name] for name in _MISC_ROWS]
    rows += [params["gnn_bm"][l] for l in range(L)]
    rows += [params["gnn_bu"][l] for l in range(L)]
    rows.append(params["sa_slots"])
    slab = jnp.concatenate([pad_w(r) for r in rows], axis=0)            # [Vp+Vd+N+misc, 2D]
    return slab, gnn_w, w_dd, w_kv, w_gru


# --------------------------------------------------------------------------
# Forward pass wrapper: one fused pallas_call
# --------------------------------------------------------------------------
def soft_parsing_forward(params, node_pos, edge_index, edge_tag, phrases,
                         *, slot_num=4, num_heads=8, slot_iters=3):
    N = int(node_pos.shape[0])
    E = int(edge_tag.shape[0])
    D = int(params["pos_embd"].shape[1])
    Vp = int(params["pos_embd"].shape[0])
    Vd = int(params["dep_embd"].shape[0])
    L = int(params["gnn_wm_h"].shape[0])
    S = slot_num
    max_len = int(params["pe"].shape[0])
    assert N <= max_len, f"graph has {N} nodes but PositionalEncoding max_len={max_len}"
    assert D % num_heads == 0
    assert S == int(params["sa_slots"].shape[0])
    hd = D // num_heads
    assert S & (S - 1) == 0 and hd & (hd - 1) == 0   # in-kernel head masks use shifts

    # ---- pack indices: one int32 slab (columns) + one dst row ----
    Lmax = max(N, E)
    idx = jnp.zeros((3, Lmax, 1), jnp.int32)
    idx = idx.at[0, :N, 0].set(node_pos.astype(jnp.int32))
    idx = idx.at[1, :E, 0].set(edge_index[0].astype(jnp.int32))
    idx = idx.at[2, :E, 0].set(edge_tag.astype(jnp.int32))
    dst_row = edge_index[1].astype(jnp.int32).reshape(1, E)

    slab, gnn_w, w_dd, w_kv, w_gru = _pack_params(params, N)

    kernel = functools.partial(_fused_kernel, N=N, E=E, D=D, S=S, H=num_heads,
                               L=L, Vp=Vp, Vd=Vd, slot_iters=slot_iters)
    out = pl.pallas_call(
        kernel,
        out_shape=jax.ShapeDtypeStruct((3, S, N), F32),
        in_specs=[VMEM_SPEC] * 7,
        out_specs=VMEM_SPEC,
        scratch_shapes=[pltpu.VMEM((E, 2 * D), F32),     # [h_src | edge_f]
                        pltpu.VMEM((N, 2 * D), F32)],    # [h     | agg   ]
    )(idx, dst_row, slab, gnn_w, w_dd, w_kv, w_gru)

    target_prob = out[0, 0].reshape(N, 1)                # module returns [N, 1]
    context_prob_k = out[1][None]                        # [1, S, N]
    w_r_prob = out[2][None]                              # [1, S, N]
    return target_prob, context_prob_k, w_r_prob, phrases


# --------------------------------------------------------------------------
if __name__ == "__main__":
    key = jax.random.PRNGKey(0)
    pkey, dkey = jax.random.split(key)

    embd_dim, slot_num, layer_num, num_heads = 64, 4, 2, 8
    N, E = 8, 10                                     # nodes / edges (small demo graph)

    params = init_params(pkey, embd_dim=embd_dim, slot_num=slot_num,
                         layer_num=layer_num)

    k1, k2, k3, k4 = jax.random.split(dkey, 4)
    node_pos = jax.random.randint(k1, (N,), 0, 32)
    edge_index = jax.random.randint(k2, (2, E), 0, N)
    edge_tag = jax.random.randint(k3, (E,), 0, 48)
    phrases = jax.random.normal(k4, (N, 32), F32)    # passed through untouched

    target_prob, context_prob_k, w_r_prob, phrases_out = soft_parsing_forward(
        params, node_pos, edge_index, edge_tag, phrases,
        slot_num=slot_num, num_heads=num_heads)
    jax.block_until_ready((target_prob, context_prob_k, w_r_prob, phrases_out))

    assert target_prob.shape == (N, 1)
    assert context_prob_k.shape == (1, slot_num, N)
    assert w_r_prob.shape == (1, slot_num, N)
    assert phrases_out.shape == phrases.shape
    assert bool(jnp.all(jnp.isfinite(target_prob)))
    assert bool(jnp.all(jnp.isfinite(context_prob_k)))
    assert bool(jnp.all(jnp.isfinite(w_r_prob)))
    # probability sanity: softmaxes sum to 1 along the right axes
    assert abs(float(jnp.sum(target_prob)) - 1.0) < 1e-3
    assert bool(jnp.allclose(jnp.sum(context_prob_k, axis=1), 1.0, atol=2e-3))
    assert bool(jnp.allclose(jnp.sum(w_r_prob, axis=-1), 1.0, atol=2e-3))
    print("KERNEL_OK")
</pallas_src>

<mosaic_0001>
module attributes {stable_mosaic.version = 11 : i64} {
  func.func @_fused_kernel(%arg0: memref<3x10x1xi32, #tpu.memory_space<vmem>>, %arg1: memref<1x10xi32, #tpu.memory_space<vmem>>, %arg2: memref<108x128xf32, #tpu.memory_space<vmem>>, %arg3: memref<4x128x64xf32, #tpu.memory_space<vmem>>, %arg4: memref<6x64x64xf32, #tpu.memory_space<vmem>>, %arg5: memref<2x64x128xf32, #tpu.memory_space<vmem>>, %arg6: memref<2x64x192xf32, #tpu.memory_space<vmem>>, %arg7: memref<3x4x8xf32, #tpu.memory_space<vmem>>, %arg8: memref<10x128xf32, #tpu.memory_space<vmem>>, %arg9: memref<8x128xf32, #tpu.memory_space<vmem>>) attributes {dimension_semantics = [], scalar_prefetch = 0 : i64, scratch_operands = 2 : i64, tpu.core_type = #tpu.core_type<tc>} {
    %c0 = arith.constant 0 : index
    %c0_0 = arith.constant 0 : index
    %c0_1 = arith.constant 0 : index
    %0 = vector.load %arg0[%c0, %c0_0, %c0_1] : memref<3x10x1xi32, #tpu.memory_space<vmem>>, vector<1x8x1xi32>
    %1 = vector.shape_cast %0 : vector<1x8x1xi32> to vector<8x1xi32>
    %c1 = arith.constant 1 : index
    %c0_2 = arith.constant 0 : index
    %c0_3 = arith.constant 0 : index
    %2 = vector.load %arg0[%c1, %c0_2, %c0_3] : memref<3x10x1xi32, #tpu.memory_space<vmem>>, vector<1x10x1xi32>
    %3 = vector.shape_cast %2 : vector<1x10x1xi32> to vector<10x1xi32>
    %c2 = arith.constant 2 : index
    %c0_4 = arith.constant 0 : index
    %c0_5 = arith.constant 0 : index
    %4 = vector.load %arg0[%c2, %c0_4, %c0_5] : memref<3x10x1xi32, #tpu.memory_space<vmem>>, vector<1x10x1xi32>
    %5 = vector.shape_cast %4 : vector<1x10x1xi32> to vector<10x1xi32>
    %c0_6 = arith.constant 0 : index
    %c0_7 = arith.constant 0 : index
    %6 = vector.load %arg1[%c0_6, %c0_7] : memref<1x10xi32, #tpu.memory_space<vmem>>, vector<1x10xi32>
    %c0_8 = arith.constant 0 : index
    %c0_9 = arith.constant 0 : index
    %7 = vector.load %arg2[%c0_8, %c0_9] : memref<108x128xf32, #tpu.memory_space<vmem>>, vector<32x64xf32>
    %c32 = arith.constant 32 : index
    %c0_10 = arith.constant 0 : index
    %8 = vector.load %arg2[%c32, %c0_10] : memref<108x128xf32, #tpu.memory_space<vmem>>, vector<48x64xf32>
    %c80 = arith.constant 80 : index
    %c0_11 = arith.constant 0 : index
    %9 = vector.load %arg2[%c80, %c0_11] : memref<108x128xf32, #tpu.memory_space<vmem>>, vector<8x64xf32>
    %10 = tpu.iota {dimensions = array<i32: 1>} : vector<8x32xi32>
    %11 = vector.broadcast %1 : vector<8x1xi32> to vector<8x32xi32>
    %12 = arith.cmpi eq, %10, %11 : vector<8x32xi32>
    %13 = arith.extui %12 : vector<8x32xi1> to vector<8x32xi32>
    %14 = arith.sitofp %13 : vector<8x32xi32> to vector<8x32xf32>
    %15 = arith.truncf %14 : vector<8x32xf32> to vector<8x32xbf16>
    %16 = arith.truncf %7 : vector<32x64xf32> to vector<32x64xbf16>
    %cst = arith.constant dense<0.000000e+00> : vector<8x64xf32>
    %17 = tpu.matmul %15, %16, %cst {dimension_numbers = #tpu.dot_dimension_numbers<[1], [0], [0], [1], [0, 0, 1, 1], [], []>} : vector<8x32xbf16>, vector<32x64xbf16>, vector<8x64xf32> -> vector<8x64xf32>
    %18 = tpu.iota {dimensions = array<i32: 1>} : vector<10x48xi32>
    %19 = vector.broadcast %5 : vector<10x1xi32> to vector<10x48xi32>
    %20 = arith.cmpi eq, %18, %19 : vector<10x48xi32>
    %21 = arith.extui %20 : vector<10x48xi1> to vector<10x48xi32>
    %22 = arith.sitofp %21 : vector<10x48xi32> to vector<10x48xf32>
    %23 = arith.truncf %22 : vector<10x48xf32> to vector<10x48xbf16>
    %24 = arith.truncf %8 : vector<48x64xf32> to vector<48x64xbf16>
    %cst_12 = arith.constant dense<0.000000e+00> : vector<10x64xf32>
    %25 = tpu.matmul %23, %24, %cst_12 {dimension_numbers = #tpu.dot_dimension_numbers<[1], [0], [0], [1], [0, 0, 1, 1], [], []>} : vector<10x48xbf16>, vector<48x64xbf16>, vector<10x64xf32> -> vector<10x64xf32>
    %26 = tpu.iota {dimensions = array<i32: 1>} : vector<10x8xi32>
    %27 = vector.broadcast %3 : vector<10x1xi32> to vector<10x8xi32>
    %28 = arith.cmpi eq, %26, %27 : vector<10x8xi32>
    %29 = arith.extui %28 : vector<10x8xi1> to vector<10x8xi32>
    %30 = arith.sitofp %29 : vector<10x8xi32> to vector<10x8xf32>
    %31 = tpu.iota {dimensions = array<i32: 0>} : vector<8x10xi32>
    %32 = vector.broadcast %6 : vector<1x10xi32> to vector<8x10xi32>
    %33 = arith.cmpi eq, %31, %32 : vector<8x10xi32>
    %34 = arith.extui %33 : vector<8x10xi1> to vector<8x10xi32>
    %35 = arith.sitofp %34 : vector<8x10xi32> to vector<8x10xf32>
    %c0_13 = arith.constant 0 : index
    %c64 = arith.constant 64 : index
    %36 = vector.load %arg8[%c0_13, %c64] : memref<10x128xf32, #tpu.memory_space<vmem>>, vector<10x64xf32>
    tpu.vector_store %arg8[%c0_13, %c64], %25 {strides = array<i32>} : memref<10x128xf32, #tpu.memory_space<vmem>>, vector<10x64xf32>,
    %37 = arith.truncf %30 : vector<10x8xf32> to vector<10x8xbf16>
    %38 = arith.truncf %17 : vector<8x64xf32> to vector<8x64xbf16>
    %cst_14 = arith.constant dense<0.000000e+00> : vector<10x64xf32>
    %39 = tpu.matmul %37, %38, %cst_14 {dimension_numbers = #tpu.dot_dimension_numbers<[1], [0], [0], [1], [0, 0, 1, 1], [], []>} : vector<10x8xbf16>, vector<8x64xbf16>, vector<10x64xf32> -> vector<10x64xf32>
    %c0_15 = arith.constant 0 : index
    %c0_16 = arith.constant 0 : index
    %40 = vector.load %arg8[%c0_15, %c0_16] : memref<10x128xf32, #tpu.memory_space<vmem>>, vector<10x64xf32>
    tpu.vector_store %arg8[%c0_15, %c0_16], %39 {strides = array<i32>} : memref<10x128xf32, #tpu.memory_space<vmem>>, vector<10x64xf32>,
    %c0_17 = arith.constant 0 : index
    %c0_18 = arith.constant 0 : index
    %41 = vector.load %arg8[%c0_17, %c0_18] : memref<10x128xf32, #tpu.memory_space<vmem>>, vector<10x128xf32>
    %c0_19 = arith.constant 0 : index
    %c0_20 = arith.constant 0 : index
    %c0_21 = arith.constant 0 : index
    %42 = vector.load %arg3[%c0_19, %c0_20, %c0_21] : memref<4x128x64xf32, #tpu.memory_space<vmem>>, vector<1x128x64xf32>
    %43 = vector.shape_cast %42 : vector<1x128x64xf32> to vector<128x64xf32>
    %44 = arith.truncf %41 : vector<10x128xf32> to vector<10x128xbf16>
    %45 = arith.truncf %43 : vector<128x64xf32> to vector<128x64xbf16>
    %cst_22 = arith.constant dense<0.000000e+00> : vector<10x64xf32>
    %46 = tpu.matmul %44, %45, %cst_22 {dimension_numbers = #tpu.dot_dimension_numbers<[1], [0], [0], [1], [0, 0, 1, 1], [], []>} : vector<10x128xbf16>, vector<128x64xbf16>, vector<10x64xf32> -> vector<10x64xf32>
    %c100 = arith.constant 100 : index
    %c0_23 = arith.constant 0 : index
    %47 = vector.load %arg2[%c100, %c0_23] : memref<108x128xf32, #tpu.memory_space<vmem>>, vector<1x64xf32>
    %48 = vector.broadcast %47 : vector<1x64xf32> to vector<10x64xf32>
    %49 = arith.addf %46, %48 : vector<10x64xf32>
    %cst_24 = arith.constant 0.000000e+00 : f32
    %50 = vector.broadcast %cst_24 : f32 to vector<10x64xf32>
    %51 = arith.cmpf ogt, %49, %50 : vector<10x64xf32>
    %cst_25 = arith.constant 0.00999999977 : f32
    %52 = vector.broadcast %cst_25 : f32 to vector<10x64xf32>
    %53 = arith.mulf %52, %49 : vector<10x64xf32>
    %54 = arith.select %51, %49, %53 : vector<10x64xi1>, vector<10x64xf32>
    %55 = arith.truncf %35 : vector<8x10xf32> to vector<8x10xbf16>
    %56 = arith.truncf %54 : vector<10x64xf32> to vector<10x64xbf16>
    %cst_26 = arith.constant dense<0.000000e+00> : vector<8x64xf32>
    %57 = tpu.matmul %55, %56, %cst_26 {dimension_numbers = #tpu.dot_dimension_numbers<[1], [0], [0], [1], [0, 0, 1, 1], [], []>} : vector<8x10xbf16>, vector<10x64xbf16>, vector<8x64xf32> -> vector<8x64xf32>
    %c0_27 = arith.constant 0 : index
    %c0_28 = arith.constant 0 : index
    %58 = vector.load %arg9[%c0_27, %c0_28] : memref<8x128xf32, #tpu.memory_space<vmem>>, vector<8x64xf32>
    tpu.vector_store %arg9[%c0_27, %c0_28], %17 {strides = array<i32>} : memref<8x128xf32, #tpu.memory_space<vmem>>, vector<8x64xf32>,
    %c0_29 = arith.constant 0 : index
    %c64_30 = arith.constant 64 : index
    %59 = vector.load %arg9[%c0_29, %c64_30] : memref<8x128xf32, #tpu.memory_space<vmem>>, vector<8x64xf32>
    tpu.vector_store %arg9[%c0_29, %c64_30], %57 {strides = array<i32>} : memref<8x128xf32, #tpu.memory_space<vmem>>, vector<8x64xf32>,
    %c0_31 = arith.constant 0 : index
    %c0_32 = arith.constant 0 : index
    %60 = vector.load %arg9[%c0_31, %c0_32] : memref<8x128xf32, #tpu.memory_space<vmem>>, vector<8x128xf32>
    %c1_33 = arith.constant 1 : index
    %c0_34 = arith.constant 0 : index
    %c0_35 = arith.constant 0 : index
    %61 = vector.load %arg3[%c1_33, %c0_34, %c0_35] : memref<4x128x64xf32, #tpu.memory_space<vmem>>, vector<1x128x64xf32>
    %62 = vector.shape_cast %61 : vector<1x128x64xf32> to vector<128x64xf32>
    %63 = arith.truncf %60 : vector<8x128xf32> to vector<8x128xbf16>
    %64 = arith.truncf %62 : vector<128x64xf32> to vector<128x64xbf16>
    %cst_36 = arith.constant dense<0.000000e+00> : vector<8x64xf32>
    %65 = tpu.matmul %63, %64, %cst_36 {dimension_numbers = #tpu.dot_dimension_numbers<[1], [0], [0], [1], [0, 0, 1, 1], [], []>} : vector<8x128xbf16>, vector<128x64xbf16>, vector<8x64xf32> -> vector<8x64xf32>
    %c102 = arith.constant 102 : index
    %c0_37 = arith.constant 0 : index
    %66 = vector.load %arg2[%c102, %c0_37] : memref<108x128xf32, #tpu.memory_space<vmem>>, vector<1x64xf32>
    %67 = vector.broadcast %66 : vector<1x64xf32> to vector<8x64xf32>
    %68 = arith.addf %65, %67 : vector<8x64xf32>
    %cst_38 = arith.constant 0.000000e+00 : f32
    %69 = vector.broadcast %cst_38 : f32 to vector<8x64xf32>
    %70 = arith.cmpf ogt, %68, %69 : vector<8x64xf32>
    %cst_39 = arith.constant 0.00999999977 : f32
    %71 = vector.broadcast %cst_39 : f32 to vector<8x64xf32>
    %72 = arith.mulf %71, %68 : vector<8x64xf32>
    %73 = arith.select %70, %68, %72 : vector<8x64xi1>, vector<8x64xf32>
    %74 = arith.truncf %30 : vector<10x8xf32> to vector<10x8xbf16>
    %75 = arith.truncf %73 : vector<8x64xf32> to vector<8x64xbf16>
    %cst_40 = arith.constant dense<0.000000e+00> : vector<10x64xf32>
    %76 = tpu.matmul %74, %75, %cst_40 {dimension_numbers = #tpu.dot_dimension_numbers<[1], [0], [0], [1], [0, 0, 1, 1], [], []>} : vector<10x8xbf16>, vector<8x64xbf16>, vector<10x64xf32> -> vector<10x64xf32>
    %c0_41 = arith.constant 0 : index
    %c0_42 = arith.constant 0 : index
    %77 = vector.load %arg8[%c0_41, %c0_42] : memref<10x128xf32, #tpu.memory_space<vmem>>, vector<10x64xf32>
    tpu.vector_store %arg8[%c0_41, %c0_42], %76 {strides = array<i32>} : memref<10x128xf32, #tpu.memory_space<vmem>>, vector<10x64xf32>,
    %c0_43 = arith.constant 0 : index
    %c0_44 = arith.constant 0 : index
    %78 = vector.load %arg8[%c0_43, %c0_44] : memref<10x128xf32, #tpu.memory_space<vmem>>, vector<10x128xf32>
    %c2_45 = arith.constant 2 : index
    %c0_46 = arith.constant 0 : index
    %c0_47 = arith.constant 0 : index
    %79 = vector.load %arg3[%c2_45, %c0_46, %c0_47] : memref<4x128x64xf32, #tpu.memory_space<vmem>>, vector<1x128x64xf32>
    %80 = vector.shape_cast %79 : vector<1x128x64xf32> to vector<128x64xf32>
    %81 = arith.truncf %78 : vector<10x128xf32> to vector<10x128xbf16>
    %82 = arith.truncf %80 : vector<128x64xf32> to vector<128x64xbf16>
    %cst_48 = arith.constant dense<0.000000e+00> : vector<10x64xf32>
    %83 = tpu.matmul %81, %82, %cst_48 {dimension_numbers = #tpu.dot_dimension_numbers<[1], [0], [0], [1], [0, 0, 1, 1], [], []>} : vector<10x128xbf16>, vector<128x64xbf16>, vector<10x64xf32> -> vector<10x64xf32>
    %c101 = arith.constant 101 : index
    %c0_49 = arith.constant 0 : index
    %84 = vector.load %arg2[%c101, %c0_49] : memref<108x128xf32, #tpu.memory_space<vmem>>, vector<1x64xf32>
    %85 = vector.broadcast %84 : vector<1x64xf32> to vector<10x64xf32>
    %86 = arith.addf %83, %85 : vector<10x64xf32>
    %cst_50 = arith.constant 0.000000e+00 : f32
    %87 = vector.broadcast %cst_50 : f32 to vector<10x64xf32>
    %88 = arith.cmpf ogt, %86, %87 : vector<10x64xf32>
    %cst_51 = arith.constant 0.00999999977 : f32
    %89 = vector.broadcast %cst_51 : f32 to vector<10x64xf32>
    %90 = arith.mulf %89, %86 : vector<10x64xf32>
    %91 = arith.select %88, %86, %90 : vector<10x64xi1>, vector<10x64xf32>
    %92 = arith.truncf %35 : vector<8x10xf32> to vector<8x10xbf16>
    %93 = arith.truncf %91 : vector<10x64xf32> to vector<10x64xbf16>
    %cst_52 = arith.constant dense<0.000000e+00> : vector<8x64xf32>
    %94 = tpu.matmul %92, %93, %cst_52 {dimension_numbers = #tpu.dot_dimension_numbers<[1], [0], [0], [1], [0, 0, 1, 1], [], []>} : vector<8x10xbf16>, vector<10x64xbf16>, vector<8x64xf32> -> vector<8x64xf32>
    %c0_53 = arith.constant 0 : index
    %c0_54 = arith.constant 0 : index
    %95 = vector.load %arg9[%c0_53, %c0_54] : memref<8x128xf32, #tpu.memory_space<vmem>>, vector<8x64xf32>
    tpu.vector_store %arg9[%c0_53, %c0_54], %73 {strides = array<i32>} : memref<8x128xf32, #tpu.memory_space<vmem>>, vector<8x64xf32>,
    %c0_55 = arith.constant 0 : index
    %c64_56 = arith.constant 64 : index
    %96 = vector.load %arg9[%c0_55, %c64_56] : memref<8x128xf32, #tpu.memory_space<vmem>>, vector<8x64xf32>
    tpu.vector_store %arg9[%c0_55, %c64_56], %94 {strides = array<i32>} : memref<8x128xf32, #tpu.memory_space<vmem>>, vector<8x64xf32>,
    %c0_57 = arith.constant 0 : index
    %c0_58 = arith.constant 0 : index
    %97 = vector.load %arg9[%c0_57, %c0_58] : memref<8x128xf32, #tpu.memory_space<vmem>>, vector<8x128xf32>
    %c3 = arith.constant 3 : index
    %c0_59 = arith.constant 0 : index
    %c0_60 = arith.constant 0 : index
    %98 = vector.load %arg3[%c3, %c0_59, %c0_60] : memref<4x128x64xf32, #tpu.memory_space<vmem>>, vector<1x128x64xf32>
    %99 = vector.shape_cast %98 : vector<1x128x64xf32> to vector<128x64xf32>
    %100 = arith.truncf %97 : vector<8x128xf32> to vector<8x128xbf16>
    %101 = arith.truncf %99 : vector<128x64xf32> to vector<128x64xbf16>
    %cst_61 = arith.constant dense<0.000000e+00> : vector<8x64xf32>
    %102 = tpu.matmul %100, %101, %cst_61 {dimension_numbers = #tpu.dot_dimension_numbers<[1], [0], [0], [1], [0, 0, 1, 1], [], []>} : vector<8x128xbf16>, vector<128x64xbf16>, vector<8x64xf32> -> vector<8x64xf32>
    %c103 = arith.constant 103 : index
    %c0_62 = arith.constant 0 : index
    %103 = vector.load %arg2[%c103, %c0_62] : memref<108x128xf32, #tpu.memory_space<vmem>>, vector<1x64xf32>
    %104 = vector.broadcast %103 : vector<1x64xf32> to vector<8x64xf32>
    %105 = arith.addf %102, %104 : vector<8x64xf32>
    %cst_63 = arith.constant 0.000000e+00 : f32
    %106 = vector.broadcast %cst_63 : f32 to vector<8x64xf32>
    %107 = arith.cmpf ogt, %105, %106 : vector<8x64xf32>
    %cst_64 = arith.constant 0.00999999977 : f32
    %108 = vector.broadcast %cst_64 : f32 to vector<8x64xf32>
    %109 = arith.mulf %108, %105 : vector<8x64xf32>
    %110 = arith.select %107, %105, %109 : vector<8x64xi1>, vector<8x64xf32>
    %cst_65 = arith.constant 0.000000e+00 : f32
    %111 = vector.broadcast %cst_65 : f32 to vector<8x64xf32>
    %112 = arith.cmpf ogt, %110, %111 : vector<8x64xf32>
    %cst_66 = arith.constant 0.00999999977 : f32
    %113 = vector.broadcast %cst_66 : f32 to vector<8x64xf32>
    %114 = arith.mulf %113, %110 : vector<8x64xf32>
    %115 = arith.select %112, %110, %114 : vector<8x64xi1>, vector<8x64xf32>
    %116 = arith.addf %115, %9 : vector<8x64xf32>
    %c88 = arith.constant 88 : index
    %c0_67 = arith.constant 0 : index
    %117 = vector.load %arg2[%c88, %c0_67] : memref<108x128xf32, #tpu.memory_space<vmem>>, vector<1x64xf32>
    %118 = arith.truncf %117 : vector<1x64xf32> to vector<1x64xbf16>
    %119 = arith.truncf %116 : vector<8x64xf32> to vector<8x64xbf16>
    %cst_68 = arith.constant dense<0.000000e+00> : vector<1x8xf32>
    %120 = tpu.matmul %118, %119, %cst_68 {dimension_numbers = #tpu.dot_dimension_numbers<[1], [1], [0], [0], [0, 0, 1, 0], [], []>} : vector<1x64xbf16>, vector<8x64xbf16>, vector<1x8xf32> -> vector<1x8xf32>
    %c89 = arith.constant 89 : index
    %c0_69 = arith.constant 0 : index
    %121 = vector.load %arg2[%c89, %c0_69] : memref<108x128xf32, #tpu.memory_space<vmem>>, vector<1x1xf32>
    %122 = vector.broadcast %121 : vector<1x1xf32> to vector<1x8xf32>
    %123 = arith.addf %120, %122 : vector<1x8xf32>
    %cst_70 = arith.constant dense<0xFF800000> : vector<1xf32>
    %124 = vector.multi_reduction <maximumf>, %123, %cst_70 [1] : vector<1x8xf32> to vector<1xf32>
    %125 = vector.shape_cast %124 : vector<1xf32> to vector<1x1xf32>
    %126 = vector.broadcast %125 : vector<1x1xf32> to vector<1x8xf32>
    %127 = arith.subf %123, %126 : vector<1x8xf32>
    %128 = math.exp %127 : vector<1x8xf32>
    %cst_71 = arith.constant dense<0.000000e+00> : vector<1xf32>
    %129 = vector.multi_reduction <add>, %128, %cst_71 [1] : vector<1x8xf32> to vector<1xf32>
    %130 = vector.shape_cast %129 : vector<1xf32> to vector<1x1xf32>
    %131 = vector.broadcast %130 : vector<1x1xf32> to vector<1x8xf32>
    %132 = arith.divf %128, %131 : vector<1x8xf32>
    %cst_72 = arith.constant dense<0.000000e+00> : vector<8xf32>
    %133 = vector.multi_reduction <add>, %116, %cst_72 [1] : vector<8x64xf32> to vector<8xf32>
    %134 = vector.shape_cast %133 : vector<8xf32> to vector<8x1xf32>
    %cst_73 = arith.constant 6.400000e+01 : f32
    %135 = vector.broadcast %cst_73 : f32 to vector<8x1xf32>
    %136 = arith.divf %134, %135 : vector<8x1xf32>
    %137 = vector.broadcast %136 : vector<8x1xf32> to vector<8x64xf32>
    %138 = arith.subf %116, %137 : vector<8x64xf32>
    %139 = arith.mulf %138, %138 : vector<8x64xf32>
    %cst_74 = arith.constant dense<0.000000e+00> : vector<8xf32>
    %140 = vector.multi_reduction <add>, %139, %cst_74 [1] : vector<8x64xf32> to vector<8xf32>
    %141 = vector.shape_cast %140 : vector<8xf32> to vector<8x1xf32>
    %cst_75 = arith.constant 6.400000e+01 : f32
    %142 = vector.broadcast %cst_75 : f32 to vector<8x1xf32>
    %143 = arith.divf %141, %142 : vector<8x1xf32>
    %144 = vector.broadcast %136 : vector<8x1xf32> to vector<8x64xf32>
    %145 = arith.subf %116, %144 : vector<8x64xf32>
    %cst_76 = arith.constant 9.99999974E-6 : f32
    %146 = vector.broadcast %cst_76 : f32 to vector<8x1xf32>
    %147 = arith.addf %143, %146 : vector<8x1xf32>
    %148 = math.rsqrt %147 : vector<8x1xf32>
    %149 = vector.broadcast %148 : vector<8x1xf32> to vector<8x64xf32>
    %150 = arith.mulf %145, %149 : vector<8x64xf32>
    %c0_77 = arith.constant 0 : index
    %c0_78 = arith.constant 0 : index
    %c0_79 = arith.constant 0 : index
    %151 = vector.load %arg5[%c0_77, %c0_78, %c0_79] : memref<2x64x128xf32, #tpu.memory_space<vmem>>, vector<1x64x128xf32>
    %152 = vector.shape_cast %151 : vector<1x64x128xf32> to vector<64x128xf32>
    %153 = arith.truncf %150 : vector<8x64xf32> to vector<8x64xbf16>
    %154 = arith.truncf %152 : vector<64x128xf32> to vector<64x128xbf16>
    %cst_80 = arith.constant dense<0.000000e+00> : vector<8x128xf32>
    %155 = tpu.matmul %153, %154, %cst_80 {dimension_numbers = #tpu.dot_dimension_numbers<[1], [0], [0], [1], [0, 0, 1, 1], [], []>} : vector<8x64xbf16>, vector<64x128xbf16>, vector<8x128xf32> -> vector<8x128xf32>
    %c91 = arith.constant 91 : index
    %c0_81 = arith.constant 0 : index
    %156 = vector.load %arg2[%c91, %c0_81] : memref<108x128xf32, #tpu.memory_space<vmem>>, vector<1x128xf32>
    %157 = vector.broadcast %156 : vector<1x128xf32> to vector<8x128xf32>
    %158 = arith.addf %155, %157 : vector<8x128xf32>
    %159 = vector.extract_strided_slice %158 {offsets = [0, 0], sizes = [8, 64], strides = [1, 1]} : vector<8x128xf32> to vector<8x64xf32>
    %160 = vector.extract_strided_slice %158 {offsets = [0, 64], sizes = [8, 64], strides = [1, 1]} : vector<8x128xf32> to vector<8x64xf32>
    %c104 = arith.constant 104 : index
    %c0_82 = arith.constant 0 : index
    %161 = vector.load %arg2[%c104, %c0_82] : memref<108x128xf32, #tpu.memory_space<vmem>>, vector<4x64xf32>
    %c0_83 = arith.constant 0 : index
    %c0_84 = arith.constant 0 : index
    %c0_85 = arith.constant 0 : index
    %162 = vector.load %arg4[%c0_83, %c0_84, %c0_85] : memref<6x64x64xf32, #tpu.memory_space<vmem>>, vector<1x64x64xf32>
    %163 = vector.shape_cast %162 : vector<1x64x64xf32> to vector<64x64xf32>
    %c90 = arith.constant 90 : index
    %c0_86 = arith.constant 0 : index
    %164 = vector.load %arg2[%c90, %c0_86] : memref<108x128xf32, #tpu.memory_space<vmem>>, vector<1x64xf32>
    %c0_87 = arith.constant 0 : index
    %c0_88 = arith.constant 0 : index
    %c0_89 = arith.constant 0 : index
    %165 = vector.load %arg6[%c0_87, %c0_88, %c0_89] : memref<2x64x192xf32, #tpu.memory_space<vmem>>, vector<1x64x192xf32>
    %166 = vector.shape_cast %165 : vector<1x64x192xf32> to vector<64x192xf32>
    %c1_90 = arith.constant 1 : index
    %c0_91 = arith.constant 0 : index
    %c0_92 = arith.constant 0 : index
    %167 = vector.load %arg6[%c1_90, %c0_91, %c0_92] : memref<2x64x192xf32, #tpu.memory_space<vmem>>, vector<1x64x192xf32>
    %168 = vector.shape_cast %167 : vector<1x64x192xf32> to vector<64x192xf32>
    %cst_93 = arith.constant dense<0.000000e+00> : vector<4xf32>
    %169 = vector.multi_reduction <add>, %161, %cst_93 [1] : vector<4x64xf32> to vector<4xf32>
    %170 = vector.shape_cast %169 : vector<4xf32> to vector<4x1xf32>
    %cst_94 = arith.constant 6.400000e+01 : f32
    %171 = vector.broadcast %cst_94 : f32 to vector<4x1xf32>
    %172 = arith.divf %170, %171 : vector<4x1xf32>
    %173 = vector.broadcast %172 : vector<4x1xf32> to vector<4x64xf32>
    %174 = arith.subf %161, %173 : vector<4x64xf32>
    %175 = arith.mulf %174, %174 : vector<4x64xf32>
    %cst_95 = arith.constant dense<0.000000e+00> : vector<4xf32>
    %176 = vector.multi_reduction <add>, %175, %cst_95 [1] : vector<4x64xf32> to vector<4xf32>
    %177 = vector.shape_cast %176 : vector<4xf32> to vector<4x1xf32>
    %cst_96 = arith.constant 6.400000e+01 : f32
    %178 = vector.broadcast %cst_96 : f32 to vector<4x1xf32>
    %179 = arith.divf %177, %178 : vector<4x1xf32>
    %180 = vector.broadcast %172 : vector<4x1xf32> to vector<4x64xf32>
    %181 = arith.subf %161, %180 : vector<4x64xf32>
    %cst_97 = arith.constant 9.99999974E-6 : f32
    %182 = vector.broadcast %cst_97 : f32 to vector<4x1xf32>
    %183 = arith.addf %179, %182 : vector<4x1xf32>
    %184 = math.rsqrt %183 : vector<4x1xf32>
    %185 = vector.broadcast %184 : vector<4x1xf32> to vector<4x64xf32>
    %186 = arith.mulf %181, %185 : vector<4x64xf32>
    %187 = arith.truncf %186 : vector<4x64xf32> to vector<4x64xbf16>
    %188 = arith.truncf %163 : vector<64x64xf32> to vector<64x64xbf16>
    %cst_98 = arith.constant dense<0.000000e+00> : vector<4x64xf32>
    %189 = tpu.matmul %187, %188, %cst_98 {dimension_numbers = #tpu.dot_dimension_numbers<[1], [0], [0], [1], [0, 0, 1, 1], [], []>} : vector<4x64xbf16>, vector<64x64xbf16>, vector<4x64xf32> -> vector<4x64xf32>
    %190 = vector.broadcast %164 : vector<1x64xf32> to vector<4x64xf32>
    %191 = arith.addf %189, %190 : vector<4x64xf32>
    %cst_99 = arith.constant 1.250000e-01 : f32
    %192 = vector.broadcast %cst_99 : f32 to vector<4x64xf32>
    %193 = arith.mulf %191, %192 : vector<4x64xf32>
    %194 = arith.truncf %193 : vector<4x64xf32> to vector<4x64xbf16>
    %195 = arith.truncf %159 : vector<8x64xf32> to vector<8x64xbf16>
    %cst_100 = arith.constant dense<0.000000e+00> : vector<4x8xf32>
    %196 = tpu.matmul %194, %195, %cst_100 {dimension_numbers = #tpu.dot_dimension_numbers<[1], [1], [0], [0], [0, 0, 1, 0], [], []>} : vector<4x64xbf16>, vector<8x64xbf16>, vector<4x8xf32> -> vector<4x8xf32>
    %cst_101 = arith.constant dense<0xFF800000> : vector<8xf32>
    %197 = vector.multi_reduction <maximumf>, %196, %cst_101 [0] : vector<4x8xf32> to vector<8xf32>
    %198 = vector.shape_cast %197 : vector<8xf32> to vector<1x8xf32>
    %199 = vector.broadcast %198 : vector<1x8xf32> to vector<4x8xf32>
    %200 = arith.subf %196, %199 : vector<4x8xf32>
    %201 = math.exp %200 : vector<4x8xf32>
    %cst_102 = arith.constant dense<0.000000e+00> : vector<8xf32>
    %202 = vector.multi_reduction <add>, %201, %cst_102 [0] : vector<4x8xf32> to vector<8xf32>
    %203 = vector.shape_cast %202 : vector<8xf32> to vector<1x8xf32>
    %204 = vector.broadcast %203 : vector<1x8xf32> to vector<4x8xf32>
    %205 = arith.divf %201, %204 : vector<4x8xf32>
    %cst_103 = arith.constant dense<0.000000e+00> : vector<4xf32>
    %206 = vector.multi_reduction <add>, %205, %cst_103 [1] : vector<4x8xf32> to vector<4xf32>
    %207 = vector.shape_cast %206 : vector<4xf32> to vector<4x1xf32>
    %cst_104 = arith.constant 9.99999993E-9 : f32
    %208 = vector.broadcast %cst_104 : f32 to vector<4x1xf32>
    %209 = arith.addf %207, %208 : vector<4x1xf32>
    %210 = vector.broadcast %209 : vector<4x1xf32> to vector<4x8xf32>
    %211 = arith.divf %205, %210 : vector<4x8xf32>
    %212 = arith.truncf %211 : vector<4x8xf32> to vector<4x8xbf16>
    %213 = arith.truncf %160 : vector<8x64xf32> to vector<8x64xbf16>
    %cst_105 = arith.constant dense<0.000000e+00> : vector<4x64xf32>
    %214 = tpu.matmul %212, %213, %cst_105 {dimension_numbers = #tpu.dot_dimension_numbers<[1], [0], [0], [1], [0, 0, 1, 1], [], []>} : vector<4x8xbf16>, vector<8x64xbf16>, vector<4x64xf32> -> vector<4x64xf32>
    %215 = arith.truncf %214 : vector<4x64xf32> to vector<4x64xbf16>
    %216 = arith.truncf %166 : vector<64x192xf32> to vector<64x192xbf16>
    %cst_106 = arith.constant dense<0.000000e+00> : vector<4x192xf32>
    %217 = tpu.matmul %215, %216, %cst_106 {dimension_numbers = #tpu.dot_dimension_numbers<[1], [0], [0], [1], [0, 0, 1, 1], [], []>} : vector<4x64xbf16>, vector<64x192xbf16>, vector<4x192xf32> -> vector<4x192xf32>
    %218 = arith.truncf %161 : vector<4x64xf32> to vector<4x64xbf16>
    %219 = arith.truncf %168 : vector<64x192xf32> to vector<64x192xbf16>
    %cst_107 = arith.constant dense<0.000000e+00> : vector<4x192xf32>
    %220 = tpu.matmul %218, %219, %cst_107 {dimension_numbers = #tpu.dot_dimension_numbers<[1], [0], [0], [1], [0, 0, 1, 1], [], []>} : vector<4x64xbf16>, vector<64x192xbf16>, vector<4x192xf32> -> vector<4x192xf32>
    %221 = vector.extract_strided_slice %217 {offsets = [0, 0], sizes = [4, 64], strides = [1, 1]} : vector<4x192xf32> to vector<4x64xf32>
    %222 = vector.extract_strided_slice %220 {offsets = [0, 0], sizes = [4, 64], strides = [1, 1]} : vector<4x192xf32> to vector<4x64xf32>
    %223 = arith.addf %221, %222 : vector<4x64xf32>
    %224 = arith.negf %223 : vector<4x64xf32>
    %225 = math.exp %224 : vector<4x64xf32>
    %cst_108 = arith.constant 1.000000e+00 : f32
    %226 = vector.broadcast %cst_108 : f32 to vector<4x64xf32>
    %227 = arith.addf %226, %225 : vector<4x64xf32>
    %228 = arith.divf %226, %227 : vector<4x64xf32>
    %229 = vector.extract_strided_slice %217 {offsets = [0, 64], sizes = [4, 64], strides = [1, 1]} : vector<4x192xf32> to vector<4x64xf32>
    %230 = vector.extract_strided_slice %220 {offsets = [0, 64], sizes = [4, 64], strides = [1, 1]} : vector<4x192xf32> to vector<4x64xf32>
    %231 = arith.addf %229, %230 : vector<4x64xf32>
    %232 = arith.negf %231 : vector<4x64xf32>
    %233 = math.exp %232 : vector<4x64xf32>
    %cst_109 = arith.constant 1.000000e+00 : f32
    %234 = vector.broadcast %cst_109 : f32 to vector<4x64xf32>
    %235 = arith.addf %234, %233 : vector<4x64xf32>
    %236 = arith.divf %234, %235 : vector<4x64xf32>
    %237 = vector.extract_strided_slice %217 {offsets = [0, 128], sizes = [4, 64], strides = [1, 1]} : vector<4x192xf32> to vector<4x64xf32>
    %238 = vector.extract_strided_slice %220 {offsets = [0, 128], sizes = [4, 64], strides = [1, 1]} : vector<4x192xf32> to vector<4x64xf32>
    %239 = arith.mulf %228, %238 : vector<4x64xf32>
    %240 = arith.addf %237, %239 : vector<4x64xf32>
    %241 = math.tanh %240 : vector<4x64xf32>
    %cst_110 = arith.constant 1.000000e+00 : f32
    %242 = vector.broadcast %cst_110 : f32 to vector<4x64xf32>
    %243 = arith.subf %242, %236 : vector<4x64xf32>
    %244 = arith.mulf %243, %241 : vector<4x64xf32>
    %245 = arith.mulf %236, %161 : vector<4x64xf32>
    %246 = arith.addf %244, %245 : vector<4x64xf32>
    %cst_111 = arith.constant dense<0.000000e+00> : vector<4xf32>
    %247 = vector.multi_reduction <add>, %246, %cst_111 [1] : vector<4x64xf32> to vector<4xf32>
    %248 = vector.shape_cast %247 : vector<4xf32> to vector<4x1xf32>
    %cst_112 = arith.constant 6.400000e+01 : f32
    %249 = vector.broadcast %cst_112 : f32 to vector<4x1xf32>
    %250 = arith.divf %248, %249 : vector<4x1xf32>
    %251 = vector.broadcast %250 : vector<4x1xf32> to vector<4x64xf32>
    %252 = arith.subf %246, %251 : vector<4x64xf32>
    %253 = arith.mulf %252, %252 : vector<4x64xf32>
    %cst_113 = arith.constant dense<0.000000e+00> : vector<4xf32>
    %254 = vector.multi_reduction <add>, %253, %cst_113 [1] : vector<4x64xf32> to vector<4xf32>
    %255 = vector.shape_cast %254 : vector<4xf32> to vector<4x1xf32>
    %cst_114 = arith.constant 6.400000e+01 : f32
    %256 = vector.broadcast %cst_114 : f32 to vector<4x1xf32>
    %257 = arith.divf %255, %256 : vector<4x1xf32>
    %258 = vector.broadcast %250 : vector<4x1xf32> to vector<4x64xf32>
    %259 = arith.subf %246, %258 : vector<4x64xf32>
    %cst_115 = arith.constant 9.99999974E-6 : f32
    %260 = vector.broadcast %cst_115 : f32 to vector<4x1xf32>
    %261 = arith.addf %257, %260 : vector<4x1xf32>
    %262 = math.rsqrt %261 : vector<4x1xf32>
    %263 = vector.broadcast %262 : vector<4x1xf32> to vector<4x64xf32>
    %264 = arith.mulf %259, %263 : vector<4x64xf32>
    %265 = arith.truncf %264 : vector<4x64xf32> to vector<4x64xbf16>
    %266 = arith.truncf %163 : vector<64x64xf32> to vector<64x64xbf16>
    %cst_116 = arith.constant dense<0.000000e+00> : vector<4x64xf32>
    %267 = tpu.matmul %265, %266, %cst_116 {dimension_numbers = #tpu.dot_dimension_numbers<[1], [0], [0], [1], [0, 0, 1, 1], [], []>} : vector<4x64xbf16>, vector<64x64xbf16>, vector<4x64xf32> -> vector<4x64xf32>
    %268 = vector.broadcast %164 : vector<1x64xf32> to vector<4x64xf32>
    %269 = arith.addf %267, %268 : vector<4x64xf32>
    %cst_117 = arith.constant 1.250000e-01 : f32
    %270 = vector.broadcast %cst_117 : f32 to vector<4x64xf32>
    %271 = arith.mulf %269, %270 : vector<4x64xf32>
    %272 = arith.truncf %271 : vector<4x64xf32> to vector<4x64xbf16>
    %273 = arith.truncf %159 : vector<8x64xf32> to vector<8x64xbf16>
    %cst_118 = arith.constant dense<0.000000e+00> : vector<4x8xf32>
    %274 = tpu.matmul %272, %273, %cst_118 {dimension_numbers = #tpu.dot_dimension_numbers<[1], [1], [0], [0], [0, 0, 1, 0], [], []>} : vector<4x64xbf16>, vector<8x64xbf16>, vector<4x8xf32> -> vector<4x8xf32>
    %cst_119 = arith.constant dense<0xFF800000> : vector<8xf32>
    %275 = vector.multi_reduction <maximumf>, %274, %cst_119 [0] : vector<4x8xf32> to vector<8xf32>
    %276 = vector.shape_cast %275 : vector<8xf32> to vector<1x8xf32>
    %277 = vector.broadcast %276 : vector<1x8xf32> to vector<4x8xf32>
    %278 = arith.subf %274, %277 : vector<4x8xf32>
    %279 = math.exp %278 : vector<4x8xf32>
    %cst_120 = arith.constant dense<0.000000e+00> : vector<8xf32>
    %280 = vector.multi_reduction <add>, %279, %cst_120 [0] : vector<4x8xf32> to vector<8xf32>
    %281 = vector.shape_cast %280 : vector<8xf32> to vector<1x8xf32>
    %282 = vector.broadcast %281 : vector<1x8xf32> to vector<4x8xf32>
    %283 = arith.divf %279, %282 : vector<4x8xf32>
    %cst_121 = arith.constant dense<0.000000e+00> : vector<4xf32>
    %284 = vector.multi_reduction <add>, %283, %cst_121 [1] : vector<4x8xf32> to vector<4xf32>
    %285 = vector.shape_cast %284 : vector<4xf32> to vector<4x1xf32>
    %cst_122 = arith.constant 9.99999993E-9 : f32
    %286 = vector.broadcast %cst_122 : f32 to vector<4x1xf32>
    %287 = arith.addf %285, %286 : vector<4x1xf32>
    %288 = vector.broadcast %287 : vector<4x1xf32> to vector<4x8xf32>
    %289 = arith.divf %283, %288 : vector<4x8xf32>
    %290 = arith.truncf %289 : vector<4x8xf32> to vector<4x8xbf16>
    %291 = arith.truncf %160 : vector<8x64xf32> to vector<8x64xbf16>
    %cst_123 = arith.constant dense<0.000000e+00> : vector<4x64xf32>
    %292 = tpu.matmul %290, %291, %cst_123 {dimension_numbers = #tpu.dot_dimension_numbers<[1], [0], [0], [1], [0, 0, 1, 1], [], []>} : vector<4x8xbf16>, vector<8x64xbf16>, vector<4x64xf32> -> vector<4x64xf32>
    %293 = arith.truncf %292 : vector<4x64xf32> to vector<4x64xbf16>
    %294 = arith.truncf %166 : vector<64x192xf32> to vector<64x192xbf16>
    %cst_124 = arith.constant dense<0.000000e+00> : vector<4x192xf32>
    %295 = tpu.matmul %293, %294, %cst_124 {dimension_numbers = #tpu.dot_dimension_numbers<[1], [0], [0], [1], [0, 0, 1, 1], [], []>} : vector<4x64xbf16>, vector<64x192xbf16>, vector<4x192xf32> -> vector<4x192xf32>
    %296 = arith.truncf %246 : vector<4x64xf32> to vector<4x64xbf16>
    %297 = arith.truncf %168 : vector<64x192xf32> to vector<64x192xbf16>
    %cst_125 = arith.constant dense<0.000000e+00> : vector<4x192xf32>
    %298 = tpu.matmul %296, %297, %cst_125 {dimension_numbers = #tpu.dot_dimension_numbers<[1], [0], [0], [1], [0, 0, 1, 1], [], []>} : vector<4x64xbf16>, vector<64x192xbf16>, vector<4x192xf32> -> vector<4x192xf32>
    %299 = vector.extract_strided_slice %295 {offsets = [0, 0], sizes = [4, 64], strides = [1, 1]} : vector<4x192xf32> to vector<4x64xf32>
    %300 = vector.extract_strided_slice %298 {offsets = [0, 0], sizes = [4, 64], strides = [1, 1]} : vector<4x192xf32> to vector<4x64xf32>
    %301 = arith.addf %299, %300 : vector<4x64xf32>
    %302 = arith.negf %301 : vector<4x64xf32>
    %303 = math.exp %302 : vector<4x64xf32>
    %cst_126 = arith.constant 1.000000e+00 : f32
    %304 = vector.broadcast %cst_126 : f32 to vector<4x64xf32>
    %305 = arith.addf %304, %303 : vector<4x64xf32>
    %306 = arith.divf %304, %305 : vector<4x64xf32>
    %307 = vector.extract_strided_slice %295 {offsets = [0, 64], sizes = [4, 64], strides = [1, 1]} : vector<4x192xf32> to vector<4x64xf32>
    %308 = vector.extract_strided_slice %298 {offsets = [0, 64], sizes = [4, 64], strides = [1, 1]} : vector<4x192xf32> to vector<4x64xf32>
    %309 = arith.addf %307, %308 : vector<4x64xf32>
    %310 = arith.negf %309 : vector<4x64xf32>
    %311 = math.exp %310 : vector<4x64xf32>
    %cst_127 = arith.constant 1.000000e+00 : f32
    %312 = vector.broadcast %cst_127 : f32 to vector<4x64xf32>
    %313 = arith.addf %312, %311 : vector<4x64xf32>
    %314 = arith.divf %312, %313 : vector<4x64xf32>
    %315 = vector.extract_strided_slice %295 {offsets = [0, 128], sizes = [4, 64], strides = [1, 1]} : vector<4x192xf32> to vector<4x64xf32>
    %316 = vector.extract_strided_slice %298 {offsets = [0, 128], sizes = [4, 64], strides = [1, 1]} : vector<4x192xf32> to vector<4x64xf32>
    %317 = arith.mulf %306, %316 : vector<4x64xf32>
    %318 = arith.addf %315, %317 : vector<4x64xf32>
    %319 = math.tanh %318 : vector<4x64xf32>
    %cst_128 = arith.constant 1.000000e+00 : f32
    %320 = vector.broadcast %cst_128 : f32 to vector<4x64xf32>
    %321 = arith.subf %320, %314 : vector<4x64xf32>
    %322 = arith.mulf %321, %319 : vector<4x64xf32>
    %323 = arith.mulf %314, %246 : vector<4x64xf32>
    %324 = arith.addf %322, %323 : vector<4x64xf32>
    %cst_129 = arith.constant dense<0.000000e+00> : vector<4xf32>
    %325 = vector.multi_reduction <add>, %324, %cst_129 [1] : vector<4x64xf32> to vector<4xf32>
    %326 = vector.shape_cast %325 : vector<4xf32> to vector<4x1xf32>
    %cst_130 = arith.constant 6.400000e+01 : f32
    %327 = vector.broadcast %cst_130 : f32 to vector<4x1xf32>
    %328 = arith.divf %326, %327 : vector<4x1xf32>
    %329 = vector.broadcast %328 : vector<4x1xf32> to vector<4x64xf32>
    %330 = arith.subf %324, %329 : vector<4x64xf32>
    %331 = arith.mulf %330, %330 : vector<4x64xf32>
    %cst_131 = arith.constant dense<0.000000e+00> : vector<4xf32>
    %332 = vector.multi_reduction <add>, %331, %cst_131 [1] : vector<4x64xf32> to vector<4xf32>
    %333 = vector.shape_cast %332 : vector<4xf32> to vector<4x1xf32>
    %cst_132 = arith.constant 6.400000e+01 : f32
    %334 = vector.broadcast %cst_132 : f32 to vector<4x1xf32>
    %335 = arith.divf %333, %334 : vector<4x1xf32>
    %336 = vector.broadcast %328 : vector<4x1xf32> to vector<4x64xf32>
    %337 = arith.subf %324, %336 : vector<4x64xf32>
    %cst_133 = arith.constant 9.99999974E-6 : f32
    %338 = vector.broadcast %cst_133 : f32 to vector<4x1xf32>
    %339 = arith.addf %335, %338 : vector<4x1xf32>
    %340 = math.rsqrt %339 : vector<4x1xf32>
    %341 = vector.broadcast %340 : vector<4x1xf32> to vector<4x64xf32>
    %342 = arith.mulf %337, %341 : vector<4x64xf32>
    %343 = arith.truncf %342 : vector<4x64xf32> to vector<4x64xbf16>
    %344 = arith.truncf %163 : vector<64x64xf32> to vector<64x64xbf16>
    %cst_134 = arith.constant dense<0.000000e+00> : vector<4x64xf32>
    %345 = tpu.matmul %343, %344, %cst_134 {dimension_numbers = #tpu.dot_dimension_numbers<[1], [0], [0], [1], [0, 0, 1, 1], [], []>} : vector<4x64xbf16>, vector<64x64xbf16>, vector<4x64xf32> -> vector<4x64xf32>
    %346 = vector.broadcast %164 : vector<1x64xf32> to vector<4x64xf32>
    %347 = arith.addf %345, %346 : vector<4x64xf32>
    %cst_135 = arith.constant 1.250000e-01 : f32
    %348 = vector.broadcast %cst_135 : f32 to vector<4x64xf32>
    %349 = arith.mulf %347, %348 : vector<4x64xf32>
    %350 = arith.truncf %349 : vector<4x64xf32> to vector<4x64xbf16>
    %351 = arith.truncf %159 : vector<8x64xf32> to vector<8x64xbf16>
    %cst_136 = arith.constant dense<0.000000e+00> : vector<4x8xf32>
    %352 = tpu.matmul %350, %351, %cst_136 {dimension_numbers = #tpu.dot_dimension_numbers<[1], [1], [0], [0], [0, 0, 1, 0], [], []>} : vector<4x64xbf16>, vector<8x64xbf16>, vector<4x8xf32> -> vector<4x8xf32>
    %cst_137 = arith.constant dense<0xFF800000> : vector<8xf32>
    %353 = vector.multi_reduction <maximumf>, %352, %cst_137 [0] : vector<4x8xf32> to vector<8xf32>
    %354 = vector.shape_cast %353 : vector<8xf32> to vector<1x8xf32>
    %355 = vector.broadcast %354 : vector<1x8xf32> to vector<4x8xf32>
    %356 = arith.subf %352, %355 : vector<4x8xf32>
    %357 = math.exp %356 : vector<4x8xf32>
    %cst_138 = arith.constant dense<0.000000e+00> : vector<8xf32>
    %358 = vector.multi_reduction <add>, %357, %cst_138 [0] : vector<4x8xf32> to vector<8xf32>
    %359 = vector.shape_cast %358 : vector<8xf32> to vector<1x8xf32>
    %360 = vector.broadcast %359 : vector<1x8xf32> to vector<4x8xf32>
    %361 = arith.divf %357, %360 : vector<4x8xf32>
    %cst_139 = arith.constant dense<0.000000e+00> : vector<4xf32>
    %362 = vector.multi_reduction <add>, %361, %cst_139 [1] : vector<4x8xf32> to vector<4xf32>
    %363 = vector.shape_cast %362 : vector<4xf32> to vector<4x1xf32>
    %cst_140 = arith.constant 9.99999993E-9 : f32
    %364 = vector.broadcast %cst_140 : f32 to vector<4x1xf32>
    %365 = arith.addf %363, %364 : vector<4x1xf32>
    %366 = vector.broadcast %365 : vector<4x1xf32> to vector<4x8xf32>
    %367 = arith.divf %361, %366 : vector<4x8xf32>
    %368 = arith.truncf %367 : vector<4x8xf32> to vector<4x8xbf16>
    %369 = arith.truncf %160 : vector<8x64xf32> to vector<8x64xbf16>
    %cst_141 = arith.constant dense<0.000000e+00> : vector<4x64xf32>
    %370 = tpu.matmul %368, %369, %cst_141 {dimension_numbers = #tpu.dot_dimension_numbers<[1], [0], [0], [1], [0, 0, 1, 1], [], []>} : vector<4x8xbf16>, vector<8x64xbf16>, vector<4x64xf32> -> vector<4x64xf32>
    %371 = arith.truncf %370 : vector<4x64xf32> to vector<4x64xbf16>
    %372 = arith.truncf %166 : vector<64x192xf32> to vector<64x192xbf16>
    %cst_142 = arith.constant dense<0.000000e+00> : vector<4x192xf32>
    %373 = tpu.matmul %371, %372, %cst_142 {dimension_numbers = #tpu.dot_dimension_numbers<[1], [0], [0], [1], [0, 0, 1, 1], [], []>} : vector<4x64xbf16>, vector<64x192xbf16>, vector<4x192xf32> -> vector<4x192xf32>
    %374 = arith.truncf %324 : vector<4x64xf32> to vector<4x64xbf16>
    %375 = arith.truncf %168 : vector<64x192xf32> to vector<64x192xbf16>
    %cst_143 = arith.constant dense<0.000000e+00> : vector<4x192xf32>
    %376 = tpu.matmul %374, %375, %cst_143 {dimension_numbers = #tpu.dot_dimension_numbers<[1], [0], [0], [1], [0, 0, 1, 1], [], []>} : vector<4x64xbf16>, vector<64x192xbf16>, vector<4x192xf32> -> vector<4x192xf32>
    %377 = vector.extract_strided_slice %373 {offsets = [0, 0], sizes = [4, 64], strides = [1, 1]} : vector<4x192xf32> to vector<4x64xf32>
    %378 = vector.extract_strided_slice %376 {offsets = [0, 0], sizes = [4, 64], strides = [1, 1]} : vector<4x192xf32> to vector<4x64xf32>
    %379 = arith.addf %377, %378 : vector<4x64xf32>
    %380 = arith.negf %379 : vector<4x64xf32>
    %381 = math.exp %380 : vector<4x64xf32>
    %cst_144 = arith.constant 1.000000e+00 : f32
    %382 = vector.broadcast %cst_144 : f32 to vector<4x64xf32>
    %383 = arith.addf %382, %381 : vector<4x64xf32>
    %384 = arith.divf %382, %383 : vector<4x64xf32>
    %385 = vector.extract_strided_slice %373 {offsets = [0, 64], sizes = [4, 64], strides = [1, 1]} : vector<4x192xf32> to vector<4x64xf32>
    %386 = vector.extract_strided_slice %376 {offsets = [0, 64], sizes = [4, 64], strides = [1, 1]} : vector<4x192xf32> to vector<4x64xf32>
    %387 = arith.addf %385, %386 : vector<4x64xf32>
    %388 = arith.negf %387 : vector<4x64xf32>
    %389 = math.exp %388 : vector<4x64xf32>
    %cst_145 = arith.constant 1.000000e+00 : f32
    %390 = vector.broadcast %cst_145 : f32 to vector<4x64xf32>
    %391 = arith.addf %390, %389 : vector<4x64xf32>
    %392 = arith.divf %390, %391 : vector<4x64xf32>
    %393 = vector.extract_strided_slice %373 {offsets = [0, 128], sizes = [4, 64], strides = [1, 1]} : vector<4x192xf32> to vector<4x64xf32>
    %394 = vector.extract_strided_slice %376 {offsets = [0, 128], sizes = [4, 64], strides = [1, 1]} : vector<4x192xf32> to vector<4x64xf32>
    %395 = arith.mulf %384, %394 : vector<4x64xf32>
    %396 = arith.addf %393, %395 : vector<4x64xf32>
    %397 = math.tanh %396 : vector<4x64xf32>
    %cst_146 = arith.constant 1.000000e+00 : f32
    %398 = vector.broadcast %cst_146 : f32 to vector<4x64xf32>
    %399 = arith.subf %398, %392 : vector<4x64xf32>
    %400 = arith.mulf %399, %397 : vector<4x64xf32>
    %401 = arith.mulf %392, %324 : vector<4x64xf32>
    %402 = arith.addf %400, %401 : vector<4x64xf32>
    %403 = tpu.iota {dimensions = array<i32: 0>} : vector<32x4xi32>
    %c3_i32 = arith.constant 3 : i32
    %404 = vector.broadcast %c3_i32 : i32 to vector<32x4xi32>
    %405 = arith.andi %403, %404 : vector<32x4xi32>
    %406 = tpu.iota {dimensions = array<i32: 1>} : vector<32x4xi32>
    %407 = arith.cmpi eq, %405, %406 : vector<32x4xi32>
    %408 = arith.extui %407 : vector<32x4xi1> to vector<32x4xi32>
    %409 = arith.sitofp %408 : vector<32x4xi32> to vector<32x4xf32>
    %410 = tpu.iota {dimensions = array<i32: 1>} : vector<4x32xi32>
    %c3_i32_147 = arith.constant 3 : i32
    %411 = vector.broadcast %c3_i32_147 : i32 to vector<4x32xi32>
    %412 = arith.andi %410, %411 : vector<4x32xi32>
    %413 = tpu.iota {dimensions = array<i32: 0>} : vector<4x32xi32>
    %414 = arith.cmpi eq, %412, %413 : vector<4x32xi32>
    %415 = arith.extui %414 : vector<4x32xi1> to vector<4x32xi32>
    %416 = arith.sitofp %415 : vector<4x32xi32> to vector<4x32xf32>
    %417 = tpu.iota {dimensions = array<i32: 1>} : vector<32x64xi32>
    %c3_i32_148 = arith.constant 3 : i32
    %418 = vector.broadcast %c3_i32_148 : i32 to vector<32x64xi32>
    %419 = arith.shrsi %417, %418 : vector<32x64xi32>
    %420 = tpu.iota {dimensions = array<i32: 0>} : vector<32x64xi32>
    %c2_i32 = arith.constant 2 : i32
    %421 = vector.broadcast %c2_i32 : i32 to vector<32x64xi32>
    %422 = arith.shrsi %420, %421 : vector<32x64xi32>
    %423 = arith.cmpi eq, %419, %422 : vector<32x64xi32>
    %424 = arith.extui %423 : vector<32x64xi1> to vector<32x64xi32>
    %425 = arith.sitofp %424 : vector<32x64xi32> to vector<32x64xf32>
    %c1_149 = arith.constant 1 : index
    %c0_150 = arith.constant 0 : index
    %c0_151 = arith.constant 0 : index
    %426 = vector.load %arg4[%c1_149, %c0_150, %c0_151] : memref<6x64x64xf32, #tpu.memory_space<vmem>>, vector<1x64x64xf32>
    %427 = vector.shape_cast %426 : vector<1x64x64xf32> to vector<64x64xf32>
    %428 = arith.truncf %402 : vector<4x64xf32> to vector<4x64xbf16>
    %429 = arith.truncf %427 : vector<64x64xf32> to vector<64x64xbf16>
    %cst_152 = arith.constant dense<0.000000e+00> : vector<4x64xf32>
    %430 = tpu.matmul %428, %429, %cst_152 {dimension_numbers = #tpu.dot_dimension_numbers<[1], [0], [0], [1], [0, 0, 1, 1], [], []>} : vector<4x64xbf16>, vector<64x64xbf16>, vector<4x64xf32> -> vector<4x64xf32>
    %c92 = arith.constant 92 : index
    %c0_153 = arith.constant 0 : index
    %431 = vector.load %arg2[%c92, %c0_153] : memref<108x128xf32, #tpu.memory_space<vmem>>, vector<1x64xf32>
    %432 = vector.broadcast %431 : vector<1x64xf32> to vector<4x64xf32>
    %433 = arith.addf %430, %432 : vector<4x64xf32>
    %c1_154 = arith.constant 1 : index
    %c0_155 = arith.constant 0 : index
    %c0_156 = arith.constant 0 : index
    %434 = vector.load %arg5[%c1_154, %c0_155, %c0_156] : memref<2x64x128xf32, #tpu.memory_space<vmem>>, vector<1x64x128xf32>
    %435 = vector.shape_cast %434 : vector<1x64x128xf32> to vector<64x128xf32>
    %436 = arith.truncf %116 : vector<8x64xf32> to vector<8x64xbf16>
    %437 = arith.truncf %435 : vector<64x128xf32> to vector<64x128xbf16>
    %cst_157 = arith.constant dense<0.000000e+00> : vector<8x128xf32>
    %438 = tpu.matmul %436, %437, %cst_157 {dimension_numbers = #tpu.dot_dimension_numbers<[1], [0], [0], [1], [0, 0, 1, 1], [], []>} : vector<8x64xbf16>, vector<64x128xbf16>, vector<8x128xf32> -> vector<8x128xf32>
    %c93 = arith.constant 93 : index
    %c0_158 = arith.constant 0 : index
    %439 = vector.load %arg2[%c93, %c0_158] : memref<108x128xf32, #tpu.memory_space<vmem>>, vector<1x128xf32>
    %440 = vector.broadcast %439 : vector<1x128xf32> to vector<8x128xf32>
    %441 = arith.addf %438, %440 : vector<8x128xf32>
    %442 = vector.extract_strided_slice %441 {offsets = [0, 0], sizes = [8, 64], strides = [1, 1]} : vector<8x128xf32> to vector<8x64xf32>
    %443 = vector.extract_strided_slice %441 {offsets = [0, 64], sizes = [8, 64], strides = [1, 1]} : vector<8x128xf32> to vector<8x64xf32>
    %444 = arith.truncf %409 : vector<32x4xf32> to vector<32x4xbf16>
    %445 = arith.truncf %433 : vector<4x64xf32> to vector<4x64xbf16>
    %cst_159 = arith.constant dense<0.000000e+00> : vector<32x64xf32>
    %446 = tpu.matmul %444, %445, %cst_159 {dimension_numbers = #tpu.dot_dimension_numbers<[1], [0], [0], [1], [0, 0, 1, 1], [], []>} : vector<32x4xbf16>, vector<4x64xbf16>, vector<32x64xf32> -> vector<32x64xf32>
    %447 = arith.mulf %446, %425 : vector<32x64xf32>
    %448 = arith.truncf %447 : vector<32x64xf32> to vector<32x64xbf16>
    %449 = arith.truncf %442 : vector<8x64xf32> to vector<8x64xbf16>
    %cst_160 = arith.constant dense<0.000000e+00> : vector<32x8xf32>
    %450 = tpu.matmul %448, %449, %cst_160 {dimension_numbers = #tpu.dot_dimension_numbers<[1], [1], [0], [0], [0, 0, 1, 0], [], []>} : vector<32x64xbf16>, vector<8x64xbf16>, vector<32x8xf32> -> vector<32x8xf32>
    %cst_161 = arith.constant 0.353553385 : f32
    %451 = vector.broadcast %cst_161 : f32 to vector<32x8xf32>
    %452 = arith.mulf %450, %451 : vector<32x8xf32>
    %cst_162 = arith.constant dense<0xFF800000> : vector<32xf32>
    %453 = vector.multi_reduction <maximumf>, %452, %cst_162 [1] : vector<32x8xf32> to vector<32xf32>
    %454 = vector.shape_cast %453 : vector<32xf32> to vector<32x1xf32>
    %455 = vector.broadcast %454 : vector<32x1xf32> to vector<32x8xf32>
    %456 = arith.subf %452, %455 : vector<32x8xf32>
    %457 = math.exp %456 : vector<32x8xf32>
    %cst_163 = arith.constant dense<0.000000e+00> : vector<32xf32>
    %458 = vector.multi_reduction <add>, %457, %cst_163 [1] : vector<32x8xf32> to vector<32xf32>
    %459 = vector.shape_cast %458 : vector<32xf32> to vector<32x1xf32>
    %460 = vector.broadcast %459 : vector<32x1xf32> to vector<32x8xf32>
    %461 = arith.divf %457, %460 : vector<32x8xf32>
    %462 = arith.truncf %461 : vector<32x8xf32> to vector<32x8xbf16>
    %463 = arith.truncf %443 : vector<8x64xf32> to vector<8x64xbf16>
    %cst_164 = arith.constant dense<0.000000e+00> : vector<32x64xf32>
    %464 = tpu.matmul %462, %463, %cst_164 {dimension_numbers = #tpu.dot_dimension_numbers<[1], [0], [0], [1], [0, 0, 1, 1], [], []>} : vector<32x8xbf16>, vector<8x64xbf16>, vector<32x64xf32> -> vector<32x64xf32>
    %465 = arith.mulf %464, %425 : vector<32x64xf32>
    %466 = arith.truncf %416 : vector<4x32xf32> to vector<4x32xbf16>
    %467 = arith.truncf %465 : vector<32x64xf32> to vector<32x64xbf16>
    %cst_165 = arith.constant dense<0.000000e+00> : vector<4x64xf32>
    %468 = tpu.matmul %466, %467, %cst_165 {dimension_numbers = #tpu.dot_dimension_numbers<[1], [0], [0], [1], [0, 0, 1, 1], [], []>} : vector<4x32xbf16>, vector<32x64xbf16>, vector<4x64xf32> -> vector<4x64xf32>
    %c2_166 = arith.constant 2 : index
    %c0_167 = arith.constant 0 : index
    %c0_168 = arith.constant 0 : index
    %469 = vector.load %arg4[%c2_166, %c0_167, %c0_168] : memref<6x64x64xf32, #tpu.memory_space<vmem>>, vector<1x64x64xf32>
    %470 = vector.shape_cast %469 : vector<1x64x64xf32> to vector<64x64xf32>
    %471 = arith.truncf %468 : vector<4x64xf32> to vector<4x64xbf16>
    %472 = arith.truncf %470 : vector<64x64xf32> to vector<64x64xbf16>
    %cst_169 = arith.constant dense<0.000000e+00> : vector<4x64xf32>
    %473 = tpu.matmul %471, %472, %cst_169 {dimension_numbers = #tpu.dot_dimension_numbers<[1], [0], [0], [1], [0, 0, 1, 1], [], []>} : vector<4x64xbf16>, vector<64x64xbf16>, vector<4x64xf32> -> vector<4x64xf32>
    %c94 = arith.constant 94 : index
    %c0_170 = arith.constant 0 : index
    %474 = vector.load %arg2[%c94, %c0_170] : memref<108x128xf32, #tpu.memory_space<vmem>>, vector<1x64xf32>
    %475 = vector.broadcast %474 : vector<1x64xf32> to vector<4x64xf32>
    %476 = arith.addf %473, %475 : vector<4x64xf32>
    %c95 = arith.constant 95 : index
    %c0_171 = arith.constant 0 : index
    %477 = vector.load %arg2[%c95, %c0_171] : memref<108x128xf32, #tpu.memory_space<vmem>>, vector<1x64xf32>
    %c96 = arith.constant 96 : index
    %c0_172 = arith.constant 0 : index
    %478 = vector.load %arg2[%c96, %c0_172] : memref<108x128xf32, #tpu.memory_space<vmem>>, vector<1x64xf32>
    %cst_173 = arith.constant dense<0.000000e+00> : vector<4xf32>
    %479 = vector.multi_reduction <add>, %476, %cst_173 [1] : vector<4x64xf32> to vector<4xf32>
    %480 = vector.shape_cast %479 : vector<4xf32> to vector<4x1xf32>
    %cst_174 = arith.constant 6.400000e+01 : f32
    %481 = vector.broadcast %cst_174 : f32 to vector<4x1xf32>
    %482 = arith.divf %480, %481 : vector<4x1xf32>
    %483 = vector.broadcast %482 : vector<4x1xf32> to vector<4x64xf32>
    %484 = arith.subf %476, %483 : vector<4x64xf32>
    %485 = arith.mulf %484, %484 : vector<4x64xf32>
    %cst_175 = arith.constant dense<0.000000e+00> : vector<4xf32>
    %486 = vector.multi_reduction <add>, %485, %cst_175 [1] : vector<4x64xf32> to vector<4xf32>
    %487 = vector.shape_cast %486 : vector<4xf32> to vector<4x1xf32>
    %cst_176 = arith.constant 6.400000e+01 : f32
    %488 = vector.broadcast %cst_176 : f32 to vector<4x1xf32>
    %489 = arith.divf %487, %488 : vector<4x1xf32>
    %490 = vector.broadcast %482 : vector<4x1xf32> to vector<4x64xf32>
    %491 = arith.subf %476, %490 : vector<4x64xf32>
    %cst_177 = arith.constant 9.99999974E-6 : f32
    %492 = vector.broadcast %cst_177 : f32 to vector<4x1xf32>
    %493 = arith.addf %489, %492 : vector<4x1xf32>
    %494 = math.rsqrt %493 : vector<4x1xf32>
    %495 = vector.broadcast %494 : vector<4x1xf32> to vector<4x64xf32>
    %496 = arith.mulf %491, %495 : vector<4x64xf32>
    %497 = vector.broadcast %477 : vector<1x64xf32> to vector<4x64xf32>
    %498 = arith.mulf %496, %497 : vector<4x64xf32>
    %499 = vector.broadcast %478 : vector<1x64xf32> to vector<4x64xf32>
    %500 = arith.addf %498, %499 : vector<4x64xf32>
    %c3_178 = arith.constant 3 : index
    %c0_179 = arith.constant 0 : index
    %c0_180 = arith.constant 0 : index
    %501 = vector.load %arg4[%c3_178, %c0_179, %c0_180] : memref<6x64x64xf32, #tpu.memory_space<vmem>>, vector<1x64x64xf32>
    %502 = vector.shape_cast %501 : vector<1x64x64xf32> to vector<64x64xf32>
    %503 = arith.truncf %500 : vector<4x64xf32> to vector<4x64xbf16>
    %504 = arith.truncf %502 : vector<64x64xf32> to vector<64x64xbf16>
    %cst_181 = arith.constant dense<0.000000e+00> : vector<4x64xf32>
    %505 = tpu.matmul %503, %504, %cst_181 {dimension_numbers = #tpu.dot_dimension_numbers<[1], [0], [0], [1], [0, 0, 1, 1], [], []>} : vector<4x64xbf16>, vector<64x64xbf16>, vector<4x64xf32> -> vector<4x64xf32>
    %c97 = arith.constant 97 : index
    %c0_182 = arith.constant 0 : index
    %506 = vector.load %arg2[%c97, %c0_182] : memref<108x128xf32, #tpu.memory_space<vmem>>, vector<1x64xf32>
    %507 = vector.broadcast %506 : vector<1x64xf32> to vector<4x64xf32>
    %508 = arith.addf %505, %507 : vector<4x64xf32>
    %c4 = arith.constant 4 : index
    %c0_183 = arith.constant 0 : index
    %c0_184 = arith.constant 0 : index
    %509 = vector.load %arg4[%c4, %c0_183, %c0_184] : memref<6x64x64xf32, #tpu.memory_space<vmem>>, vector<1x64x64xf32>
    %510 = vector.shape_cast %509 : vector<1x64x64xf32> to vector<64x64xf32>
    %511 = arith.truncf %508 : vector<4x64xf32> to vector<4x64xbf16>
    %512 = arith.truncf %510 : vector<64x64xf32> to vector<64x64xbf16>
    %cst_185 = arith.constant dense<0.000000e+00> : vector<4x64xf32>
    %513 = tpu.matmul %511, %512, %cst_185 {dimension_numbers = #tpu.dot_dimension_numbers<[1], [0], [0], [1], [0, 0, 1, 1], [], []>} : vector<4x64xbf16>, vector<64x64xbf16>, vector<4x64xf32> -> vector<4x64xf32>
    %c98 = arith.constant 98 : index
    %c0_186 = arith.constant 0 : index
    %514 = vector.load %arg2[%c98, %c0_186] : memref<108x128xf32, #tpu.memory_space<vmem>>, vector<1x64xf32>
    %515 = vector.broadcast %514 : vector<1x64xf32> to vector<4x64xf32>
    %516 = arith.addf %513, %515 : vector<4x64xf32>
    %c5 = arith.constant 5 : index
    %c0_187 = arith.constant 0 : index
    %c0_188 = arith.constant 0 : index
    %517 = vector.load %arg4[%c5, %c0_187, %c0_188] : memref<6x64x64xf32, #tpu.memory_space<vmem>>, vector<1x64x64xf32>
    %518 = vector.shape_cast %517 : vector<1x64x64xf32> to vector<64x64xf32>
    %519 = arith.truncf %116 : vector<8x64xf32> to vector<8x64xbf16>
    %520 = arith.truncf %518 : vector<64x64xf32> to vector<64x64xbf16>
    %cst_189 = arith.constant dense<0.000000e+00> : vector<8x64xf32>
    %521 = tpu.matmul %519, %520, %cst_189 {dimension_numbers = #tpu.dot_dimension_numbers<[1], [0], [0], [1], [0, 0, 1, 1], [], []>} : vector<8x64xbf16>, vector<64x64xbf16>, vector<8x64xf32> -> vector<8x64xf32>
    %c99 = arith.constant 99 : index
    %c0_190 = arith.constant 0 : index
    %522 = vector.load %arg2[%c99, %c0_190] : memref<108x128xf32, #tpu.memory_space<vmem>>, vector<1x64xf32>
    %523 = vector.broadcast %522 : vector<1x64xf32> to vector<8x64xf32>
    %524 = arith.addf %521, %523 : vector<8x64xf32>
    %525 = arith.truncf %409 : vector<32x4xf32> to vector<32x4xbf16>
    %526 = arith.truncf %516 : vector<4x64xf32> to vector<4x64xbf16>
    %cst_191 = arith.constant dense<0.000000e+00> : vector<32x64xf32>
    %527 = tpu.matmul %525, %526, %cst_191 {dimension_numbers = #tpu.dot_dimension_numbers<[1], [0], [0], [1], [0, 0, 1, 1], [], []>} : vector<32x4xbf16>, vector<4x64xbf16>, vector<32x64xf32> -> vector<32x64xf32>
    %528 = arith.mulf %527, %425 : vector<32x64xf32>
    %529 = arith.truncf %528 : vector<32x64xf32> to vector<32x64xbf16>
    %530 = arith.truncf %524 : vector<8x64xf32> to vector<8x64xbf16>
    %cst_192 = arith.constant dense<0.000000e+00> : vector<32x8xf32>
    %531 = tpu.matmul %529, %530, %cst_192 {dimension_numbers = #tpu.dot_dimension_numbers<[1], [1], [0], [0], [0, 0, 1, 0], [], []>} : vector<32x64xbf16>, vector<8x64xbf16>, vector<32x8xf32> -> vector<32x8xf32>
    %cst_193 = arith.constant 0.353553385 : f32
    %532 = vector.broadcast %cst_193 : f32 to vector<32x8xf32>
    %533 = arith.mulf %531, %532 : vector<32x8xf32>
    %cst_194 = arith.constant dense<0xFF800000> : vector<32xf32>
    %534 = vector.multi_reduction <maximumf>, %533, %cst_194 [1] : vector<32x8xf32> to vector<32xf32>
    %535 = vector.shape_cast %534 : vector<32xf32> to vector<32x1xf32>
    %536 = vector.broadcast %535 : vector<32x1xf32> to vector<32x8xf32>
    %537 = arith.subf %533, %536 : vector<32x8xf32>
    %538 = math.exp %537 : vector<32x8xf32>
    %cst_195 = arith.constant dense<0.000000e+00> : vector<32xf32>
    %539 = vector.multi_reduction <add>, %538, %cst_195 [1] : vector<32x8xf32> to vector<32xf32>
    %540 = vector.shape_cast %539 : vector<32xf32> to vector<32x1xf32>
    %541 = vector.broadcast %540 : vector<32x1xf32> to vector<32x8xf32>
    %542 = arith.divf %538, %541 : vector<32x8xf32>
    %cst_196 = arith.constant dense<0.000000e+00> : vector<4x8xf32>
    %543 = tpu.matmul %416, %542, %cst_196 {dimension_numbers = #tpu.dot_dimension_numbers<[1], [0], [0], [1], [0, 0, 1, 1], [], []>} : vector<4x32xf32>, vector<32x8xf32>, vector<4x8xf32> -> vector<4x8xf32>
    %cst_197 = arith.constant 1.250000e-01 : f32
    %544 = vector.broadcast %cst_197 : f32 to vector<4x8xf32>
    %545 = arith.mulf %543, %544 : vector<4x8xf32>
    %546 = vector.shape_cast %132 : vector<1x8xf32> to vector<1x8xf32>
    %547 = vector.broadcast %546 : vector<1x8xf32> to vector<4x8xf32>
    %c0_198 = arith.constant 0 : index
    %c0_199 = arith.constant 0 : index
    %c0_200 = arith.constant 0 : index
    %548 = vector.load %arg7[%c0_198, %c0_199, %c0_200] : memref<3x4x8xf32, #tpu.memory_space<vmem>>, vector<1x4x8xf32>
    %549 = vector.shape_cast %548 : vector<1x4x8xf32> to vector<4x8xf32>
    %550 = vector.shape_cast %547 : vector<4x8xf32> to vector<1x4x8xf32>
    tpu.vector_store %arg7[%c0_198, %c0_199, %c0_200], %550 {strides = array<i32>} : memref<3x4x8xf32, #tpu.memory_space<vmem>>, vector<1x4x8xf32>,
    %c1_201 = arith.constant 1 : index
    %c0_202 = arith.constant 0 : index
    %c0_203 = arith.constant 0 : index
    %551 = vector.load %arg7[%c1_201, %c0_202, %c0_203] : memref<3x4x8xf32, #tpu.memory_space<vmem>>, vector<1x4x8xf32>
    %552 = vector.shape_cast %551 : vector<1x4x8xf32> to vector<4x8xf32>
    %553 = vector.shape_cast %361 : vector<4x8xf32> to vector<1x4x8xf32>
    tpu.vector_store %arg7[%c1_201, %c0_202, %c0_203], %553 {strides = array<i32>} : memref<3x4x8xf32, #tpu.memory_space<vmem>>, vector<1x4x8xf32>,
    %c2_204 = arith.constant 2 : index
    %c0_205 = arith.constant 0 : index
    %c0_206 = arith.constant 0 : index
    %554 = vector.load %arg7[%c2_204, %c0_205, %c0_206] : memref<3x4x8xf32, #tpu.memory_space<vmem>>, vector<1x4x8xf32>
    %555 = vector.shape_cast %554 : vector<1x4x8xf32> to vector<4x8xf32>
    %556 = vector.shape_cast %545 : vector<4x8xf32> to vector<1x4x8xf32>
    tpu.vector_store %arg7[%c2_204, %c0_205, %c0_206], %556 {strides = array<i32>} : memref<3x4x8xf32, #tpu.memory_space<vmem>>, vector<1x4x8xf32>,
    return
  }
}

</mosaic_0001>

<bundles_post_ra>
// kernel: tpu_custom_call.1
= control target key start
LH: loop header
LB: loop body
LE: loop exit
PB: predicated region body
PF: predicated region fallthrough
CT: control target
= control target key end

     0   :  { %12 = vsyncpa [#allocation5], 0  ;;  %s4707_s0 = inlined_call_operand.vmem [shape: s32[3,10,1], index: 0, kind: input, shape index: {}]   ;;  %s4708_s1 = inlined_call_operand.vmem [shape: s32[1,10], index: 1, kind: input, shape index: {}]   ;;  %s4709_s2 = inlined_call_operand.hbm [shape: f32[108,128], index: 2, kind: input, shape index: {}]   ;;  %s4710_s3 = inlined_call_operand.vmem [shape: f32[4,128,64], index: 3, kind: input, shape index: {}]   ;;  %s4711_s4 = inlined_call_operand.vmem [shape: f32[6,64,64], index: 4, kind: input, shape index: {}]   ;;  %s4712_s5 = inlined_call_operand.vmem [shape: f32[2,64,128], index: 5, kind: input, shape index: {}]   ;;  %s4713_s6 = inlined_call_operand.vmem [shape: f32[2,64,192], index: 6, kind: input, shape index: {}]   ;;  %s4714_s7 = inlined_call_operand.hbm [shape: f32[3,4,8], index: 7, kind: output, shape index: {}]  }
   0x1   :  { %13 = vsyncpa [#allocation6], 0  ;;  %s3622_s24 = smov [#allocation4]   ;;  %s3574_s28 = scalar_lea.hbm %s4709_s2, 1792 }
   0x2   :  { %s23_s25 = sshll.u32 %s3622_s24, 4  ;;  %p3575_p0 = scmp.ne.s32.totalorder %s4709_s2, %s3574_s28  ;;  %s24_s25 = int_to_ptr.vmem [resolvable:$true] %s23_s25 }
   0x3   :  { %p3578_p1 = scmp.lt.u32.totalorder %s3574_s28, %s4709_s2 }
   0x5   :  { %p3580_p2 = pnand %p3578_p1, %p3575_p0 }
   0x7   :  { %3583 = shalt.err (!%p3580_p2)
}
   0x8   :  { %s3584_s10 = scalar_lea.vmem %s24_s25, 1792  ;;  %p3589_p4 = scmp.lt.s32.totalorder %s24_s25, %s24_s25 }
   0x9   :  { %p3585_p3 = scmp.ne.s32.totalorder %s24_s25, %s3584_s10  ;;  %p3590_p5 = scmp.lt.s32.totalorder %s3584_s10, %s3584_s10 }
   0xb   :  { %p3591_p6 = por %p3590_p5, %p3589_p4 }
   0xd   :  { %p3592_p7 = pnand %p3591_p6, %p3585_p3 }
   0xf   :  { %3595 = shalt.err (!%p3592_p7)
}
  0x10   :  { %s3623_s11 = smov 128   ;;  %s3624_s12 = smov 8  }
  0x11   :  { %29 = dma.hbm_to_vmem [thread:$0]  %s4709_s2, 1792, %s24_s25, [#allocation5], %s3623_s11, %s3623_s11, %s3624_s12  }
  0x12   :  { %3618 = dma.done.wait [#allocation5], 1792  }
  0x13   :  { %3619 = vsyncadd [#allocation5], 4294965504  ;;  %v3625_v0 = vmov 0   ;;  %v3626_v1 = vmov 0.0   ;;  %v42_v2 = vld [vmem:[%s4707_s0] sm:$0xff]  ;;  %v2808_v5 = vld [vmem:[%s4707_s0 + $0x10] sm:$0xff]  ;;  %v61_v22 = vlaneseq }
  0x14   :  { %3490 = vset.pattern.permute.xlu0 %v3625_v0  ;;  %3491 = vset.pattern.permute.xlu1 %v3625_v0  ;;  %v2811_v3 = vld [vmem:[%s4707_s0 + $0x28] sm:$0x3]  ;;  %v2810_v4 = vld [vmem:[%s4707_s0 + $0x20] sm:$0xff]  ;;  %v51_v7 = vld [vmem:[#allocation4 + $0x8] sm:$0xff]  ;;  %vm3627_vm0 = vmmov 0   ;;  %vm72_vm3 = vcmask 261120  }
  0x15   :  { %3136 = vmatprep.subr.bf16.mxu0 %v3626_v1  ;;  %3144 = vmatprep.subr.bf16.mxu1 %v3626_v1  ;;  %v50_v6 = vld [vmem:[#allocation4] sm:$0xff]  ;;  %v55_v9 = vld [vmem:[#allocation4 + $0x28] sm:$0xff]  ;;  %v52_v12 = vld [vmem:[#allocation4 + $0x10] sm:$0xff]  ;;  %v3713_v23 = vand.u32 127, %v61_v22  ;;  %vm132_vm5 = vcmask 392192   ;;  %vm259_vm6 = vcmask 523264  }
  0x16   :  { %64 = vperm.xlu0 %3490, %v42_v2   ;;  %120 = vperm.xlu1 %3491, %v2811_v3   ;;  %v54_v8 = vld [vmem:[#allocation4 + $0x20] sm:$0xff]  ;;  %v70_v10 = vpack.c.bf16 %v51_v7, %v50_v6  ;;  %v53_v13 = vld [vmem:[#allocation4 + $0x18] sm:$0xff]  ;;  %v56_v14 = vld [vmem:[#allocation4 + $0x30] sm:$0xff]  ;;  %vm214_vm9 = vcmask 1043456   ;;  %vm210_vm10 = vcmask 64512   ;;  %s3628_s16 = smov 64  }
  0x17   :  { %v129_v11 = vpack.c.bf16 %v55_v9, %v54_v8  ;;  %v57_v15 = vld [vmem:[#allocation4 + $0x38] sm:$0xff]  ;;  %3140 = vmatprep.mubr.msk.bf16.mxu0 %vm3627_vm0, %v3626_v1  ;;  %3150 = vmatprep.mubr.msk.bf16.mxu1 %vm3627_vm0, %v3626_v1  ;;  %v2809_v16 = vld [vmem:[%s4707_s0 + $0x18] sm:$0x3]  ;;  %v71_v17 = vpack.c.bf16 %v53_v13, %v52_v12  ;;  %v58_v19 = vld [vmem:[#allocation4 + $0x40] sm:$0xff]  ;;  %vm200_vm11 = vcmask 1048064   ;;  %vm202_vm12 = vcmask 1041920  }
  0x18   :  { %3137 = vmatpush3.bf16.msra.mxu0 %v70_v10  ;;  %v130_v18 = vpack.c.bf16 %v57_v15, %v56_v14  ;;  %v59_v20 = vld [vmem:[#allocation4 + $0x48] sm:$0xff]  ;;  %v265_v32 = vld [vmem:[%s4710_s3] sm:$0xff]  ;;  %v266_v33 = vld [vmem:[%s4710_s3 + $0x8] sm:$0xff]  ;;  %vm261_vm13 = vcmask 517120  }
  0x19   :  { %3145 = vmatpush3.bf16.msra.mxu1 %v129_v11  ;;  %3138 = vmatprep.subr.bf16.mxu0 %v3626_v1  ;;  %v131_v21 = vpack.c.bf16 %v59_v20, %v58_v19  ;;  %v267_v34 = vld [vmem:[%s4710_s3 + $0x10] sm:$0xff]  ;;  %v282_v35 = vpack.c.bf16 %v266_v33, %v265_v32  ;;  %v268_v36 = vld [vmem:[%s4710_s3 + $0x18] sm:$0xff]  ;;  %v269_v40 = vld [vmem:[%s4710_s3 + $0x20] sm:$0xff]  ;;  %v3803_v20 = vshrl.u32 %v61_v22, 7 }
  0x1a   :  { %117 = vperm.xlu0 %3490, %v2810_v4   ;;  %178 = vperm.xlu1 %3491, %v2808_v5   ;;  %v283_v39 = vpack.c.bf16 %v268_v36, %v267_v34  ;;  %v270_v41 = vld [vmem:[%s4710_s3 + $0x28] sm:$0xff]  ;;  %v271_v49 = vld [vmem:[%s4710_s3 + $0x30] sm:$0xff]  ;;  %v272_v50 = vld [vmem:[%s4710_s3 + $0x38] sm:$0xff] }
  0x1b   :  { %3146 = vmatprep.subr.bf16.mxu1 %v3626_v1  ;;  %v284_v45 = vpack.c.bf16 %v270_v41, %v269_v40  ;;  %v285_v56 = vpack.c.bf16 %v272_v50, %v271_v49  ;;  %v273_v58 = vld [vmem:[%s4710_s3 + $0x40] sm:$0xff]  ;;  %v274_v59 = vld [vmem:[%s4710_s3 + $0x48] sm:$0xff]  ;;  %v275_v62 = vld [vmem:[%s4710_s3 + $0x50] sm:$0xff] }
  0x1c   :  { %3139 = vmatpush3.bf16.msra.mxu0 %v71_v17  ;;  %v286_v61 = vpack.c.bf16 %v274_v59, %v273_v58  ;;  %v276_v63 = vld [vmem:[%s4710_s3 + $0x58] sm:$0xff]  ;;  %v277_v3 = vld [vmem:[%s4710_s3 + $0x60] sm:$0xff]  ;;  %v278_v4 = vld [vmem:[%s4710_s3 + $0x68] sm:$0xff] }
  0x1d   :  { %3147 = vmatpush3.bf16.msra.mxu1 %v130_v18  ;;  %3154 = vmatprep.subr.bf16.mxu0 %v3626_v1  ;;  %v287_v2 = vpack.c.bf16 %v276_v63, %v275_v62  ;;  %v279_v5 = vld [vmem:[%s4710_s3 + $0x70] sm:$0xff]  ;;  %v288_v6 = vpack.c.bf16 %v278_v4, %v277_v3  ;;  %v280_v7 = vld [vmem:[%s4710_s3 + $0x78] sm:$0xff]  ;;  %v2821_v18 = vld [vmem:[#allocation4 + $0x64] ss:$0 sm:$0xff] }
  0x1e   :  { %181 = vperm.xlu0 %3490, %v2809_v16   ;;  %3148 = vmatprep.subr.bf16.mxu1 %v3626_v1  ;;  %v289_v8 = vpack.c.bf16 %v280_v7, %v279_v5  ;;  %v2824_v36 = vld [vmem:[%s4710_s3 + $0x80] sm:$0xff]  ;;  %v2827_v40 = vld [vmem:[%s4710_s3 + $0x98] sm:$0xff]  ;;  %v2833_v49 = vld [vmem:[%s4710_s3 + $0xc8] sm:$0xff] }
  0x1f   :  { %v2839_v59 = vld [vmem:[%s4710_s3 + $0xf8] sm:$0xff] }
  0x21   :  { %3149 = vmatpush3.bf16.msra.mxu1 %v131_v21 }
  0x22   :  { %3160 = vmatprep.subr.bf16.mxu1 %v3626_v1 }
  0x95   :  { %v65_v24 = vpop.permute.xlu0 %64  ;;  %v121_v25 = vpop.permute.xlu1 %120 }
  0x96   :  { %vm66_vm1 = vcmp.eq.s32.totalorder %v3713_v23, %v65_v24  ;;  %vm123_vm2 = vcmp.eq.s32.totalorder %v3713_v23, %v121_v25  ;;  %v2817_v25 = vld [vmem:[%s4708_s1] ss:$0 sm:$0xff] }
  0x97   :  { %v2812_v26 = vsel %vm66_vm1, 1.0, %v3626_v1  ;;  %v2815_v28 = vsel %vm123_vm2, 1.0, %v3626_v1  ;;  %vm191_vm15 = vcmp.eq.s32.totalorder %v3803_v20, %v2817_v25  ;;  %vm350_vm2 = vcmask 1044480   ;;  %v2846_v25 = vld [vmem:[%s4710_s3 + $0x120] sm:$0xff] }
  0x98   :  { %v69_v27 = vpack.c.bf16 %v2812_v26, %v2812_v26  ;;  %v2822_v22 = vsel %vm191_vm15, 1.0, %v3626_v1 }
  0x99   :  { %v118_v29 = vpop.permute.xlu0 %117  ;;  %v179_v37 = vpop.permute.xlu1 %178 }
  0x9a   :  { %vm122_vm4 = vcmp.eq.s32.totalorder %v3713_v23, %v118_v29  ;;  %3141 = vmatmul.mubr.msk.bf16.vlgmr.msra.gmra.mrb[0].mxu0 %vm72_vm3, %v69_v27  ;;  %vm183_vm7 = vcmp.eq.s32.totalorder %v3713_v23, %v179_v37  ;;  %v2825_v37 = vld [vmem:[%s4710_s3 + $0x88] sm:$0xff] }
  0x9b   :  { %v2814_v30 = vsel %vm122_vm4, 1.0, %v3626_v1  ;;  %3156 = vmatprep.mubr.msk.bf16.mxu0 %vm3627_vm0, %v3626_v1  ;;  %v2818_v46 = vsel %vm183_vm7, 1.0, %v3626_v1  ;;  %vm346_vm4 = vcmask 80896  }
  0x9c   :  { %v128_v31 = vpack.c.bf16 %v2815_v28, %v2814_v30 }
  0x9d   :  { %v182_v38 = vpop.permute.xlu0 %181 }
  0x9e   :  { %3151 = vmatmul.mubr.msk.bf16.vlgmr.msra.gmra.mrb[0].mxu1 %vm132_vm5, %v128_v31  ;;  %vm184_vm8 = vcmp.eq.s32.totalorder %v3713_v23, %v182_v38  ;;  %v2826_v38 = vld [vmem:[%s4710_s3 + $0x90] sm:$0xff] }
  0x9f   :  { %3176 = vmatprep.mubr.msk.bf16.mxu1 %vm3627_vm0, %v3626_v1  ;;  %3161 = vmatpush3.bf16.msra.mxu1 %v282_v35  ;;  %v2819_v47 = vsel %vm184_vm8, 1.0, %v3626_v1  ;;  %v3811_v35 = vpack.c.bf16 %v2822_v22, %v2822_v22  ;;  %v420_v41 = vpack.c.bf16 %v2827_v40, %v2826_v38  ;;  %v2852_v22 = vld [vmem:[%s4710_s3 + $0x150] sm:$0xff]  ;;  %v2857_v40 = vld [vmem:[%s4710_s3 + $0x178] sm:$0xff] }
  0xa0   :  { %3162 = vmatprep.subr.bf16.mxu1 %v3626_v1  ;;  %v3758_v54 = vpack.c.bf16 %v2819_v47, %v2818_v46  ;;  %v2831_v46 = vld [vmem:[%s4710_s3 + $0xb8] sm:$0xff]  ;;  %v2856_v38 = vld [vmem:[%s4710_s3 + $0x170] sm:$0xff] }
  0xa3   :  { %3163 = vmatpush3.bf16.msra.mxu1 %v283_v39  ;;  %v419_v39 = vpack.c.bf16 %v2825_v37, %v2824_v36  ;;  %v2854_v36 = vld [vmem:[%s4710_s3 + $0x160] sm:$0xff]  ;;  %v2855_v37 = vld [vmem:[%s4710_s3 + $0x168] sm:$0xff] }
  0xa4   :  { %3164 = vmatprep.subr.bf16.mxu1 %v3626_v1 }
  0xa7   :  { %3165 = vmatpush3.bf16.msra.mxu1 %v284_v45  ;;  %v2830_v45 = vld [vmem:[%s4710_s3 + $0xb0] sm:$0xff] }
  0xa8   :  { %3166 = vmatprep.subr.bf16.mxu1 %v3626_v1  ;;  %v422_v47 = vpack.c.bf16 %v2831_v46, %v2830_v45 }
  0xab   :  { %3167 = vmatpush3.bf16.msra.mxu1 %v285_v56  ;;  %v2837_v56 = vld [vmem:[%s4710_s3 + $0xe8] sm:$0xff] }
  0xac   :  { %3168 = vmatprep.subr.bf16.mxu1 %v3626_v1 }
  0xaf   :  { %3169 = vmatpush3.bf16.msra.mxu1 %v286_v61 }
  0xb0   :  { %3170 = vmatprep.subr.bf16.mxu1 %v3626_v1 }
  0xb3   :  { %3171 = vmatpush3.bf16.msra.mxu1 %v287_v2 }
  0xb4   :  { %3172 = vmatprep.subr.bf16.mxu1 %v3626_v1 }
  0xb7   :  { %3173 = vmatpush3.bf16.msra.mxu1 %v288_v6  ;;  %v2840_v6 = vld [vmem:[#allocation4 + $0x66] ss:$0 sm:$0xff] }
  0xb8   :  { %3174 = vmatprep.subr.bf16.mxu1 %v3626_v1 }
  0xbb   :  { %3175 = vmatpush3.bf16.msra.mxu1 %v289_v8 }
  0xbc   :  { %3206 = vmatprep.subr.bf16.mxu1 %v3626_v1 }
 0x16d   :  { %v110_v42 = vpop.f32.mrb[0].mxu0 }
 0x16e   :  { %v209_v43 = vpack.c.bf16 %v110_v42, %v110_v42  ;;  %394 = vst.msk [vmem:[#allocation3] sm:$0xff] %vm259_vm6, %v110_v42  ;;  %v3142_v44 = vpop.f32.mrb[1].mxu0  ;;  %v2828_v42 = vld [vmem:[%s4710_s3 + $0xa0] sm:$0xff] }
 0x16f   :  { %v113_v48 = vpop.f32.mrb[2].mxu0 }
 0x170   :  { %v3143_v51 = vpop.f32.mrb[3].mxu0  ;;  %v216_v52 = vsel %vm214_vm9, %v209_v43, 0  ;;  %v2829_v43 = vld [vmem:[%s4710_s3 + $0xa8] sm:$0xff]  ;;  %v2832_v48 = vld [vmem:[%s4710_s3 + $0xc0] sm:$0xff] }
 0x171   :  { %v170_v53 = vpop.f32.mrb[0].mxu1  ;;  %3155 = vmatpush3.bf16.msra.mxu0 %v216_v52  ;;  %v421_v44 = vpack.c.bf16 %v2829_v43, %v2828_v42  ;;  %v423_v50 = vpack.c.bf16 %v2833_v49, %v2832_v48  ;;  %v2834_v51 = vld [vmem:[%s4710_s3 + $0xd0] sm:$0xff]  ;;  %v2835_v52 = vld [vmem:[%s4710_s3 + $0xd8] sm:$0xff]  ;;  %v2858_v49 = vld [vmem:[#allocation4 + $0x65] ss:$0 sm:$0xff] }
 0x172   :  { %194 = vrot.lane.b32.xlu1 %v170_v53, %s3628_s16  ;;  %v3152_v55 = vpop.f32.mrb[1].mxu1  ;;  %3180 = vmatprep.subr.bf16.mxu0 %v3626_v1  ;;  %v424_v53 = vpack.c.bf16 %v2835_v52, %v2834_v51 }
 0x173   :  { %v173_v57 = vpop.f32.mrb[2].mxu1  ;;  %v2836_v55 = vld [vmem:[%s4710_s3 + $0xe0] sm:$0xff] }
 0x174   :  { %196 = vrot.lane.b32.xlu0 %v173_v57, %s3628_s16  ;;  %v3153_v60 = vpop.f32.mrb[3].mxu1  ;;  %3157 = vmatmul.mubr.msk.bf16.vlgmr.msra.gmra.mrb[4].mxu0 %vm210_vm10, %v3758_v54  ;;  %v2838_v57 = vld [vmem:[%s4710_s3 + $0xf0] sm:$0xff]  ;;  %v425_v58 = vpack.c.bf16 %v2837_v56, %v2836_v55 }
 0x175   :  { %3182 = vmatprep.mubr.msk.bf16.mxu0 %vm3627_vm0, %v3626_v1  ;;  %v426_v60 = vpack.c.bf16 %v2839_v59, %v2838_v57 }
 0x1e4   :  { %v195_v9 = vpop.permute.xlu1 %194 }
 0x1e5   :  { %201 = vst.msk [vmem:[#allocation2] sm:$0xff] %vm200_vm11, %v195_v9 }
 0x1e6   :  { %v197_v10 = vpop.permute.xlu0 %196 }
 0x1e7   :  { %203 = vst.msk [vmem:[#allocation2 + $0x8] sm:$0x3] %vm202_vm12, %v197_v10  ;;  %vm916_vm12 = vcmask 519168  }
 0x247   :  { %v252_v11 = vpop.f32.mrb[4].mxu0 }
 0x248   :  { %260 = vst.msk [vmem:[#allocation2] sm:$0xff] %vm259_vm6, %v252_v11  ;;  %v3158_v12 = vpop.f32.mrb[5].mxu0 }
 0x249   :  { %v255_v13 = vpop.f32.mrb[6].mxu0 }
 0x24a   :  { %262 = vst.msk [vmem:[#allocation2 + $0x8] sm:$0x3] %vm261_vm13, %v255_v13  ;;  %v3159_v14 = vpop.f32.mrb[7].mxu0 }
 0x24f   :  { %v263_v15 = vld [vmem:[#allocation2] sm:$0xff] }
 0x251   :  { %v264_v16 = vld [vmem:[#allocation2 + $0x8] sm:$0x3] }
 0x252   :  { %v281_v17 = vpack.c.bf16 %v264_v16, %v263_v15  ;;  %v2842_v15 = vld [vmem:[%s4710_s3 + $0x100] sm:$0xff]  ;;  %v2843_v16 = vld [vmem:[%s4710_s3 + $0x108] sm:$0xff] }
 0x254   :  { %3177 = vmatmul.mubr.bf16.vlgmr.msra.gmra.mrb[4].mxu1 %v281_v17 }
 0x255   :  { %3208 = vmatprep.mubr.msk.bf16.mxu1 %vm3627_vm0, %v3626_v1 }
 0x327   :  { %v329_v19 = vpop.f32.mrb[4].mxu1 }
 0x328   :  { %v330_v21 = vadd.f32 %v2821_v18, %v329_v19  ;;  %v3178_v24 = vpop.f32.mrb[5].mxu1  ;;  %v2844_v19 = vld [vmem:[%s4710_s3 + $0x110] sm:$0xff] }
 0x329   :  { %v332_v26 = vpop.f32.mrb[6].mxu1 }
 0x32a   :  { %v338_v27 = vmul.f32 0.01, %v330_v21  ;;  %v333_v28 = vadd.f32 %v2821_v18, %v332_v26  ;;  %v3179_v29 = vpop.f32.mrb[7].mxu1  ;;  %vm336_vm14 = vcmp.gt.f32.partialorder %v330_v21, 0.0  ;;  %v542_v18 = vpack.c.bf16 %v2843_v16, %v2842_v15  ;;  %v2847_v26 = vld [vmem:[%s4710_s3 + $0x128] sm:$0xff]  ;;  %v2870_v15 = vld [vmem:[%s4710_s3 + $0x1d0] sm:$0xff] }
 0x32b   :  { %v2871_v16 = vld [vmem:[%s4710_s3 + $0x1d8] sm:$0xff] }
 0x32c   :  { %vm337_vm1 = vcmp.gt.f32.partialorder %v333_v28, 0.0  ;;  %v339_v30 = vmul.f32 0.01, %v333_v28  ;;  %v340_v31 = vsel %vm336_vm14, %v330_v21, %v338_v27  ;;  %v2845_v21 = vld [vmem:[%s4710_s3 + $0x118] sm:$0xff]  ;;  %v544_v27 = vpack.c.bf16 %v2847_v26, %v2846_v25 }
 0x32d   :  { %v543_v24 = vpack.c.bf16 %v2845_v21, %v2844_v19  ;;  %v2873_v19 = vld [vmem:[%s4710_s3 + $0x1e8] sm:$0xff]  ;;  %v2874_v21 = vld [vmem:[%s4710_s3 + $0x1f0] sm:$0xff]  ;;  %v2875_v25 = vld [vmem:[%s4710_s3 + $0x1f8] sm:$0xff]  ;;  %vm1031_vm14 = vcmask 60416  }
 0x32e   :  { %v341_v32 = vsel %vm337_vm1, %v333_v28, %v339_v30  ;;  %v2849_v28 = vld [vmem:[%s4710_s3 + $0x138] sm:$0xff]  ;;  %v2850_v30 = vld [vmem:[%s4710_s3 + $0x140] sm:$0xff]  ;;  %v678_v26 = vpack.c.bf16 %v2875_v25, %v2874_v21 }
 0x32f   :  { %v345_v33 = vpack.c.bf16 %v341_v32, %v340_v31  ;;  %v2851_v31 = vld [vmem:[%s4710_s3 + $0x148] sm:$0xff]  ;;  %v815_v25 = vld [vmem:[%s4712_s5 + $0x18] sm:$0xff] }
 0x330   :  { %v546_v32 = vpack.c.bf16 %v2851_v31, %v2850_v30  ;;  %v4008_v30 = vld [vmem:[#allocation4 + $0x68] sm:$0xf] }
 0x331   :  { %v352_v34 = vsel %vm350_vm2, %v345_v33, 0  ;;  %v2853_v33 = vld [vmem:[%s4710_s3 + $0x158] sm:$0xff]  ;;  %v917_v31 = vsel %vm916_vm12, %v4008_v30, 0.0 }
 0x332   :  { %3181 = vmatpush3.bf16.msra.mxu0 %v352_v34  ;;  %v547_v34 = vpack.c.bf16 %v2853_v33, %v2852_v22 }
 0x333   :  { %3186 = vmatprep.subr.bf16.mxu0 %v3626_v1 }
 0x335   :  { %3183 = vmatmul.mubr.msk.bf16.vlgmr.msra.gmra.mrb[8].mxu0 %vm346_vm4, %v3811_v35 }
 0x336   :  { %3202 = vmatprep.mubr.msk.bf16.mxu0 %vm3627_vm0, %v3626_v1  ;;  %3187 = vmatpush3.bf16.msra.mxu0 %v419_v39  ;;  %v548_v39 = vpack.c.bf16 %v2855_v37, %v2854_v36 }
 0x337   :  { %3188 = vmatprep.subr.bf16.mxu0 %v3626_v1 }
 0x33a   :  { %3189 = vmatpush3.bf16.msra.mxu0 %v420_v41  ;;  %v549_v41 = vpack.c.bf16 %v2857_v40, %v2856_v38 }
 0x33b   :  { %3190 = vmatprep.subr.bf16.mxu0 %v3626_v1 }
 0x33e   :  { %3191 = vmatpush3.bf16.msra.mxu0 %v421_v44 }
 0x33f   :  { %3192 = vmatprep.subr.bf16.mxu0 %v3626_v1 }
 0x342   :  { %3193 = vmatpush3.bf16.msra.mxu0 %v422_v47 }
 0x343   :  { %3194 = vmatprep.subr.bf16.mxu0 %v3626_v1 }
 0x346   :  { %3195 = vmatpush3.bf16.msra.mxu0 %v423_v50 }
 0x347   :  { %3196 = vmatprep.subr.bf16.mxu0 %v3626_v1 }
 0x34a   :  { %3197 = vmatpush3.bf16.msra.mxu0 %v424_v53 }
 0x34b   :  { %3198 = vmatprep.subr.bf16.mxu0 %v3626_v1 }
 0x34e   :  { %3199 = vmatpush3.bf16.msra.mxu0 %v425_v58 }
 0x34f   :  { %3200 = vmatprep.subr.bf16.mxu0 %v3626_v1 }
 0x352   :  { %3201 = vmatpush3.bf16.msra.mxu0 %v426_v60 }
 0x353   :  { %3232 = vmatprep.subr.bf16.mxu0 %v3626_v1 }
 0x408   :  { %v388_v61 = vpop.f32.mrb[8].mxu0 }
 0x409   :  { %396 = vrot.lane.b32.xlu1 %v388_v61, %s3628_s16  ;;  %v3184_v62 = vpop.f32.mrb[9].mxu0 }
 0x40a   :  { %v391_v63 = vpop.f32.mrb[10].mxu0 }
 0x40b   :  { %v3185_v2 = vpop.f32.mrb[11].mxu0  ;;  %v2860_v63 = vld [vmem:[%s4710_s3 + $0x180] sm:$0xff] }
 0x40c   :  { %v2861_v2 = vld [vmem:[%s4710_s3 + $0x188] sm:$0xff] }
 0x47b   :  { %v397_v3 = vpop.permute.xlu1 %396 }
 0x47c   :  { %399 = vst.msk [vmem:[#allocation3] sm:$0xff] %vm200_vm11, %v397_v3  ;;  %v2862_v3 = vld [vmem:[%s4710_s3 + $0x190] sm:$0xff] }
 0x483   :  { %v400_v4 = vld [vmem:[#allocation3] sm:$0xff] }
 0x484   :  { %v418_v5 = vpack.c.bf16 %v400_v4, %v400_v4  ;;  %v671_v4 = vpack.c.bf16 %v2861_v2, %v2860_v63  ;;  %v879_v63 = vld [vmem:[%s4711_s4 + $0x28] sm:$0xff] }
 0x486   :  { %3203 = vmatmul.mubr.bf16.vlgmr.msra.gmra.mrb[12].mxu0 %v418_v5 }
 0x487   :  { %3234 = vmatprep.mubr.msk.bf16.mxu0 %vm3627_vm0, %v3626_v1 }
 0x559   :  { %v466_v7 = vpop.f32.mrb[12].mxu0 }
 0x55a   :  { %v467_v8 = vadd.f32 %v2840_v6, %v466_v7  ;;  %v3204_v9 = vpop.f32.mrb[13].mxu0  ;;  %v2864_v6 = vld [vmem:[%s4710_s3 + $0x1a0] sm:$0xff]  ;;  %v2865_v7 = vld [vmem:[%s4710_s3 + $0x1a8] sm:$0xff] }
 0x55b   :  { %v469_v10 = vpop.f32.mrb[14].mxu0  ;;  %v2866_v9 = vld [vmem:[%s4710_s3 + $0x1b0] sm:$0xff] }
 0x55c   :  { %vm472_vm5 = vcmp.gt.f32.partialorder %v467_v8, 0.0  ;;  %v473_v11 = vmul.f32 0.01, %v467_v8  ;;  %v3205_v12 = vpop.f32.mrb[15].mxu0  ;;  %v2867_v10 = vld [vmem:[%s4710_s3 + $0x1b8] sm:$0xff] }
 0x55d   :  { %v2868_v12 = vld [vmem:[%s4710_s3 + $0x1c0] sm:$0xff] }
 0x55e   :  { %v474_v13 = vsel %vm472_vm5, %v467_v8, %v473_v11  ;;  %v673_v8 = vpack.c.bf16 %v2865_v7, %v2864_v6  ;;  %v674_v11 = vpack.c.bf16 %v2867_v10, %v2866_v9 }
 0x55f   :  { %646 = vst.msk [vmem:[#allocation3] sm:$0xff] %vm259_vm6, %v474_v13  ;;  %v475_v14 = vpack.c.bf16 %v474_v13, %v474_v13  ;;  %v2869_v13 = vld [vmem:[%s4710_s3 + $0x1c8] sm:$0xff] }
 0x561   :  { %v477_v17 = vsel %vm214_vm9, %v475_v14, 0  ;;  %v675_v14 = vpack.c.bf16 %v2869_v13, %v2868_v12 }
 0x562   :  { %3207 = vmatpush3.bf16.msra.mxu1 %v477_v17  ;;  %v676_v17 = vpack.c.bf16 %v2871_v16, %v2870_v15  ;;  %v731_v15 = vld [vmem:[#allocation4 + $0x58] sm:$0x1] }
 0x563   :  { %3212 = vmatprep.subr.bf16.mxu1 %v3626_v1  ;;  %v732_v16 = vpack.c.bf16 %v731_v15, %v731_v15 }
 0x565   :  { %3209 = vmatmul.mubr.msk.bf16.vlgmr.msra.gmra.mrb[8].mxu1 %vm210_vm10, %v3758_v54  ;;  %v2848_v54 = vld [vmem:[%s4710_s3 + $0x130] sm:$0xff] }
 0x566   :  { %3213 = vmatpush3.bf16.msra.mxu1 %v542_v18  ;;  %3228 = vmatprep.mubr.msk.bf16.mxu1 %vm3627_vm0, %v3626_v1  ;;  %v545_v29 = vpack.c.bf16 %v2849_v28, %v2848_v54  ;;  %v2872_v18 = vld [vmem:[%s4710_s3 + $0x1e0] sm:$0xff] }
 0x567   :  { %3214 = vmatprep.subr.bf16.mxu1 %v3626_v1 }
 0x56a   :  { %3215 = vmatpush3.bf16.msra.mxu1 %v543_v24  ;;  %v677_v24 = vpack.c.bf16 %v2873_v19, %v2872_v18  ;;  %v812_v18 = vld [vmem:[%s4712_s5] sm:$0xff]  ;;  %v813_v19 = vld [vmem:[%s4712_s5 + $0x8] sm:$0xff] }
 0x56b   :  { %3216 = vmatprep.subr.bf16.mxu1 %v3626_v1  ;;  %v821_v21 = vpack.c.bf16 %v813_v19, %v812_v18 }
 0x56e   :  { %3217 = vmatpush3.bf16.msra.mxu1 %v544_v27 }
 0x56f   :  { %3218 = vmatprep.subr.bf16.mxu1 %v3626_v1 }
 0x572   :  { %3219 = vmatpush3.bf16.msra.mxu1 %v545_v29 }
 0x573   :  { %3220 = vmatprep.subr.bf16.mxu1 %v3626_v1 }
 0x576   :  { %3221 = vmatpush3.bf16.msra.mxu1 %v546_v32 }
 0x577   :  { %3222 = vmatprep.subr.bf16.mxu1 %v3626_v1 }
 0x57a   :  { %3223 = vmatpush3.bf16.msra.mxu1 %v547_v34  ;;  %v2876_v34 = vld [vmem:[#allocation4 + $0x67] ss:$0 sm:$0xff] }
 0x57b   :  { %3224 = vmatprep.subr.bf16.mxu1 %v3626_v1 }
 0x57e   :  { %3225 = vmatpush3.bf16.msra.mxu1 %v548_v39 }
 0x57f   :  { %3226 = vmatprep.subr.bf16.mxu1 %v3626_v1 }
 0x582   :  { %3227 = vmatpush3.bf16.msra.mxu1 %v549_v41 }
 0x583   :  { %3258 = vmatprep.subr.bf16.mxu1 %v3626_v1 }
 0x638   :  { %v513_v42 = vpop.f32.mrb[8].mxu1 }
 0x639   :  { %520 = vst.msk [vmem:[#allocation2] sm:$0xff] %vm259_vm6, %v513_v42  ;;  %v3210_v43 = vpop.f32.mrb[9].mxu1 }
 0x63a   :  { %v516_v44 = vpop.f32.mrb[10].mxu1 }
 0x63b   :  { %521 = vst.msk [vmem:[#allocation2 + $0x8] sm:$0x3] %vm261_vm13, %v516_v44  ;;  %v3211_v45 = vpop.f32.mrb[11].mxu1 }
 0x640   :  { %v522_v46 = vld [vmem:[#allocation2] sm:$0xff] }
 0x642   :  { %v523_v47 = vld [vmem:[#allocation2 + $0x8] sm:$0x3] }
 0x643   :  { %v541_v48 = vpack.c.bf16 %v523_v47, %v522_v46  ;;  %v60_v47 = vld [vmem:[#allocation4 + $0x50] sm:$0xff] }
 0x645   :  { %3229 = vmatmul.mubr.bf16.vlgmr.msra.gmra.mrb[12].mxu1 %v541_v48 }
 0x646   :  { %3260 = vmatprep.mubr.msk.bf16.mxu1 %vm3627_vm0, %v3626_v1 }
 0x718   :  { %v589_v50 = vpop.f32.mrb[12].mxu1 }
 0x719   :  { %v590_v51 = vadd.f32 %v2858_v49, %v589_v50  ;;  %v3230_v52 = vpop.f32.mrb[13].mxu1 }
 0x71a   :  { %v592_v53 = vpop.f32.mrb[14].mxu1 }
 0x71b   :  { %v598_v55 = vmul.f32 0.01, %v590_v51  ;;  %v593_v56 = vadd.f32 %v2858_v49, %v592_v53  ;;  %v3231_v57 = vpop.f32.mrb[15].mxu1  ;;  %vm596_vm7 = vcmp.gt.f32.partialorder %v590_v51, 0.0 }
 0x71c   :  { %v875_v57 = vld [vmem:[%s4711_s4 + $0x8] sm:$0xff] }
 0x71d   :  { %vm597_vm8 = vcmp.gt.f32.partialorder %v593_v56, 0.0  ;;  %v599_v58 = vmul.f32 0.01, %v593_v56  ;;  %v600_v59 = vsel %vm596_vm7, %v590_v51, %v598_v55  ;;  %vm1994_vm7 = vcmask 1041408  }
 0x71f   :  { %v601_v60 = vsel %vm597_vm8, %v593_v56, %v599_v58  ;;  %v874_v56 = vld [vmem:[%s4711_s4] sm:$0xff] }
 0x720   :  { %v602_v61 = vpack.c.bf16 %v601_v60, %v600_v59  ;;  %v4029_v58 = vpack.c.bf16 %v875_v57, %v874_v56  ;;  %v876_v59 = vld [vmem:[%s4711_s4 + $0x10] sm:$0xff]  ;;  %v877_v60 = vld [vmem:[%s4711_s4 + $0x18] sm:$0xff] }
 0x722   :  { %v604_v62 = vsel %vm350_vm2, %v602_v61, 0  ;;  %v4039_v61 = vpack.c.bf16 %v877_v60, %v876_v59  ;;  %vm1987_vm2 = vcmask 31744  }
 0x723   :  { %3233 = vmatpush3.bf16.msra.mxu0 %v604_v62  ;;  %v878_v62 = vld [vmem:[%s4711_s4 + $0x20] sm:$0xff] }
 0x724   :  { %3238 = vmatprep.subr.bf16.mxu0 %v3626_v1  ;;  %v4048_v2 = vpack.c.bf16 %v879_v63, %v878_v62 }
 0x726   :  { %3235 = vmatmul.mubr.msk.bf16.vlgmr.msra.gmra.mrb[16].mxu0 %vm346_vm4, %v3811_v35  ;;  %v2863_v35 = vld [vmem:[%s4710_s3 + $0x198] sm:$0xff] }
 0x727   :  { %3254 = vmatprep.mubr.msk.bf16.mxu0 %vm3627_vm0, %v3626_v1  ;;  %3239 = vmatpush3.bf16.msra.mxu0 %v671_v4  ;;  %v672_v5 = vpack.c.bf16 %v2863_v35, %v2862_v3  ;;  %v880_v3 = vld [vmem:[%s4711_s4 + $0x30] sm:$0xff]  ;;  %v881_v4 = vld [vmem:[%s4711_s4 + $0x38] sm:$0xff] }
 0x728   :  { %3240 = vmatprep.subr.bf16.mxu0 %v3626_v1  ;;  %v4058_v35 = vpack.c.bf16 %v881_v4, %v880_v3 }
 0x72b   :  { %3241 = vmatpush3.bf16.msra.mxu0 %v672_v5 }
 0x72c   :  { %3242 = vmatprep.subr.bf16.mxu0 %v3626_v1 }
 0x72f   :  { %3243 = vmatpush3.bf16.msra.mxu0 %v673_v8 }
 0x730   :  { %3244 = vmatprep.subr.bf16.mxu0 %v3626_v1 }
 0x733   :  { %3245 = vmatpush3.bf16.msra.mxu0 %v674_v11 }
 0x734   :  { %3246 = vmatprep.subr.bf16.mxu0 %v3626_v1 }
 0x737   :  { %3247 = vmatpush3.bf16.msra.mxu0 %v675_v14 }
 0x738   :  { %3248 = vmatprep.subr.bf16.mxu0 %v3626_v1 }
 0x73b   :  { %3249 = vmatpush3.bf16.msra.mxu0 %v676_v17 }
 0x73c   :  { %3250 = vmatprep.subr.bf16.mxu0 %v3626_v1 }
 0x73f   :  { %3251 = vmatpush3.bf16.msra.mxu0 %v677_v24  ;;  %v814_v24 = vld [vmem:[%s4712_s5 + $0x10] sm:$0xff] }
 0x740   :  { %3252 = vmatprep.subr.bf16.mxu0 %v3626_v1 }
 0x743   :  { %3253 = vmatpush3.bf16.msra.mxu0 %v678_v26  ;;  %v822_v26 = vpack.c.bf16 %v815_v25, %v814_v24 }
 0x744   :  { %3276 = vmatprep.subr.bf16.mxu0 %v3626_v1 }
 0x7f9   :  { %v640_v27 = vpop.f32.mrb[16].mxu0 }
 0x7fa   :  { %648 = vrot.lane.b32.xlu0 %v640_v27, %s3628_s16  ;;  %v3236_v54 = vpop.f32.mrb[17].mxu0  ;;  %v816_v27 = vld [vmem:[%s4712_s5 + $0x20] sm:$0xff] }
 0x7fb   :  { %v643_v28 = vpop.f32.mrb[18].mxu0  ;;  %v817_v54 = vld [vmem:[%s4712_s5 + $0x28] sm:$0xff] }
 0x7fc   :  { %v3237_v29 = vpop.f32.mrb[19].mxu0  ;;  %v823_v28 = vpack.c.bf16 %v817_v54, %v816_v27 }
 0x7fd   :  { %v818_v29 = vld [vmem:[%s4712_s5 + $0x30] sm:$0xff] }
 0x819   :  { %918 = vadd.xlane.f32.xlu0 %v917_v31  ;;  %v819_v31 = vld [vmem:[%s4712_s5 + $0x38] sm:$0xff] }
 0x86c   :  { %v649_v32 = vpop.permute.xlu0 %648 }
 0x86d   :  { %651 = vst.msk [vmem:[#allocation3] sm:$0xff] %vm200_vm11, %v649_v32  ;;  %v824_v32 = vpack.c.bf16 %v819_v31, %v818_v29  ;;  %v2881_v31 = vld [vmem:[%s4713_s6 + $0x88] sm:$0xff] }
 0x874   :  { %v652_v22 = vld [vmem:[#allocation3] sm:$0xff] }
 0x875   :  { %v670_v33 = vpack.c.bf16 %v652_v22, %v652_v22 }
 0x877   :  { %3255 = vmatmul.mubr.bf16.vlgmr.msra.gmra.mrb[20].mxu0 %v670_v33 }
 0x878   :  { %3284 = vmatprep.mubr.msk.bf16.mxu0 %vm3627_vm0, %v3626_v1  ;;  %3277 = vmatpush3.bf16.msra.mxu0 %v4029_v58 }
 0x879   :  { %3278 = vmatprep.subr.bf16.mxu0 %v3626_v1 }
 0x87c   :  { %3279 = vmatpush3.bf16.msra.mxu0 %v4039_v61 }
 0x87d   :  { %3280 = vmatprep.subr.bf16.mxu0 %v3626_v1 }
 0x880   :  { %3281 = vmatpush3.bf16.msra.mxu0 %v4048_v2 }
 0x881   :  { %3282 = vmatprep.subr.bf16.mxu0 %v3626_v1 }
 0x884   :  { %3283 = vmatpush3.bf16.msra.mxu0 %v4058_v35 }
 0x885   :  { %3294 = vmatprep.subr.bf16.mxu0 %v3626_v1 }
 0x8a6   :  { %v919_v36 = vpop.xlane.xlu0 %918 }
 0x8a7   :  { %v920_v40 = vmul.f32 0.015625, %v919_v36 }
 0x8a9   :  { %v921_v45 = vsub.f32 %v4008_v30, %v920_v40 }
 0x8ab   :  { %v922_v50 = vmul.f32 %v921_v45, %v921_v45 }
 0x8ad   :  { %v923_v55 = vsel %vm916_vm12, %v922_v50, 0.0 }
 0x94a   :  { %v718_v37 = vpop.f32.mrb[20].mxu0 }
 0x94b   :  { %v719_v38 = vadd.f32 %v2876_v34, %v718_v37  ;;  %v3256_v39 = vpop.f32.mrb[21].mxu0 }
 0x94c   :  { %v721_v41 = vpop.f32.mrb[22].mxu0 }
 0x94d   :  { %vm724_vm13 = vcmp.gt.f32.partialorder %v719_v38, 0.0  ;;  %v725_v42 = vmul.f32 0.01, %v719_v38  ;;  %v3257_v43 = vpop.f32.mrb[23].mxu0 }
 0x94f   :  { %v726_v44 = vsel %vm724_vm13, %v719_v38, %v725_v42 }
 0x950   :  { %vm727_vm11 = vcmp.gt.f32.partialorder %v726_v44, 0.0  ;;  %v728_v46 = vmul.f32 0.01, %v726_v44 }
 0x952   :  { %v729_v48 = vsel %vm727_vm11, %v726_v44, %v728_v46 }
 0x953   :  { %v730_v49 = vadd.f32 %v729_v48, %v60_v47  ;;  %v2878_v47 = vld [vmem:[#allocation4 + $0x5b] ss:$0 sm:$0xff]  ;;  %v4103_v48 = vld [vmem:[#allocation4 + $0x5a] ss:$0 sm:$0xff] }
 0x955   :  { %v798_v51 = vsel %vm259_vm6, %v730_v49, 0.0  ;;  %v4017_v52 = vpack.c.bf16 %v730_v49, %v730_v49 }
 0x956   :  { %799 = vadd.xlane.f32.xlu1 %v798_v51 }
 0x957   :  { %v744_v53 = vsel %vm259_vm6, %v4017_v52, 0 }
 0x958   :  { %3259 = vmatpush3.bf16.xpose.msra.mxu1 %v744_v53 }
 0x959   :  { %3264 = vmatprep.subr.bf16.mxu1 %v3626_v1 }
 0x95a   :  { %924 = vadd.xlane.f32.xlu1 %v923_v55 }
 0x95f   :  { %3261 = vmatmul.mubr.msk.bf16.vlgmr.msra.gmra.mrb[16].mxu1 %vm259_vm6, %v732_v16 }
 0x960   :  { %3272 = vmatprep.mubr.msk.bf16.mxu1 %vm3627_vm0, %v3626_v1  ;;  %3265 = vmatpush3.bf16.msra.mxu1 %v821_v21 }
 0x961   :  { %3266 = vmatprep.subr.bf16.mxu1 %v3626_v1 }
 0x964   :  { %3267 = vmatpush3.bf16.msra.mxu1 %v822_v26 }
 0x965   :  { %3268 = vmatprep.subr.bf16.mxu1 %v3626_v1 }
 0x968   :  { %3269 = vmatpush3.bf16.msra.mxu1 %v823_v28 }
 0x969   :  { %3270 = vmatprep.subr.bf16.mxu1 %v3626_v1 }
 0x96c   :  { %3271 = vmatpush3.bf16.msra.mxu1 %v824_v32  ;;  %v2883_v32 = vld [vmem:[%s4713_s6 + $0x98] sm:$0xff] }
 0x96d   :  { %3288 = vmatprep.subr.bf16.mxu1 %v3626_v1 }
 0x9e3   :  { %v800_v5 = vpop.xlane.xlu1 %799 }
 0x9e4   :  { %v802_v6 = vmul.f32 0.015625, %v800_v5 }
 0x9e6   :  { %v803_v7 = vsub.f32 %v730_v49, %v802_v6 }
 0x9e7   :  { %v925_v8 = vpop.xlane.xlu1 %924 }
 0x9e8   :  { %v926_v9 = vmul.f32 0.015625, %v925_v8  ;;  %v804_v10 = vmul.f32 %v803_v7, %v803_v7 }
 0x9ea   :  { %v927_v11 = vadd.f32 1e-05, %v926_v9  ;;  %v805_v12 = vsel %vm259_vm6, %v804_v10, 0.0 }
 0x9eb   :  { %806 = vadd.xlane.f32.xlu0 %v805_v12 }
 0x9ec   :  { %3492 = vrsqrt.f32 %v927_v11 }
 0x9f6   :  { %v3493_v13 = vpop.eup %3492 }
 0x9f7   :  { %v929_v14 = vmul.f32 %v3493_v13, %v921_v45 }
 0x9f9   :  { %v930_v17 = vpack.c.bf16 %v929_v14, %v929_v14 }
 0x9fb   :  { %3285 = vmatmul.mubr.msk.bf16.vlgmr.msra.gmra.mrb[24].mxu0 %vm259_vm6, %v930_v17 }
 0x9fc   :  { %3296 = vmatprep.mubr.msk.bf16.mxu0 %vm3627_vm0, %v3626_v1 }
 0xa32   :  { %v4101_v39 = vpop.f32.mrb[16].mxu1 }
 0xa33   :  { %v3262_v41 = vpop.f32.mrb[17].mxu1 }
 0xa34   :  { %v783_v43 = vpop.f32.mrb[18].mxu1  ;;  %v890_v41 = vld [vmem:[%s4713_s6 + $0x38] sm:$0xff] }
 0xa35   :  { %v3263_v45 = vpop.f32.mrb[19].mxu1 }
 0xa36   :  { %v889_v45 = vld [vmem:[%s4713_s6 + $0x30] sm:$0xff] }
 0xa78   :  { %v807_v22 = vpop.xlane.xlu0 %806 }
 0xa79   :  { %v808_v33 = vmul.f32 0.015625, %v807_v22  ;;  %v4128_v22 = vpack.c.bf16 %v2883_v32, %v2881_v31  ;;  %v1160_v31 = vpack.c.bf16 %v4008_v30, %v4008_v30  ;;  %v895_v32 = vld [vmem:[%s4713_s6 + $0x60] sm:$0xff] }
 0xa7b   :  { %v809_v34 = vadd.f32 1e-05, %v808_v33  ;;  %v884_v33 = vld [vmem:[%s4713_s6 + $0x8] sm:$0xff] }
 0xa7d   :  { %3494 = vrsqrt.f32 %v809_v34  ;;  %v886_v34 = vld [vmem:[%s4713_s6 + $0x18] sm:$0xff] }
 0xa87   :  { %v3495_v36 = vpop.eup %3494 }
 0xa88   :  { %v811_v37 = vmul.f32 %v3495_v36, %v803_v7  ;;  %v883_v36 = vld [vmem:[%s4713_s6] sm:$0xff] }
 0xa8a   :  { %v820_v38 = vpack.c.bf16 %v811_v37, %v811_v37  ;;  %v4140_v37 = vpack.c.bf16 %v886_v34, %v884_v33 }
 0xa8c   :  { %3273 = vmatmul.mubr.msk.bf16.vlgmr.msra.gmra.mrb[20].mxu1 %vm259_vm6, %v820_v38  ;;  %v885_v38 = vld [vmem:[%s4713_s6 + $0x10] sm:$0xff] }
 0xa8d   :  { %3290 = vmatprep.mubr.msk.bf16.mxu1 %vm3627_vm0, %v3626_v1 }
 0xace   :  { %v976_v40 = vpop.f32.mrb[24].mxu0 }
 0xacf   :  { %v3286_v42 = vpop.f32.mrb[25].mxu0  ;;  %v977_v55 = vadd.f32 %v4103_v48, %v976_v40  ;;  %v888_v40 = vld [vmem:[%s4713_s6 + $0x28] sm:$0xff] }
 0xad0   :  { %v979_v44 = vpop.f32.mrb[26].mxu0  ;;  %v4151_v42 = vpack.c.bf16 %v885_v38, %v883_v36  ;;  %v4153_v43 = vpack.c.bf16 %v890_v41, %v888_v40 }
 0xad1   :  { %v3287_v46 = vpop.f32.mrb[27].mxu0  ;;  %v982_v60 = vmul.f32 0.125, %v977_v55  ;;  %v887_v44 = vld [vmem:[%s4713_s6 + $0x20] sm:$0xff]  ;;  %v896_v55 = vld [vmem:[%s4713_s6 + $0x68] sm:$0xff] }
 0xad2   :  { %v892_v46 = vld [vmem:[%s4713_s6 + $0x48] sm:$0xff] }
 0xad3   :  { %v983_v62 = vpack.c.bf16 %v982_v60, %v982_v60 }
 0xb5f   :  { %v867_v49 = vpop.f32.mrb[20].mxu1 }
 0xb60   :  { %v868_v50 = vadd.f32 %v2878_v47, %v867_v49  ;;  %v3274_v51 = vpop.f32.mrb[21].mxu1  ;;  %v894_v47 = vld [vmem:[%s4713_s6 + $0x58] sm:$0xff]  ;;  %v4169_v49 = vpack.c.bf16 %v889_v45, %v887_v44 }
 0xb61   :  { %v870_v53 = vpop.f32.mrb[22].mxu1  ;;  %v891_v51 = vld [vmem:[%s4713_s6 + $0x40] sm:$0xff] }
 0xb62   :  { %v984_v56 = vpack.c.bf16 %v868_v50, %v868_v50  ;;  %v3275_v57 = vpop.f32.mrb[23].mxu1  ;;  %v4172_v50 = vpack.c.bf16 %v894_v47, %v892_v46  ;;  %v893_v53 = vld [vmem:[%s4713_s6 + $0x50] sm:$0xff] }
 0xb63   :  { %v4187_v57 = vpack.c.bf16 %v893_v53, %v891_v51 }
 0xb64   :  { %v4107_v59 = vsel %vm259_vm6, %v984_v56, 0  ;;  %1059 = vrot.lane.b32.xlu1 %v984_v56, %s3628_s16  ;;  %v898_v56 = vld [vmem:[%s4713_s6 + $0x78] sm:$0xff] }
 0xb65   :  { %3289 = vmatpush3.bf16.xpose.msra.mxu1 %v4107_v59  ;;  %v4190_v60 = vpack.c.bf16 %v898_v56, %v896_v55 }
 0xb66   :  { %1119 = vmatprep.subr.bf16.mxu1 %v4140_v37 }
 0xb68   :  { %1230 = vrot.lane.b32.xlu1 %v4008_v30, %s3628_s16  ;;  %v897_v30 = vld [vmem:[%s4713_s6 + $0x70] sm:$0xff] }
 0xb69   :  { %v4273_v33 = vpack.c.bf16 %v897_v30, %v895_v32 }
 0xb6c   :  { %3291 = vmatmul.mubr.msk.bf16.vlgmr.msra.gmra.mrb[24].mxu1 %vm259_vm6, %v983_v62 }
 0xb6d   :  { %1151 = vmatprep.mubr.bf16.mxu1 %v3625_v0  ;;  %1120 = vmatpush1.bf16.msra.mxu1 %v4151_v42 }
 0xb6e   :  { %1121 = vmatprep.subr.bf16.mxu1 %v4153_v43 }
 0xb71   :  { %1122 = vmatpush1.bf16.msra.mxu1 %v4169_v49 }
 0xb72   :  { %1123 = vmatprep.subr.bf16.mxu1 %v4172_v50 }
 0xb75   :  { %1124 = vmatpush1.bf16.msra.mxu1 %v4187_v57 }
 0xb76   :  { %1125 = vmatprep.subr.bf16.mxu1 %v4190_v60 }
 0xb79   :  { %1126 = vmatpush1.bf16.msra.mxu1 %v4273_v33 }
 0xb7a   :  { %3300 = vmatprep.subr.bf16.mxu1 %v3626_v1 }
 0xbd6   :  { %v1060_v63 = vpop.permute.xlu1 %1059 }
 0xbd7   :  { %v4116_v3 = vsel %vm214_vm9, %v1060_v63, 0 }
 0xbd8   :  { %3295 = vmatpush3.bf16.msra.mxu0 %v4116_v3 }
 0xbd9   :  { %1172 = vmatprep.subr.bf16.mxu0 %v4128_v22 }
 0xc3f   :  { %v1025_v4 = vpop.f32.mrb[24].mxu1 }
 0xc40   :  { %v1032_v5 = vsel %vm1031_vm14, %v1025_v4, -inf  ;;  %v3292_v6 = vpop.f32.mrb[25].mxu1 }
 0xc41   :  { %v1033_v7 = vrot.slane %v1032_v5, 4  ;;  %v1028_v8 = vpop.f32.mrb[26].mxu1 }
 0xc42   :  { %v3293_v9 = vpop.f32.mrb[27].mxu1  ;;  %v2887_v8 = vld [vmem:[%s4713_s6 + $0xb8] sm:$0xff] }
 0xc43   :  { %v1034_v10 = vmax.f32 %v1032_v5, %v1033_v7  ;;  %v2882_v5 = vld [vmem:[%s4713_s6 + $0x90] sm:$0xff]  ;;  %v2885_v7 = vld [vmem:[%s4713_s6 + $0xa8] sm:$0xff] }
 0xc45   :  { %v1035_v11 = vrot.slane %v1034_v10, 2 }
 0xc47   :  { %v1036_v12 = vmax.f32 %v1034_v10, %v1035_v11 }
 0xc49   :  { %v1037_v13 = vrot.slane %v1036_v12, 1 }
 0xc4b   :  { %v1038_v14 = vmax.f32 %v1036_v12, %v1037_v13  ;;  %v4208_v12 = vpack.c.bf16 %v2887_v8, %v2885_v7  ;;  %v2884_v13 = vld [vmem:[%s4713_s6 + $0xa0] sm:$0xff] }
 0xc4d   :  { %v1039_v15 = vsub.f32 %v1025_v4, %v1038_v14  ;;  %v2880_v4 = vld [vmem:[%s4713_s6 + $0x80] sm:$0xff]  ;;  %v2886_v14 = vld [vmem:[%s4713_s6 + $0xb0] sm:$0xff] }
 0xc4e   :  { %v4206_v10 = vpack.c.bf16 %v2882_v5, %v2880_v4 }
 0xc4f   :  { %v1040_v16 = vmul.f32 1.442695, %v1039_v15  ;;  %v2889_v15 = vld [vmem:[%s4713_s6 + $0xc8] sm:$0xff] }
 0xc51   :  { %3496 = vpow2.f32 %v1040_v16  ;;  %v2891_v16 = vld [vmem:[%s4713_s6 + $0xd8] sm:$0xff] }
 0xc5b   :  { %v3497_v17 = vpop.eup %3496 }
 0xc5c   :  { %v1042_v18 = vsel %vm1031_vm14, %v3497_v17, 0.0 }
 0xc5d   :  { %v1043_v19 = vrot.slane %v1042_v18, 4 }
 0xc5f   :  { %v1044_v21 = vadd.f32 %v1043_v19, %v1042_v18  ;;  %v4228_v18 = vpack.c.bf16 %v2891_v16, %v2889_v15  ;;  %v2888_v19 = vld [vmem:[%s4713_s6 + $0xc0] sm:$0xff] }
 0xc61   :  { %v1045_v24 = vrot.slane %v1044_v21, 2 }
 0xc63   :  { %v1046_v25 = vadd.f32 %v1045_v24, %v1044_v21  ;;  %v2890_v21 = vld [vmem:[%s4713_s6 + $0xd0] sm:$0xff]  ;;  %v2893_v24 = vld [vmem:[%s4713_s6 + $0xe8] sm:$0xff] }
 0xc65   :  { %v1047_v26 = vrot.slane %v1046_v25, 1 }
 0xc67   :  { %v1048_v27 = vadd.f32 %v1047_v26, %v1046_v25  ;;  %v2895_v25 = vld [vmem:[%s4713_s6 + $0xf8] sm:$0xff]  ;;  %v4243_v26 = vpack.c.bf16 %v2890_v21, %v2888_v19 }
 0xc69   :  { %3498 = vrcp.f32 %v1048_v27  ;;  %v4246_v27 = vpack.c.bf16 %v2895_v25, %v2893_v24 }
 0xc73   :  { %v3499_v54 = vpop.eup %3498 }
 0xc74   :  { %v1050_v28 = vmul.f32 %v3499_v54, %v3497_v17  ;;  %v4224_v17 = vpack.c.bf16 %v2886_v14, %v2884_v13  ;;  %v2892_v54 = vld [vmem:[%s4713_s6 + $0xe0] sm:$0xff] }
 0xc76   :  { %v1051_v29 = vsel %vm1031_vm14, %v1050_v28, 0.0 }
 0xc77   :  { %1052 = vadd.xlane.f32.xlu0 %v1051_v29 }
 0xd04   :  { %v1053_v62 = vpop.xlane.xlu0 %1052 }
 0xd05   :  { %v1054_v63 = vadd.f32 1e-08, %v1053_v62 }
 0xd07   :  { %3500 = vrcp.f32 %v1054_v63 }
 0xd11   :  { %v3501_v6 = vpop.eup %3500 }
 0xd12   :  { %v1056_v9 = vmul.f32 %v3501_v6, %v1050_v28  ;;  %v2894_v28 = vld [vmem:[%s4713_s6 + $0xf0] sm:$0xff] }
 0xd13   :  { %v4255_v29 = vpack.c.bf16 %v2894_v28, %v2892_v54 }
 0xd14   :  { %v1057_v11 = vpack.c.bf16 %v1056_v9, %v1056_v9 }
 0xd16   :  { %3297 = vmatmul.mubr.msk.bf16.vlgmr.msra.gmra.mrb[28].mxu0 %vm210_vm10, %v1057_v11  ;;  %v1231_v11 = vpop.permute.xlu1 %1230 }
 0xd17   :  { %1173 = vmatpush1.bf16.msra.mxu0 %v4206_v10  ;;  %1204 = vmatprep.mubr.bf16.mxu0 %v3625_v0 }
 0xd18   :  { %1174 = vmatprep.subr.bf16.mxu0 %v4208_v12 }
 0xd1b   :  { %1175 = vmatpush1.bf16.msra.mxu0 %v4224_v17 }
 0xd1c   :  { %1176 = vmatprep.subr.bf16.mxu0 %v4228_v18 }
 0xd1f   :  { %1177 = vmatpush1.bf16.msra.mxu0 %v4243_v26 }
 0xd20   :  { %1178 = vmatprep.subr.bf16.mxu0 %v4246_v27 }
 0xd23   :  { %1179 = vmatpush1.bf16.msra.mxu0 %v4255_v29 }
 0xd24   :  { %3312 = vmatprep.subr.bf16.mxu0 %v3626_v1 }
 0xd26   :  { %2901 = vmatmul.mubr.msk.bf16.vlgmr.msra.gmra.mrb[32].mxu0 %vm259_vm6, %v1160_v31 }
 0xd27   :  { %3314 = vmatprep.mubr.msk.bf16.mxu0 %vm3627_vm0, %v3626_v1 }
 0xd2c   :  { %3313 = vmatpush3.bf16.xpose.msra.mxu0 %v4107_v59 }
 0xd2d   :  { %3318 = vmatprep.subr.bf16.mxu0 %v3626_v1 }
 0xde9   :  { %v1101_v34 = vpop.f32.mrb[28].mxu0 }
 0xdea   :  { %v1107_v36 = vpack.c.bf16 %v1101_v34, %v1101_v34  ;;  %v3298_v38 = vpop.f32.mrb[29].mxu0 }
 0xdeb   :  { %v1104_v40 = vpop.f32.mrb[30].mxu0 }
 0xdec   :  { %v3299_v41 = vpop.f32.mrb[31].mxu0  ;;  %2900 = vmatmul.mubr.msk.bf16.vlgmr.msra.gmra.mrb[28].mxu1 %vm259_vm6, %v1107_v36 }
 0xded   :  { %3301 = vmatpush3.bf16.msra.mxu1 %v4029_v58  ;;  %3308 = vmatprep.mubr.msk.bf16.mxu1 %vm3627_vm0, %v3626_v1 }
 0xdee   :  { %3302 = vmatprep.subr.bf16.mxu1 %v3626_v1 }
 0xdf1   :  { %3303 = vmatpush3.bf16.msra.mxu1 %v4039_v61 }
 0xdf2   :  { %3304 = vmatprep.subr.bf16.mxu1 %v3626_v1 }
 0xdf5   :  { %3305 = vmatpush3.bf16.msra.mxu1 %v4048_v2 }
 0xdf6   :  { %3306 = vmatprep.subr.bf16.mxu1 %v3626_v1 }
 0xdf9   :  { %v1206_v44 = vpop.f32.mrb[32].mxu0  ;;  %3307 = vmatpush3.bf16.msra.mxu1 %v4058_v35 }
 0xdfa   :  { %v1208_v45 = vpop.f32.mrb[33].mxu0  ;;  %1421 = vmatprep.subr.bf16.mxu1 %v4140_v37 }
 0xdfb   :  { %v1210_v46 = vpop.f32.mrb[34].mxu0 }
 0xdfc   :  { %v1211_v47 = vpop.f32.mrb[35].mxu0 }
 0xebf   :  { %v1153_v51 = vpop.f32.mrb[28].mxu1 }
 0xec0   :  { %v1213_v53 = vadd.f32 %v1206_v44, %v1153_v51  ;;  %v1155_v55 = vpop.f32.mrb[29].mxu1 }
 0xec1   :  { %v1157_v56 = vpop.f32.mrb[30].mxu1 }
 0xec2   :  { %v2902_v62 = vmul.f32 -1.442695, %v1213_v53  ;;  %v1158_v63 = vpop.f32.mrb[31].mxu1 }
 0xec4   :  { %3502 = vpow2.f32 %v2902_v62 }
 0xece   :  { %v3503_v4 = vpop.eup %3502 }
 0xecf   :  { %v1217_v5 = vadd.f32 1.0, %v3503_v4 }
 0xed1   :  { %3504 = vrcp.f32 %v1217_v5 }
 0xedb   :  { %v3505_v6 = vpop.eup %3504 }
 0xedc   :  { %v1220_v7 = vmul.f32 %v3505_v6, %v1208_v45  ;;  %v1223_v13 = vsub.f32 1.0, %v3505_v6  ;;  %v1233_v15 = vmul.f32 %v3505_v6, %v1231_v11 }
 0xede   :  { %v1221_v8 = vadd.f32 %v1220_v7, %v1155_v55 }
 0xee0   :  { %3506 = vtanh.f32 %v1221_v8 }
 0xeea   :  { %v3507_v9 = vpop.eup %3506 }
 0xeeb   :  { %1225 = vrot.lane.b32.xlu0 %v3507_v9, %s3628_s16 }
 0xf5d   :  { %v1226_v14 = vpop.permute.xlu0 %1225 }
 0xf5e   :  { %v1228_v16 = vmul.f32 %v1226_v14, %v1223_v13 }
 0xf60   :  { %v4289_v19 = vadd.f32 %v1233_v15, %v1228_v16 }
 0xf62   :  { %1236 = vrot.lane.b32.xlu1 %v4289_v19, %s3628_s16 }
 0xfd4   :  { %v1237_v21 = vpop.permute.xlu1 %1236 }
 0xfd5   :  { %v1239_v24 = vsel %vm916_vm12, %v1237_v21, 0.0 }
 0xfd6   :  { %1240 = vadd.xlane.f32.xlu0 %v1239_v24 }
0x1063   :  { %v1241_v25 = vpop.xlane.xlu0 %1240 }
0x1064   :  { %v1242_v54 = vmul.f32 0.015625, %v1241_v25 }
0x1066   :  { %v1243_v28 = vsub.f32 %v4289_v19, %v1242_v54 }
0x1068   :  { %v1244_v31 = vmul.f32 %v1243_v28, %v1243_v28 }
0x106a   :  { %1246 = vrot.lane.b32.xlu1 %v1244_v31, %s3628_s16 }
0x10dc   :  { %v1247_v32 = vpop.permute.xlu1 %1246 }
0x10dd   :  { %v1249_v30 = vsel %vm916_vm12, %v1247_v32, 0.0 }
0x10de   :  { %1250 = vadd.xlane.f32.xlu1 %v1249_v30 }
0x116b   :  { %v1251_v34 = vpop.xlane.xlu1 %1250 }
0x116c   :  { %v1252_v36 = vmul.f32 0.015625, %v1251_v34 }
0x116e   :  { %v1253_v38 = vadd.f32 1e-05, %v1252_v36 }
0x1170   :  { %3508 = vrsqrt.f32 %v1253_v38 }
0x117a   :  { %v3509_v40 = vpop.eup %3508 }
0x117b   :  { %v1255_v41 = vmul.f32 %v3509_v40, %v1243_v28 }
0x117d   :  { %v1256_v44 = vpack.c.bf16 %v1255_v41, %v1255_v41  ;;  %v1462_v41 = vpack.c.bf16 %v4289_v19, %v4289_v19 }
0x117f   :  { %1258 = vrot.lane.b32.xlu0 %v1256_v44, %s3628_s16 }
0x11f1   :  { %v1259_v45 = vpop.permute.xlu0 %1258 }
0x11f2   :  { %3309 = vmatmul.mubr.msk.bf16.vlgmr.msra.gmra.mrb[32].mxu1 %vm259_vm6, %v1259_v45 }
0x11f3   :  { %1422 = vmatpush1.bf16.msra.mxu1 %v4151_v42  ;;  %1453 = vmatprep.mubr.bf16.mxu1 %v3625_v0 }
0x11f4   :  { %1423 = vmatprep.subr.bf16.mxu1 %v4153_v43 }
0x11f7   :  { %1424 = vmatpush1.bf16.msra.mxu1 %v4169_v49 }
0x11f8   :  { %1425 = vmatprep.subr.bf16.mxu1 %v4172_v50 }
0x11fb   :  { %1426 = vmatpush1.bf16.msra.mxu1 %v4187_v57 }
0x11fc   :  { %1427 = vmatprep.subr.bf16.mxu1 %v4190_v60 }
0x11ff   :  { %1428 = vmatpush1.bf16.msra.mxu1 %v4273_v33 }
0x1200   :  { %3324 = vmatprep.subr.bf16.mxu1 %v3626_v1 }
0x12c5   :  { %v1297_v46 = vpop.f32.mrb[32].mxu1 }
0x12c6   :  { %v1298_v47 = vadd.f32 %v4103_v48, %v1297_v46  ;;  %v3310_v51 = vpop.f32.mrb[33].mxu1 }
0x12c7   :  { %v1300_v53 = vpop.f32.mrb[34].mxu1 }
0x12c8   :  { %v1303_v55 = vmul.f32 0.125, %v1298_v47  ;;  %v3311_v56 = vpop.f32.mrb[35].mxu1 }
0x12ca   :  { %v1304_v62 = vpack.c.bf16 %v1303_v55, %v1303_v55 }
0x12cc   :  { %3315 = vmatmul.mubr.msk.bf16.vlgmr.msra.gmra.mrb[36].mxu0 %vm259_vm6, %v1304_v62 }
0x12cd   :  { %3319 = vmatpush3.bf16.msra.mxu0 %v4116_v3  ;;  %3320 = vmatprep.mubr.msk.bf16.mxu0 %vm3627_vm0, %v3626_v1 }
0x12ce   :  { %1469 = vmatprep.subr.bf16.mxu0 %v4128_v22 }
0x139f   :  { %v1342_v63 = vpop.f32.mrb[36].mxu0 }
0x13a0   :  { %v1348_v4 = vsel %vm1031_vm14, %v1342_v63, -inf  ;;  %v3316_v5 = vpop.f32.mrb[37].mxu0 }
0x13a1   :  { %v1349_v6 = vrot.slane %v1348_v4, 4  ;;  %v1345_v7 = vpop.f32.mrb[38].mxu0 }
0x13a2   :  { %v3317_v8 = vpop.f32.mrb[39].mxu0 }
0x13a3   :  { %v1350_v9 = vmax.f32 %v1348_v4, %v1349_v6 }
0x13a5   :  { %v1351_v11 = vrot.slane %v1350_v9, 2 }
0x13a7   :  { %v1352_v13 = vmax.f32 %v1350_v9, %v1351_v11 }
0x13a9   :  { %v1353_v14 = vrot.slane %v1352_v13, 1 }
0x13ab   :  { %v1354_v15 = vmax.f32 %v1352_v13, %v1353_v14 }
0x13ad   :  { %v1355_v16 = vsub.f32 %v1342_v63, %v1354_v15 }
0x13af   :  { %v1356_v21 = vmul.f32 1.442695, %v1355_v16 }
0x13b1   :  { %3510 = vpow2.f32 %v1356_v21 }
0x13bb   :  { %v3511_v24 = vpop.eup %3510 }
0x13bc   :  { %v1358_v25 = vsel %vm1031_vm14, %v3511_v24, 0.0 }
0x13bd   :  { %v1359_v54 = vrot.slane %v1358_v25, 4 }
0x13bf   :  { %v1360_v28 = vadd.f32 %v1359_v54, %v1358_v25 }
0x13c1   :  { %v1361_v31 = vrot.slane %v1360_v28, 2 }
0x13c3   :  { %v1362_v32 = vadd.f32 %v1361_v31, %v1360_v28 }
0x13c5   :  { %v1363_v30 = vrot.slane %v1362_v32, 1 }
0x13c7   :  { %v1364_v34 = vadd.f32 %v1363_v30, %v1362_v32 }
0x13c9   :  { %3512 = vrcp.f32 %v1364_v34 }
0x13d3   :  { %v3513_v36 = vpop.eup %3512 }
0x13d4   :  { %v1366_v38 = vmul.f32 %v3513_v36, %v3511_v24 }
0x13d6   :  { %v1367_v40 = vsel %vm1031_vm14, %v1366_v38, 0.0 }
0x13d7   :  { %1368 = vadd.xlane.f32.xlu1 %v1367_v40 }
0x13e8   :  { %1464 = vrot.lane.b32.xlu1 %v1462_v41, %s3628_s16 }
0x1464   :  { %v1369_v44 = vpop.xlane.xlu1 %1368 }
0x1465   :  { %v1370_v45 = vadd.f32 1e-08, %v1369_v44 }
0x1467   :  { %3514 = vrcp.f32 %v1370_v45 }
0x1468   :  { %v1465_v53 = vpop.permute.xlu1 %1464 }
0x1471   :  { %v3515_v46 = vpop.eup %3514 }
0x1472   :  { %v1372_v47 = vmul.f32 %v3515_v46, %v1366_v38 }
0x1474   :  { %v1373_v51 = vpack.c.bf16 %v1372_v47, %v1372_v47 }
0x1476   :  { %3321 = vmatmul.mubr.msk.bf16.vlgmr.msra.gmra.mrb[40].mxu0 %vm210_vm10, %v1373_v51 }
0x1477   :  { %1470 = vmatpush1.bf16.msra.mxu0 %v4206_v10  ;;  %1501 = vmatprep.mubr.bf16.mxu0 %v3625_v0 }
0x1478   :  { %1471 = vmatprep.subr.bf16.mxu0 %v4208_v12 }
0x147b   :  { %1472 = vmatpush1.bf16.msra.mxu0 %v4224_v17 }
0x147c   :  { %1473 = vmatprep.subr.bf16.mxu0 %v4228_v18 }
0x147f   :  { %1474 = vmatpush1.bf16.msra.mxu0 %v4243_v26 }
0x1480   :  { %1475 = vmatprep.subr.bf16.mxu0 %v4246_v27 }
0x1483   :  { %1476 = vmatpush1.bf16.msra.mxu0 %v4255_v29 }
0x1484   :  { %3336 = vmatprep.subr.bf16.mxu0 %v3626_v1 }
0x1486   :  { %2907 = vmatmul.mubr.msk.bf16.vlgmr.msra.gmra.mrb[44].mxu0 %vm259_vm6, %v1465_v53 }
0x1487   :  { %3338 = vmatprep.mubr.msk.bf16.mxu0 %vm3627_vm0, %v3626_v1 }
0x148c   :  { %3337 = vmatpush3.bf16.xpose.msra.mxu0 %v4107_v59 }
0x148d   :  { %3342 = vmatprep.subr.bf16.mxu0 %v3626_v1 }
0x1549   :  { %v1411_v55 = vpop.f32.mrb[40].mxu0 }
0x154a   :  { %v1417_v56 = vpack.c.bf16 %v1411_v55, %v1411_v55  ;;  %v3322_v62 = vpop.f32.mrb[41].mxu0 }
0x154b   :  { %v1414_v63 = vpop.f32.mrb[42].mxu0 }
0x154c   :  { %v3323_v4 = vpop.f32.mrb[43].mxu0  ;;  %2906 = vmatmul.mubr.msk.bf16.vlgmr.msra.gmra.mrb[36].mxu1 %vm259_vm6, %v1417_v56 }
0x154d   :  { %3325 = vmatpush3.bf16.msra.mxu1 %v4029_v58  ;;  %3332 = vmatprep.mubr.msk.bf16.mxu1 %vm3627_vm0, %v3626_v1 }
0x154e   :  { %3326 = vmatprep.subr.bf16.mxu1 %v3626_v1 }
0x1551   :  { %3327 = vmatpush3.bf16.msra.mxu1 %v4039_v61 }
0x1552   :  { %3328 = vmatprep.subr.bf16.mxu1 %v3626_v1 }
0x1555   :  { %3329 = vmatpush3.bf16.msra.mxu1 %v4048_v2 }
0x1556   :  { %3330 = vmatprep.subr.bf16.mxu1 %v3626_v1 }
0x1559   :  { %v1503_v59 = vpop.f32.mrb[44].mxu0  ;;  %3331 = vmatpush3.bf16.msra.mxu1 %v4058_v35 }
0x155a   :  { %v1505_v5 = vpop.f32.mrb[45].mxu0  ;;  %1714 = vmatprep.subr.bf16.mxu1 %v4140_v37 }
0x155b   :  { %v1507_v58 = vpop.f32.mrb[46].mxu0 }
0x155c   :  { %v1508_v6 = vpop.f32.mrb[47].mxu0 }
0x161f   :  { %v1455_v7 = vpop.f32.mrb[36].mxu1 }
0x1620   :  { %v1510_v8 = vadd.f32 %v1503_v59, %v1455_v7  ;;  %v1457_v9 = vpop.f32.mrb[37].mxu1 }
0x1621   :  { %v1459_v11 = vpop.f32.mrb[38].mxu1 }
0x1622   :  { %v2908_v13 = vmul.f32 -1.442695, %v1510_v8  ;;  %v1460_v61 = vpop.f32.mrb[39].mxu1 }
0x1624   :  { %3516 = vpow2.f32 %v2908_v13 }
0x162e   :  { %v3517_v14 = vpop.eup %3516 }
0x162f   :  { %v1514_v15 = vadd.f32 1.0, %v3517_v14 }
0x1631   :  { %3518 = vrcp.f32 %v1514_v15 }
0x163b   :  { %v3519_v2 = vpop.eup %3518 }
0x163c   :  { %v1517_v16 = vmul.f32 %v3519_v2, %v1505_v5  ;;  %v1520_v37 = vsub.f32 1.0, %v3519_v2  ;;  %v1526_v25 = vmul.f32 %v3519_v2, %v4289_v19 }
0x163e   :  { %v1518_v21 = vadd.f32 %v1517_v16, %v1457_v9 }
0x1640   :  { %3520 = vtanh.f32 %v1518_v21 }
0x164a   :  { %v3521_v35 = vpop.eup %3520 }
0x164b   :  { %1522 = vrot.lane.b32.xlu0 %v3521_v35, %s3628_s16 }
0x16bd   :  { %v1523_v24 = vpop.permute.xlu0 %1522 }
0x16be   :  { %v1525_v54 = vmul.f32 %v1523_v24, %v1520_v37 }
0x16c0   :  { %v4348_v28 = vadd.f32 %v1526_v25, %v1525_v54 }
0x16c2   :  { %1529 = vrot.lane.b32.xlu0 %v4348_v28, %s3628_s16  ;;  %v1755_v37 = vpack.c.bf16 %v4348_v28, %v4348_v28 }
0x1734   :  { %v1530_v31 = vpop.permute.xlu0 %1529 }
0x1735   :  { %v1532_v32 = vsel %vm916_vm12, %v1530_v31, 0.0 }
0x1736   :  { %1533 = vadd.xlane.f32.xlu0 %v1532_v32 }
0x17c3   :  { %v1534_v30 = vpop.xlane.xlu0 %1533 }
0x17c4   :  { %v1535_v34 = vmul.f32 0.015625, %v1534_v30  ;;  %v2930_v30 = vld [vmem:[%s4712_s5 + $0x40] sm:$0xff] }
0x17c6   :  { %v1536_v36 = vsub.f32 %v4348_v28, %v1535_v34 }
0x17c8   :  { %v1537_v38 = vmul.f32 %v1536_v36, %v1536_v36 }
0x17ca   :  { %1539 = vrot.lane.b32.xlu1 %v1537_v38, %s3628_s16  ;;  %v2937_v38 = vld [vmem:[%s4712_s5 + $0x78] sm:$0xff] }
0x183c   :  { %v1540_v40 = vpop.permute.xlu1 %1539 }
0x183d   :  { %v1542_v19 = vsel %vm916_vm12, %v1540_v40, 0.0 }
0x183e   :  { %1543 = vadd.xlane.f32.xlu1 %v1542_v19 }
0x18cb   :  { %v1544_v41 = vpop.xlane.xlu1 %1543 }
0x18cc   :  { %v1545_v44 = vmul.f32 0.015625, %v1544_v41 }
0x18ce   :  { %v1546_v45 = vadd.f32 1e-05, %v1545_v44 }
0x18d0   :  { %3522 = vrsqrt.f32 %v1546_v45 }
0x18da   :  { %v3523_v46 = vpop.eup %3522 }
0x18db   :  { %v1548_v47 = vmul.f32 %v3523_v46, %v1536_v36  ;;  %v2936_v36 = vld [vmem:[%s4712_s5 + $0x70] sm:$0xff] }
0x18dc   :  { %v1930_v40 = vpack.c.bf16 %v2937_v38, %v2936_v36 }
0x18dd   :  { %v1549_v51 = vpack.c.bf16 %v1548_v47, %v1548_v47 }
0x18df   :  { %1551 = vrot.lane.b32.xlu0 %v1549_v51, %s3628_s16 }
0x1951   :  { %v1552_v53 = vpop.permute.xlu0 %1551 }
0x1952   :  { %3333 = vmatmul.mubr.msk.bf16.vlgmr.msra.gmra.mrb[40].mxu1 %vm259_vm6, %v1552_v53 }
0x1953   :  { %1715 = vmatpush1.bf16.msra.mxu1 %v4151_v42  ;;  %1746 = vmatprep.mubr.bf16.mxu1 %v3625_v0 }
0x1954   :  { %1716 = vmatprep.subr.bf16.mxu1 %v4153_v43 }
0x1957   :  { %1717 = vmatpush1.bf16.msra.mxu1 %v4169_v49 }
0x1958   :  { %1718 = vmatprep.subr.bf16.mxu1 %v4172_v50 }
0x195b   :  { %1719 = vmatpush1.bf16.msra.mxu1 %v4187_v57 }
0x195c   :  { %1720 = vmatprep.subr.bf16.mxu1 %v4190_v60 }
0x195f   :  { %1721 = vmatpush1.bf16.msra.mxu1 %v4273_v33 }
0x1960   :  { %3348 = vmatprep.subr.bf16.mxu1 %v3626_v1 }
0x1a25   :  { %v1590_v55 = vpop.f32.mrb[40].mxu1 }
0x1a26   :  { %v1591_v56 = vadd.f32 %v4103_v48, %v1590_v55  ;;  %v3334_v42 = vpop.f32.mrb[41].mxu1 }
0x1a27   :  { %v1593_v62 = vpop.f32.mrb[42].mxu1 }
0x1a28   :  { %v1596_v63 = vmul.f32 0.125, %v1591_v56  ;;  %v3335_v4 = vpop.f32.mrb[43].mxu1  ;;  %v2938_v56 = vld [vmem:[#allocation4 + $0x5d] ss:$0 sm:$0xff] }
0x1a2a   :  { %v1597_v43 = vpack.c.bf16 %v1596_v63, %v1596_v63 }
0x1a2c   :  { %3339 = vmatmul.mubr.msk.bf16.vlgmr.msra.gmra.mrb[48].mxu0 %vm259_vm6, %v1597_v43 }
0x1a2d   :  { %3343 = vmatpush3.bf16.msra.mxu0 %v4116_v3  ;;  %3344 = vmatprep.mubr.msk.bf16.mxu0 %vm3627_vm0, %v3626_v1 }
0x1a2e   :  { %1762 = vmatprep.subr.bf16.mxu0 %v4128_v22 }
0x1aff   :  { %v1635_v49 = vpop.f32.mrb[48].mxu0 }
0x1b00   :  { %v1641_v50 = vsel %vm1031_vm14, %v1635_v49, -inf  ;;  %v3340_v57 = vpop.f32.mrb[49].mxu0 }
0x1b01   :  { %v1642_v60 = vrot.slane %v1641_v50, 4  ;;  %v1638_v48 = vpop.f32.mrb[50].mxu0 }
0x1b02   :  { %v3341_v33 = vpop.f32.mrb[51].mxu0 }
0x1b03   :  { %v1643_v59 = vmax.f32 %v1641_v50, %v1642_v60 }
0x1b05   :  { %v1644_v5 = vrot.slane %v1643_v59, 2 }
0x1b07   :  { %v1645_v58 = vmax.f32 %v1643_v59, %v1644_v5 }
0x1b09   :  { %v1646_v6 = vrot.slane %v1645_v58, 1 }
0x1b0b   :  { %v1647_v7 = vmax.f32 %v1645_v58, %v1646_v6 }
0x1b0d   :  { %v1648_v8 = vsub.f32 %v1635_v49, %v1647_v7 }
0x1b0f   :  { %v1649_v9 = vmul.f32 1.442695, %v1648_v8 }
0x1b11   :  { %3524 = vpow2.f32 %v1649_v9 }
0x1b1b   :  { %v3525_v3 = vpop.eup %3524 }
0x1b1c   :  { %v1651_v11 = vsel %vm1031_vm14, %v3525_v3, 0.0 }
0x1b1d   :  { %v1652_v13 = vrot.slane %v1651_v11, 4 }
0x1b1f   :  { %v1653_v22 = vadd.f32 %v1652_v13, %v1651_v11  ;;  %v2921_v11 = vld [vmem:[%s4711_s4 + $0x48] sm:$0xff]  ;;  %v2922_v13 = vld [vmem:[%s4711_s4 + $0x50] sm:$0xff] }
0x1b21   :  { %v1654_v61 = vrot.slane %v1653_v22, 2 }
0x1b23   :  { %v1655_v14 = vadd.f32 %v1654_v61, %v1653_v22  ;;  %v2923_v61 = vld [vmem:[%s4711_s4 + $0x58] sm:$0xff] }
0x1b25   :  { %v1656_v15 = vrot.slane %v1655_v14, 1 }
0x1b27   :  { %v1657_v2 = vadd.f32 %v1656_v15, %v1655_v14  ;;  %v1864_v14 = vpack.c.bf16 %v2923_v61, %v2922_v13  ;;  %v2924_v15 = vld [vmem:[%s4711_s4 + $0x60] sm:$0xff] }
0x1b29   :  { %3526 = vrcp.f32 %v1657_v2  ;;  %v2925_v2 = vld [vmem:[%s4711_s4 + $0x68] sm:$0xff] }
0x1b33   :  { %v3527_v16 = vpop.eup %3526 }
0x1b34   :  { %v1659_v21 = vmul.f32 %v3527_v16, %v3525_v3  ;;  %v2920_v3 = vld [vmem:[%s4711_s4 + $0x40] sm:$0xff] }
0x1b35   :  { %v1863_v22 = vpack.c.bf16 %v2921_v11, %v2920_v3 }
0x1b36   :  { %v1660_v35 = vsel %vm1031_vm14, %v1659_v21, 0.0  ;;  %2788 = vst.msk [vmem:[#allocation7 + $0x4] sm:$0xf] %vm1031_vm14, %v1659_v21 }
0x1b37   :  { %1661 = vadd.xlane.f32.xlu1 %v1660_v35  ;;  %v2926_v35 = vld [vmem:[%s4711_s4 + $0x70] sm:$0xff] }
0x1b48   :  { %1757 = vrot.lane.b32.xlu1 %v1755_v37, %s3628_s16  ;;  %v2927_v37 = vld [vmem:[%s4711_s4 + $0x78] sm:$0xff] }
0x1bc4   :  { %v1662_v24 = vpop.xlane.xlu1 %1661 }
0x1bc5   :  { %v1663_v25 = vadd.f32 1e-08, %v1662_v24  ;;  %v1866_v24 = vpack.c.bf16 %v2927_v37, %v2926_v35 }
0x1bc7   :  { %3528 = vrcp.f32 %v1663_v25 }
0x1bd1   :  { %v3529_v54 = vpop.eup %3528 }
0x1bd2   :  { %v1665_v31 = vmul.f32 %v3529_v54, %v1659_v21  ;;  %v1865_v21 = vpack.c.bf16 %v2925_v2, %v2924_v15 }
0x1bd4   :  { %v1666_v32 = vpack.c.bf16 %v1665_v31, %v1665_v31 }
0x1bd6   :  { %3345 = vmatmul.mubr.msk.bf16.vlgmr.msra.gmra.mrb[52].mxu0 %vm210_vm10, %v1666_v32 }
0x1bd7   :  { %1763 = vmatpush1.bf16.msra.mxu0 %v4206_v10  ;;  %1794 = vmatprep.mubr.bf16.mxu0 %v3625_v0  ;;  %v2931_v10 = vld [vmem:[%s4712_s5 + $0x48] sm:$0xff] }
0x1bd8   :  { %1764 = vmatprep.subr.bf16.mxu0 %v4208_v12  ;;  %v1927_v0 = vpack.c.bf16 %v2931_v10, %v2930_v30  ;;  %v2932_v12 = vld [vmem:[%s4712_s5 + $0x50] sm:$0xff] }
0x1bdb   :  { %1765 = vmatpush1.bf16.msra.mxu0 %v4224_v17  ;;  %v2933_v17 = vld [vmem:[%s4712_s5 + $0x58] sm:$0xff] }
0x1bdc   :  { %1766 = vmatprep.subr.bf16.mxu0 %v4228_v18  ;;  %v1758_v18 = vpop.permute.xlu1 %1757 }
0x1bdf   :  { %1767 = vmatpush1.bf16.msra.mxu0 %v4243_v26  ;;  %v1928_v26 = vpack.c.bf16 %v2933_v17, %v2932_v12  ;;  %v1821_v12 = vadd.s32 8, %v3803_v20  ;;  %v1824_v17 = vand.u32 3, %v3803_v20 }
0x1be0   :  { %1768 = vmatprep.subr.bf16.mxu0 %v4246_v27  ;;  %v2934_v27 = vld [vmem:[%s4712_s5 + $0x60] sm:$0xff] }
0x1be1   :  { %vm1828_vm15 = vcmp.eq.s32.totalorder %v1824_v17, %v3713_v23 }
0x1be3   :  { %1769 = vmatpush1.bf16.msra.mxu0 %v4255_v29  ;;  %v2935_v29 = vld [vmem:[%s4712_s5 + $0x68] sm:$0xff] }
0x1be4   :  { %3360 = vmatprep.subr.bf16.mxu0 %v3626_v1  ;;  %v1929_v34 = vpack.c.bf16 %v2935_v29, %v2934_v27  ;;  %v1822_v29 = vadd.s32 16, %v3803_v20 }
0x1be6   :  { %2913 = vmatmul.mubr.msk.bf16.vlgmr.msra.gmra.mrb[56].mxu0 %vm259_vm6, %v1758_v18  ;;  %v1825_v18 = vand.u32 3, %v1821_v12  ;;  %v1826_v36 = vand.u32 3, %v1822_v29 }
0x1be7   :  { %3361 = vmatpush3.bf16.msra.mxu0 %v1927_v0  ;;  %3368 = vmatprep.mubr.msk.bf16.mxu0 %vm3627_vm0, %v3626_v1 }
0x1be8   :  { %3362 = vmatprep.subr.bf16.mxu0 %v3626_v1  ;;  %vm1829_vm1 = vcmp.eq.s32.totalorder %v1825_v18, %v3713_v23  ;;  %vm1830_vm4 = vcmp.eq.s32.totalorder %v1826_v36, %v3713_v23 }
0x1beb   :  { %3363 = vmatpush3.bf16.msra.mxu0 %v1928_v26  ;;  %v2940_v26 = vsel %vm1828_vm15, 1.0, %v3626_v1 }
0x1bec   :  { %3364 = vmatprep.subr.bf16.mxu0 %v3626_v1 }
0x1bef   :  { %3365 = vmatpush3.bf16.msra.mxu0 %v1929_v34  ;;  %v1823_v34 = vadd.s32 24, %v3803_v20 }
0x1bf0   :  { %3366 = vmatprep.subr.bf16.mxu0 %v3626_v1 }
0x1bf1   :  { %v1827_v38 = vand.u32 3, %v1823_v34 }
0x1bf3   :  { %3367 = vmatpush3.bf16.msra.mxu0 %v1930_v40  ;;  %v2928_v40 = vld [vmem:[#allocation4 + $0x5c] ss:$0 sm:$0xff]  ;;  %vm1831_vm5 = vcmp.eq.s32.totalorder %v1827_v38, %v3713_v23 }
0x1bf6   :  { %3369 = vmatmul.mubr.msk.bf16.vlgmr.msra.gmra.mrb[60].mxu0 %vm259_vm6, %v4017_v52 }
0x1ca9   :  { %v1704_v19 = vpop.f32.mrb[52].mxu0 }
0x1caa   :  { %v1710_v41 = vpack.c.bf16 %v1704_v19, %v1704_v19  ;;  %v3346_v44 = vpop.f32.mrb[53].mxu0 }
0x1cab   :  { %v1707_v45 = vpop.f32.mrb[54].mxu0 }
0x1cac   :  { %v3347_v46 = vpop.f32.mrb[55].mxu0  ;;  %2912 = vmatmul.mubr.msk.bf16.vlgmr.msra.gmra.mrb[44].mxu1 %vm259_vm6, %v1710_v41 }
0x1cad   :  { %3356 = vmatprep.mubr.msk.bf16.mxu1 %vm3627_vm0, %v3626_v1  ;;  %3349 = vmatpush3.bf16.msra.mxu1 %v1863_v22  ;;  %v2942_v46 = vsel %vm1830_vm4, 1.0, %v3626_v1 }
0x1cae   :  { %3350 = vmatprep.subr.bf16.mxu1 %v3626_v1 }
0x1cb1   :  { %3351 = vmatpush3.bf16.msra.mxu1 %v1864_v14 }
0x1cb2   :  { %3352 = vmatprep.subr.bf16.mxu1 %v3626_v1 }
0x1cb5   :  { %3353 = vmatpush3.bf16.msra.mxu1 %v1865_v21 }
0x1cb6   :  { %3354 = vmatprep.subr.bf16.mxu1 %v3626_v1 }
0x1cb9   :  { %v1796_v47 = vpop.f32.mrb[56].mxu0  ;;  %3355 = vmatpush3.bf16.msra.mxu1 %v1866_v24 }
0x1cba   :  { %v1798_v51 = vpop.f32.mrb[57].mxu0 }
0x1cbb   :  { %v1800_v53 = vpop.f32.mrb[58].mxu0 }
0x1cbc   :  { %v1801_v55 = vpop.f32.mrb[59].mxu0 }
0x1cc9   :  { %v1970_v42 = vpop.f32.mrb[60].mxu0 }
0x1cca   :  { %v1971_v62 = vadd.f32 %v2938_v56, %v1970_v42  ;;  %v3370_v63 = vpop.f32.mrb[61].mxu0  ;;  %v1836_v42 = vshra.s32 %v3713_v23, 3 }
0x1ccb   :  { %v1973_v4 = vpop.f32.mrb[62].mxu0  ;;  %v1840_v63 = vshra.s32 %v1823_v34, 2 }
0x1ccc   :  { %v4425_v43 = vpack.c.bf16 %v1971_v62, %v1971_v62  ;;  %v3371_v49 = vpop.f32.mrb[63].mxu0  ;;  %v1839_v62 = vshra.s32 %v1822_v29, 2  ;;  %v1837_v4 = vshra.s32 %v3803_v20, 2 }
0x1ccd   :  { %v1838_v49 = vshra.s32 %v1821_v12, 2  ;;  %vm1844_vm13 = vcmp.eq.s32.totalorder %v1836_v42, %v1840_v63 }
0x1cce   :  { %3476 = vmatprep.subr.msk.bf16.mxu0 %vm259_vm6, %v4425_v43  ;;  %v2061_v50 = vsel %vm259_vm6, %v4425_v43, 0  ;;  %vm1843_vm8 = vcmp.eq.s32.totalorder %v1836_v42, %v1839_v62  ;;  %vm1841_vm11 = vcmp.eq.s32.totalorder %v1836_v42, %v1837_v4 }
0x1ccf   :  { %3379 = vmatpush3.bf16.xpose.msra.mxu0 %v2061_v50  ;;  %vm1842_vm15 = vcmp.eq.s32.totalorder %v1836_v42, %v1838_v49  ;;  %v4488_v50 = vsel %vm1843_vm8, 1.0, %v3626_v1 }
0x1cd0   :  { %3390 = vmatprep.subr.bf16.mxu0 %v3626_v1 }
0x1d7f   :  { %v1748_v57 = vpop.f32.mrb[44].mxu1 }
0x1d80   :  { %v1803_v60 = vadd.f32 %v1796_v47, %v1748_v57  ;;  %v1750_v48 = vpop.f32.mrb[45].mxu1  ;;  %v2943_v47 = vsel %vm1831_vm5, 1.0, %v3626_v1 }
0x1d81   :  { %v1752_v33 = vpop.f32.mrb[46].mxu1  ;;  %v4481_v56 = vpack.c.bf16 %v2943_v47, %v2942_v46 }
0x1d82   :  { %v2914_v59 = vmul.f32 -1.442695, %v1803_v60  ;;  %v1753_v5 = vpop.f32.mrb[47].mxu1  ;;  %v4491_v60 = vsel %vm1844_vm13, 1.0, %v3626_v1 }
0x1d84   :  { %3530 = vpow2.f32 %v2914_v59  ;;  %v4497_v59 = vsel %vm1842_vm15, 1.0, %v3626_v1 }
0x1d8e   :  { %v3531_v58 = vpop.eup %3530 }
0x1d8f   :  { %v1807_v6 = vadd.f32 1.0, %v3531_v58 }
0x1d91   :  { %3532 = vrcp.f32 %v1807_v6 }
0x1d9b   :  { %v3533_v7 = vpop.eup %3532 }
0x1d9c   :  { %v1810_v8 = vmul.f32 %v3533_v7, %v1798_v51  ;;  %v1813_v25 = vsub.f32 1.0, %v3533_v7  ;;  %v1819_v31 = vmul.f32 %v3533_v7, %v4348_v28  ;;  %v2941_v28 = vsel %vm1829_vm1, 1.0, %v3626_v1 }
0x1d9d   :  { %v4469_v27 = vpack.c.bf16 %v2941_v28, %v2940_v26 }
0x1d9e   :  { %v1811_v9 = vadd.f32 %v1810_v8, %v1750_v48  ;;  %v4494_v48 = vsel %vm1841_vm11, 1.0, %v3626_v1 }
0x1da0   :  { %3534 = vtanh.f32 %v1811_v9 }
0x1daa   :  { %v3535_v16 = vpop.eup %3534 }
0x1dab   :  { %1815 = vrot.lane.b32.xlu0 %v3535_v16, %s3628_s16 }
0x1e1d   :  { %v1816_v54 = vpop.permute.xlu0 %1815 }
0x1e1e   :  { %v1818_v32 = vmul.f32 %v1816_v54, %v1813_v25 }
0x1e20   :  { %v1820_v30 = vadd.f32 %v1819_v31, %v1818_v32 }
0x1e22   :  { %v1862_v10 = vpack.c.bf16 %v1820_v30, %v1820_v30 }
0x1e24   :  { %1873 = vrot.lane.b32.xlu0 %v1862_v10, %s3628_s16 }
0x1e96   :  { %v1874_v0 = vpop.permute.xlu0 %1873 }
0x1e97   :  { %3357 = vmatmul.mubr.msk.bf16.vlgmr.msra.gmra.mrb[48].mxu1 %vm259_vm6, %v1874_v0 }
0x1e98   :  { %3374 = vmatprep.mubr.msk.bf16.mxu1 %vm1987_vm2, %v4469_v27 }
0x1f6a   :  { %v1912_v19 = vpop.f32.mrb[48].mxu1 }
0x1f6b   :  { %v1913_v41 = vadd.f32 %v2928_v40, %v1912_v19  ;;  %v3358_v44 = vpop.f32.mrb[49].mxu1 }
0x1f6c   :  { %v1915_v45 = vpop.f32.mrb[50].mxu1 }
0x1f6d   :  { %v1986_v51 = vpack.c.bf16 %v1913_v41, %v1913_v41  ;;  %v3359_v53 = vpop.f32.mrb[51].mxu1 }
0x1f6f   :  { %v1996_v55 = vsel %vm1994_vm7, %v1986_v51, 0  ;;  %3475 = vmatprep.subr.msk.bf16.mxu1 %vm1994_vm7, %v1986_v51 }
0x1f70   :  { %3373 = vmatpush3.bf16.msra.mxu1 %v1996_v55 }
0x1f73   :  { %3375 = vmatmul.mubr.msk.bf16.vlgmr.msra.gmra.mrb[52].mxu1 %vm1987_vm2, %v4481_v56 }
0x2046   :  { %v3376_v57 = vpop.f32.mrb[52].mxu1 }
0x2047   :  { %v2032_v33 = vpop.f32.mrb[53].mxu1  ;;  %v2049_v58 = vmul.f32 %v3376_v57, %v4488_v50 }
0x2048   :  { %v3377_v5 = vpop.f32.mrb[54].mxu1  ;;  %v2047_v8 = vmul.f32 %v4494_v48, %v2032_v33 }
0x2049   :  { %v2050_v6 = vmul.f32 %v3377_v5, %v4491_v60  ;;  %v2035_v7 = vpop.f32.mrb[55].mxu1 }
0x204a   :  { %v2048_v9 = vmul.f32 %v4497_v59, %v2035_v7  ;;  %v2951_v7 = vld [vmem:[%s4711_s4 + $0x80] sm:$0xff] }
0x204b   :  { %v2052_v3 = vpack.c.bf16 %v2050_v6, %v2049_v58 }
0x204c   :  { %v2051_v11 = vpack.c.bf16 %v2048_v9, %v2047_v8  ;;  %v2952_v8 = vld [vmem:[%s4711_s4 + $0x88] sm:$0xff]  ;;  %v2953_v9 = vld [vmem:[%s4711_s4 + $0x90] sm:$0xff] }
0x204e   :  { %3380 = vmatprep.mubr.msk.bf16.mxu0 %vm259_vm6, %v2051_v11  ;;  %v2954_v11 = vld [vmem:[%s4711_s4 + $0x98] sm:$0xff] }
0x204f   :  { %3381 = vmatmul.mubr.msk.bf16.vlgmr.msra.gmra.mrb[64].mxu0 %vm259_vm6, %v2052_v3  ;;  %v2283_v3 = vpack.c.bf16 %v2952_v8, %v2951_v7  ;;  %v2973_v7 = vld [vmem:[%s4711_s4 + $0x100] sm:$0xff]  ;;  %v2974_v8 = vld [vmem:[%s4711_s4 + $0x108] sm:$0xff] }
0x2050   :  { %3394 = vmatprep.mubr.msk.bf16.mxu0 %vm3627_vm0, %v3626_v1 }
0x2122   :  { %v3382_v13 = vpop.f32.mrb[64].mxu0 }
0x2123   :  { %v2097_v22 = vpop.f32.mrb[65].mxu0  ;;  %v2114_v2 = vmul.f32 0.35355338, %v3382_v13  ;;  %v2284_v13 = vpack.c.bf16 %v2954_v11, %v2953_v9  ;;  %v2975_v9 = vld [vmem:[%s4711_s4 + $0x110] sm:$0xff]  ;;  %v2976_v11 = vld [vmem:[%s4711_s4 + $0x118] sm:$0xff] }
0x2124   :  { %v2112_v61 = vmul.f32 0.35355338, %v2097_v22  ;;  %v3383_v14 = vpop.f32.mrb[66].mxu0  ;;  %v2955_v22 = vld [vmem:[%s4711_s4 + $0xa0] sm:$0xff] }
0x2125   :  { %v2100_v15 = vpop.f32.mrb[67].mxu0  ;;  %v2115_v37 = vmul.f32 0.35355338, %v3383_v14  ;;  %v2122_v24 = vsel %vm210_vm10, %v2114_v2, -inf }
0x2126   :  { %v2113_v16 = vmul.f32 0.35355338, %v2100_v15  ;;  %v2116_v21 = vsel %vm210_vm10, %v2112_v61, -inf }
0x2127   :  { %2117 = vmax.xlane.f32.xlu0 %v2116_v21  ;;  %v2125_v25 = vsel %vm210_vm10, %v2115_v37, -inf }
0x2128   :  { %v2119_v35 = vsel %vm210_vm10, %v2113_v16, -inf }
0x2129   :  { %2120 = vmax.xlane.f32.xlu1 %v2119_v35 }
0x212b   :  { %2123 = vmax.xlane.f32.xlu0 %v2122_v24 }
0x212f   :  { %2126 = vmax.xlane.f32.xlu0 %v2125_v25 }
0x21b4   :  { %v2118_v54 = vpop.xlane.xlu0 %2117 }
0x21b5   :  { %v2128_v32 = vsub.f32 %v2112_v61, %v2118_v54  ;;  %v2956_v61 = vld [vmem:[%s4711_s4 + $0xa8] sm:$0xff] }
0x21b6   :  { %v2121_v31 = vpop.xlane.xlu1 %2120  ;;  %v2285_v14 = vpack.c.bf16 %v2956_v61, %v2955_v22  ;;  %v2977_v22 = vld [vmem:[%s4711_s4 + $0x120] sm:$0xff]  ;;  %v2978_v61 = vld [vmem:[%s4711_s4 + $0x128] sm:$0xff] }
0x21b7   :  { %v2129_v30 = vsub.f32 %v2113_v16, %v2121_v31  ;;  %v2132_v17 = vmul.f32 1.442695, %v2128_v32  ;;  %v1832_v16 = vand.u32 3, %v3713_v23 }
0x21b8   :  { %v2124_v10 = vpop.xlane.xlu0 %2123 }
0x21b9   :  { %v2134_v0 = vmul.f32 1.442695, %v2129_v30  ;;  %v2130_v12 = vsub.f32 %v2114_v2, %v2124_v10  ;;  %v2957_v10 = vld [vmem:[%s4711_s4 + $0xb0] sm:$0xff] }
0x21bb   :  { %3536 = vpow2.f32 %v2134_v0  ;;  %v2136_v18 = vmul.f32 1.442695, %v2130_v12  ;;  %v2958_v0 = vld [vmem:[%s4711_s4 + $0xb8] sm:$0xff] }
0x21bc   :  { %v2127_v26 = vpop.xlane.xlu0 %2126  ;;  %v2286_v12 = vpack.c.bf16 %v2958_v0, %v2957_v10  ;;  %v2985_v0 = vld [vmem:[%s4711_s4 + $0x150] sm:$0xff] }
0x21bd   :  { %3538 = vpow2.f32 %v2136_v18  ;;  %v2131_v28 = vsub.f32 %v2115_v37, %v2127_v26 }
0x21be   :  { %3540 = vpow2.f32 %v2132_v17 }
0x21bf   :  { %v2138_v29 = vmul.f32 1.442695, %v2131_v28 }
0x21c1   :  { %3542 = vpow2.f32 %v2138_v29 }
0x21c5   :  { %v3537_v34 = vpop.eup %3536 }
0x21c6   :  { %v2143_v36 = vsel %vm210_vm10, %v3537_v34, 0.0 }
0x21c7   :  { %v3539_v38 = vpop.eup %3538  ;;  %2144 = vadd.xlane.f32.xlu0 %v2143_v36 }
0x21c8   :  { %v2146_v40 = vsel %vm210_vm10, %v3539_v38, 0.0  ;;  %v3541_v19 = vpop.eup %3540 }
0x21c9   :  { %2147 = vadd.xlane.f32.xlu1 %v2146_v40  ;;  %v2140_v44 = vsel %vm210_vm10, %v3541_v19, 0.0 }
0x21cb   :  { %v3543_v41 = vpop.eup %3542 }
0x21cc   :  { %v2149_v45 = vsel %vm210_vm10, %v3543_v41, 0.0 }
0x21cd   :  { %2141 = vadd.xlane.f32.xlu1 %v2140_v44  ;;  %2150 = vadd.xlane.f32.xlu0 %v2149_v45 }
0x21de   :  { %2163 = vrot.lane.b32.xlu1 %v4425_v43, %s3628_s16 }
0x2254   :  { %v2145_v46 = vpop.xlane.xlu0 %2144 }
0x2256   :  { %v2148_v47 = vpop.xlane.xlu1 %2147 }
0x2257   :  { %3544 = vrcp.f32 %v2148_v47 }
0x2258   :  { %3546 = vrcp.f32 %v2145_v46 }
0x225a   :  { %v2151_v51 = vpop.xlane.xlu0 %2150  ;;  %v2142_v53 = vpop.xlane.xlu1 %2141 }
0x225b   :  { %3548 = vrcp.f32 %v2151_v51 }
0x225c   :  { %3550 = vrcp.f32 %v2142_v53 }
0x225e   :  { %v2164_v55 = vpop.permute.xlu1 %2163 }
0x225f   :  { %v2172_v42 = vsel %vm214_vm9, %v2164_v55, 0  ;;  %3477 = vmatprep.subr.msk.bf16.mxu1 %vm214_vm9, %v2164_v55  ;;  %vm1833_vm9 = vcmp.eq.s32.totalorder %v1832_v16, %v3803_v20  ;;  %v2963_v55 = vld [vmem:[%s4711_s4 + $0xc0] sm:$0xff] }
0x2260   :  { %3385 = vmatpush3.bf16.msra.mxu1 %v2172_v42  ;;  %v4552_v30 = vsel %vm1833_vm9, 1.0, %v3626_v1  ;;  %v2964_v42 = vld [vmem:[%s4711_s4 + $0xc8] sm:$0xff] }
0x2261   :  { %3398 = vmatprep.subr.bf16.mxu1 %v3626_v1  ;;  %v3545_v62 = vpop.eup %3544  ;;  %v2227_v23 = vpack.c.bf16 %v4552_v30, %v4552_v30 }
0x2262   :  { %v3547_v63 = vpop.eup %3546  ;;  %v2157_v49 = vmul.f32 %v3545_v62, %v3539_v38  ;;  %v2370_v62 = vpack.c.bf16 %v2964_v42, %v2963_v55 }
0x2263   :  { %v2155_v5 = vmul.f32 %v3547_v63, %v3537_v34  ;;  %v2959_v34 = vld [vmem:[#allocation4 + $0x5e] ss:$0 sm:$0xff]  ;;  %v2965_v63 = vld [vmem:[%s4711_s4 + $0xd0] sm:$0xff] }
0x2265   :  { %v3549_v4 = vpop.eup %3548 }
0x2266   :  { %v3551_v43 = vpop.eup %3550  ;;  %v2159_v57 = vmul.f32 %v3549_v4, %v3543_v41  ;;  %v2966_v4 = vld [vmem:[%s4711_s4 + $0xd8] sm:$0xff] }
0x2267   :  { %v2153_v33 = vmul.f32 %v3551_v43, %v3541_v19  ;;  %v2371_v43 = vpack.c.bf16 %v2966_v4, %v2965_v63 }
0x2268   :  { %v2161_v58 = vpack.c.bf16 %v2159_v57, %v2157_v49  ;;  %v2967_v49 = vld [vmem:[%s4711_s4 + $0xe0] sm:$0xff]  ;;  %v2968_v57 = vld [vmem:[%s4711_s4 + $0xe8] sm:$0xff] }
0x2269   :  { %v2160_v6 = vpack.c.bf16 %v2155_v5, %v2153_v33  ;;  %v2372_v33 = vpack.c.bf16 %v2968_v57, %v2967_v49  ;;  %v2969_v5 = vld [vmem:[%s4711_s4 + $0xf0] sm:$0xff]  ;;  %v2981_v57 = vld [vmem:[#allocation4 + $0x62] ss:$0 sm:$0xff] }
0x226b   :  { %3386 = vmatprep.mubr.msk.bf16.mxu1 %vm210_vm10, %v2160_v6 }
0x226c   :  { %3387 = vmatmul.mubr.msk.bf16.vlgmr.msra.gmra.mrb[56].mxu1 %vm210_vm10, %v2161_v58  ;;  %v2970_v58 = vld [vmem:[%s4711_s4 + $0xf8] sm:$0xff] }
0x226d   :  { %3406 = vmatprep.mubr.msk.bf16.mxu1 %vm3627_vm0, %v3626_v1  ;;  %3399 = vmatpush3.bf16.msra.mxu1 %v2283_v3  ;;  %v2373_v6 = vpack.c.bf16 %v2970_v58, %v2969_v5  ;;  %v2432_v3 = vpack.c.bf16 %v2974_v8, %v2973_v7 }
0x226e   :  { %3400 = vmatprep.subr.bf16.mxu1 %v3626_v1 }
0x2271   :  { %3401 = vmatpush3.bf16.msra.mxu1 %v2284_v13  ;;  %v2433_v13 = vpack.c.bf16 %v2976_v11, %v2975_v9 }
0x2272   :  { %3402 = vmatprep.subr.bf16.mxu1 %v3626_v1 }
0x2275   :  { %3403 = vmatpush3.bf16.msra.mxu1 %v2285_v14  ;;  %v2434_v14 = vpack.c.bf16 %v2978_v61, %v2977_v22 }
0x2276   :  { %3404 = vmatprep.subr.bf16.mxu1 %v3626_v1 }
0x2279   :  { %3405 = vmatpush3.bf16.msra.mxu1 %v2286_v12  ;;  %v2986_v12 = vld [vmem:[%s4711_s4 + $0x158] sm:$0xff] }
0x227a   :  { %3422 = vmatprep.subr.bf16.mxu1 %v3626_v1 }
0x233f   :  { %v3388_v15 = vpop.f32.mrb[56].mxu1 }
0x2340   :  { %v2208_v2 = vpop.f32.mrb[57].mxu1  ;;  %v2225_v35 = vmul.f32 %v3388_v15, %v4488_v50 }
0x2341   :  { %v3389_v21 = vpop.f32.mrb[58].mxu1  ;;  %v2223_v25 = vmul.f32 %v4494_v48, %v2208_v2 }
0x2342   :  { %v2226_v37 = vmul.f32 %v3389_v21, %v4491_v60  ;;  %v2211_v24 = vpop.f32.mrb[59].mxu1 }
0x2343   :  { %v2224_v54 = vmul.f32 %v4497_v59, %v2211_v24  ;;  %v2962_v24 = vld [vmem:[#allocation4 + $0x60] ss:$0 sm:$0xff] }
0x2344   :  { %v2229_v31 = vpack.c.bf16 %v2226_v37, %v2225_v35  ;;  %v2961_v35 = vld [vmem:[#allocation4 + $0x5f] ss:$0 sm:$0xff] }
0x2345   :  { %v2228_v32 = vpack.c.bf16 %v2224_v54, %v2223_v25  ;;  %v2983_v54 = vld [vmem:[%s4711_s4 + $0x140] sm:$0xff] }
0x2347   :  { %3391 = vmatpush3.bf16.msra.mxu0 %v2228_v32 }
0x2348   :  { %3392 = vmatprep.subr.bf16.mxu0 %v3626_v1 }
0x234b   :  { %3393 = vmatpush3.bf16.msra.mxu0 %v2229_v31  ;;  %v2984_v31 = vld [vmem:[%s4711_s4 + $0x148] sm:$0xff] }
0x234c   :  { %3410 = vmatprep.subr.bf16.mxu0 %v3626_v1 }
0x234e   :  { %3395 = vmatmul.mubr.msk.bf16.vlgmr.msra.gmra.mrb[68].mxu0 %vm72_vm3, %v2227_v23  ;;  %v2493_v23 = vpack.c.bf16 %v2984_v31, %v2983_v54 }
0x234f   :  { %3418 = vmatprep.mubr.msk.bf16.mxu0 %vm3627_vm0, %v3626_v1  ;;  %3411 = vmatpush3.bf16.msra.mxu0 %v2370_v62 }
0x2350   :  { %3412 = vmatprep.subr.bf16.mxu0 %v3626_v1 }
0x2353   :  { %3413 = vmatpush3.bf16.msra.mxu0 %v2371_v43 }
0x2354   :  { %3414 = vmatprep.subr.bf16.mxu0 %v3626_v1 }
0x2357   :  { %3415 = vmatpush3.bf16.msra.mxu0 %v2372_v33 }
0x2358   :  { %3416 = vmatprep.subr.bf16.mxu0 %v3626_v1 }
0x235b   :  { %3417 = vmatpush3.bf16.msra.mxu0 %v2373_v6 }
0x235c   :  { %3434 = vmatprep.subr.bf16.mxu0 %v3626_v1 }
0x2421   :  { %v2267_v17 = vpop.f32.mrb[68].mxu0 }
0x2422   :  { %v2282_v18 = vpack.c.bf16 %v2267_v17, %v2267_v17  ;;  %v3396_v26 = vpop.f32.mrb[69].mxu0  ;;  %v2494_v17 = vpack.c.bf16 %v2986_v12, %v2985_v0 }
0x2423   :  { %v2270_v28 = vpop.f32.mrb[70].mxu0  ;;  %v2988_v26 = vld [vmem:[%s4711_s4 + $0x168] sm:$0xff] }
0x2424   :  { %v3397_v29 = vpop.f32.mrb[71].mxu0  ;;  %3407 = vmatmul.mubr.msk.bf16.vlgmr.msra.gmra.mrb[60].mxu1 %vm259_vm6, %v2282_v18  ;;  %v2987_v18 = vld [vmem:[%s4711_s4 + $0x160] sm:$0xff] }
0x2425   :  { %3430 = vmatprep.mubr.msk.bf16.mxu1 %vm3627_vm0, %v3626_v1  ;;  %3423 = vmatpush3.bf16.msra.mxu1 %v2432_v3  ;;  %v2495_v28 = vpack.c.bf16 %v2988_v26, %v2987_v18  ;;  %v2989_v29 = vld [vmem:[%s4711_s4 + $0x170] sm:$0xff] }
0x2426   :  { %3424 = vmatprep.subr.bf16.mxu1 %v3626_v1 }
0x2429   :  { %3425 = vmatpush3.bf16.msra.mxu1 %v2433_v13 }
0x242a   :  { %3426 = vmatprep.subr.bf16.mxu1 %v3626_v1 }
0x242d   :  { %3427 = vmatpush3.bf16.msra.mxu1 %v2434_v14 }
0x242e   :  { %3428 = vmatprep.subr.bf16.mxu1 %v3626_v1 }
0x24f7   :  { %v2329_v36 = vpop.f32.mrb[60].mxu1 }
0x24f8   :  { %v2330_v38 = vadd.f32 %v2959_v34, %v2329_v36  ;;  %v3408_v40 = vpop.f32.mrb[61].mxu1  ;;  %v2990_v34 = vld [vmem:[%s4711_s4 + $0x178] sm:$0xff] }
0x24f9   :  { %v2332_v19 = vpop.f32.mrb[62].mxu1  ;;  %v2496_v36 = vpack.c.bf16 %v2990_v34, %v2989_v29  ;;  %v2980_v40 = vld [vmem:[%s4711_s4 + $0x138] sm:$0xff] }
0x24fa   :  { %v3409_v41 = vpop.f32.mrb[63].mxu1  ;;  %v2337_v44 = vsel %vm916_vm12, %v2330_v38, 0.0 }
0x24fb   :  { %2338 = vadd.xlane.f32.xlu0 %v2337_v44  ;;  %v2971_v41 = vld [vmem:[#allocation4 + $0x61] ss:$0 sm:$0xff] }
0x2588   :  { %v2339_v45 = vpop.xlane.xlu0 %2338 }
0x2589   :  { %v2340_v46 = vmul.f32 0.015625, %v2339_v45 }
0x258b   :  { %v2341_v47 = vsub.f32 %v2330_v38, %v2340_v46  ;;  %v2979_v38 = vld [vmem:[%s4711_s4 + $0x130] sm:$0xff]  ;;  %s3630_s4 = smov [#allocation7]  }
0x258c   :  { %v2435_v19 = vpack.c.bf16 %v2980_v40, %v2979_v38  ;;  %s2796_s8 = sshll.u32 %s3630_s4, 4  ;;  %s2797_s8 = int_to_ptr.vmem [resolvable:$true] %s2796_s8 }
0x258d   :  { %v2342_v51 = vmul.f32 %v2341_v47, %v2341_v47  ;;  %s3596_s9 = scalar_lea.vmem %s2797_s8, 192  ;;  %p3601_p9 = scmp.lt.s32.totalorder %s2797_s8, %s2797_s8 }
0x258e   :  { %3429 = vmatpush3.bf16.msra.mxu1 %v2435_v19  ;;  %p3597_p8 = scmp.ne.s32.totalorder %s2797_s8, %s3596_s9  ;;  %p3602_p10 = scmp.lt.s32.totalorder %s3596_s9, %s3596_s9 }
0x258f   :  { %v2343_v53 = vsel %vm916_vm12, %v2342_v51, 0.0 }
0x2590   :  { %2344 = vadd.xlane.f32.xlu0 %v2343_v53  ;;  %p3603_p11 = por %p3602_p10, %p3601_p9 }
0x2592   :  { %p3604_p12 = pnand %p3603_p11, %p3597_p8 }
0x261d   :  { %v2345_v15 = vpop.xlane.xlu0 %2344 }
0x261e   :  { %v2346_v2 = vmul.f32 0.015625, %v2345_v15 }
0x2620   :  { %v2347_v16 = vadd.f32 1e-05, %v2346_v2 }
0x2622   :  { %3552 = vrsqrt.f32 %v2347_v16 }
0x262c   :  { %v3553_v21 = vpop.eup %3552 }
0x262d   :  { %v2349_v37 = vmul.f32 %v3553_v21, %v2341_v47 }
0x262f   :  { %v2354_v25 = vmul.f32 %v2961_v35, %v2349_v37 }
0x2631   :  { %v2359_v32 = vadd.f32 %v2962_v24, %v2354_v25 }
0x2633   :  { %v2369_v10 = vpack.c.bf16 %v2359_v32, %v2359_v32 }
0x2635   :  { %3419 = vmatmul.mubr.msk.bf16.vlgmr.msra.gmra.mrb[72].mxu0 %vm259_vm6, %v2369_v10 }
0x2636   :  { %3435 = vmatpush3.bf16.msra.mxu0 %v2493_v23  ;;  %3442 = vmatprep.mubr.msk.bf16.mxu0 %vm3627_vm0, %v3626_v1 }
0x2637   :  { %3436 = vmatprep.subr.bf16.mxu0 %v3626_v1 }
0x263a   :  { %3437 = vmatpush3.bf16.msra.mxu0 %v2494_v17 }
0x263b   :  { %3438 = vmatprep.subr.bf16.mxu0 %v3626_v1 }
0x263e   :  { %3439 = vmatpush3.bf16.msra.mxu0 %v2495_v28 }
0x263f   :  { %3440 = vmatprep.subr.bf16.mxu0 %v3626_v1 }
0x2642   :  { %3441 = vmatpush3.bf16.msra.mxu0 %v2496_v36 }
0x2645   :  { %3443 = vmatmul.mubr.msk.bf16.vlgmr.msra.gmra.mrb[76].mxu0 %vm259_vm6, %v4017_v52  ;;  %v2991_v52 = vld [vmem:[#allocation4 + $0x63] ss:$0 sm:$0xff] }
0x2708   :  { %v2416_v44 = vpop.f32.mrb[72].mxu0 }
0x2709   :  { %v2417_v45 = vadd.f32 %v2971_v41, %v2416_v44  ;;  %v3420_v46 = vpop.f32.mrb[73].mxu0 }
0x270a   :  { %v2419_v47 = vpop.f32.mrb[74].mxu0 }
0x270b   :  { %v2431_v51 = vpack.c.bf16 %v2417_v45, %v2417_v45  ;;  %v3421_v53 = vpop.f32.mrb[75].mxu0  ;;  %v734_v47 = vld [vmem:[#allocation4 + $0x59] sm:$0x1] }
0x270d   :  { %3431 = vmatmul.mubr.msk.bf16.vlgmr.msra.gmra.mrb[64].mxu1 %vm259_vm6, %v2431_v51  ;;  %v3629_v51 = vmov 0.0|0.0  }
0x270e   :  { %3448 = vmatprep.mubr.msk.bf16.mxu1 %vm1987_vm2, %v4469_v27 }
0x2718   :  { %v2536_v55 = vpop.f32.mrb[76].mxu0 }
0x2719   :  { %v2537_v42 = vadd.f32 %v2991_v52, %v2536_v55  ;;  %v3444_v62 = vpop.f32.mrb[77].mxu0 }
0x271a   :  { %v2539_v63 = vpop.f32.mrb[78].mxu0 }
0x271b   :  { %v2601_v4 = vpack.c.bf16 %v2537_v42, %v2537_v42  ;;  %v3445_v43 = vpop.f32.mrb[79].mxu0 }
0x271d   :  { %v2609_v49 = vsel %vm259_vm6, %v2601_v4, 0  ;;  %3479 = vmatprep.subr.msk.bf16.mxu0 %vm259_vm6, %v2601_v4 }
0x271e   :  { %3453 = vmatpush3.bf16.xpose.msra.mxu0 %v2609_v49 }
0x27e0   :  { %v2478_v33 = vpop.f32.mrb[64].mxu1 }
0x27e1   :  { %v2479_v5 = vadd.f32 %v2981_v57, %v2478_v33  ;;  %v3432_v58 = vpop.f32.mrb[65].mxu1 }
0x27e2   :  { %v2481_v6 = vpop.f32.mrb[66].mxu1 }
0x27e3   :  { %v2542_v7 = vpack.c.bf16 %v2479_v5, %v2479_v5  ;;  %v3433_v8 = vpop.f32.mrb[67].mxu1 }
0x27e5   :  { %v2544_v27 = vsel %vm1994_vm7, %v2542_v7, 0  ;;  %3478 = vmatprep.subr.msk.bf16.mxu1 %vm1994_vm7, %v2542_v7 }
0x27e6   :  { %3447 = vmatpush3.bf16.msra.mxu1 %v2544_v27 }
0x27e7   :  { %3469 = vmatprep.subr.bf16.mxu1 %v3629_v51 }
0x27e9   :  { %3449 = vmatmul.mubr.msk.bf16.vlgmr.msra.gmra.mrb[68].mxu1 %vm1987_vm2, %v4481_v56 }
0x27ea   :  { %3466 = vmatprep.mubr.msk.f32.mxu1 %vm3627_vm0, %v3626_v1  ;;  %vm786_vm0 = vcmask 57344  }
0x28bc   :  { %v3450_v9 = vpop.f32.mrb[68].mxu1 }
0x28bd   :  { %v2580_v3 = vpop.f32.mrb[69].mxu1  ;;  %v2597_v13 = vmul.f32 %v3450_v9, %v4488_v50 }
0x28be   :  { %v3451_v11 = vpop.f32.mrb[70].mxu1  ;;  %v2595_v14 = vmul.f32 %v4494_v48, %v2580_v3 }
0x28bf   :  { %v2598_v22 = vmul.f32 %v3451_v11, %v4491_v60  ;;  %v2583_v61 = vpop.f32.mrb[71].mxu1 }
0x28c0   :  { %v2596_v15 = vmul.f32 %v4497_v59, %v2583_v61 }
0x28c1   :  { %v2600_v2 = vpack.c.bf16 %v2598_v22, %v2597_v13 }
0x28c2   :  { %v2599_v16 = vpack.c.bf16 %v2596_v15, %v2595_v14 }
0x28c4   :  { %3454 = vmatprep.mubr.msk.bf16.mxu0 %vm259_vm6, %v2599_v16 }
0x28c5   :  { %3455 = vmatmul.mubr.msk.bf16.vlgmr.msra.gmra.mrb[80].mxu0 %vm259_vm6, %v2600_v2  ;;  %v2784_v2 = vsub.s32 0, %v3803_v20 }
0x2998   :  { %v3456_v56 = vpop.f32.mrb[80].mxu0 }
0x2999   :  { %v2662_v1 = vmul.f32 0.35355338, %v3456_v56  ;;  %v2645_v21 = vpop.f32.mrb[81].mxu0 }
0x299a   :  { %v2660_v35 = vmul.f32 0.35355338, %v2645_v21  ;;  %v3457_v37 = vpop.f32.mrb[82].mxu0 }
0x299b   :  { %v2648_v24 = vpop.f32.mrb[83].mxu0  ;;  %v2670_v50 = vsel %vm210_vm10, %v2662_v1, -inf  ;;  %v2663_v59 = vmul.f32 0.35355338, %v3457_v37 }
0x299c   :  { %v2661_v60 = vmul.f32 0.35355338, %v2648_v24  ;;  %2671 = vmax.xlane.f32.xlu1 %v2670_v50  ;;  %v2664_v48 = vsel %vm210_vm10, %v2660_v35, -inf }
0x299d   :  { %2665 = vmax.xlane.f32.xlu0 %v2664_v48  ;;  %v2673_v54 = vsel %vm210_vm10, %v2663_v59, -inf }
0x299e   :  { %v2667_v25 = vsel %vm210_vm10, %v2661_v60, -inf }
0x29a1   :  { %2668 = vmax.xlane.f32.xlu0 %v2667_v25 }
0x29a5   :  { %2674 = vmax.xlane.f32.xlu0 %v2673_v54 }
0x2a29   :  { %v2672_v31 = vpop.xlane.xlu1 %2671 }
0x2a2a   :  { %v2678_v32 = vsub.f32 %v2662_v1, %v2672_v31  ;;  %v2666_v23 = vpop.xlane.xlu0 %2665 }
0x2a2b   :  { %v2676_v10 = vsub.f32 %v2660_v35, %v2666_v23 }
0x2a2c   :  { %v2684_v0 = vmul.f32 1.442695, %v2678_v32 }
0x2a2d   :  { %v2680_v12 = vmul.f32 1.442695, %v2676_v10 }
0x2a2e   :  { %3554 = vpow2.f32 %v2684_v0  ;;  %v2669_v17 = vpop.xlane.xlu0 %2668 }
0x2a2f   :  { %v2677_v18 = vsub.f32 %v2661_v60, %v2669_v17  ;;  %3556 = vpow2.f32 %v2680_v12 }
0x2a31   :  { %v2682_v26 = vmul.f32 1.442695, %v2677_v18 }
0x2a32   :  { %v2675_v28 = vpop.xlane.xlu0 %2674 }
0x2a33   :  { %v2679_v29 = vsub.f32 %v2663_v59, %v2675_v28  ;;  %3558 = vpow2.f32 %v2682_v26 }
0x2a35   :  { %v2686_v34 = vmul.f32 1.442695, %v2679_v29 }
0x2a37   :  { %3560 = vpow2.f32 %v2686_v34 }
0x2a38   :  { %v3555_v36 = vpop.eup %3554 }
0x2a39   :  { %v2694_v38 = vsel %vm210_vm10, %v3555_v36, 0.0  ;;  %v3557_v40 = vpop.eup %3556 }
0x2a3a   :  { %2695 = vadd.xlane.f32.xlu0 %v2694_v38  ;;  %v2688_v19 = vsel %vm210_vm10, %v3557_v40, 0.0 }
0x2a3d   :  { %v3559_v41 = vpop.eup %3558 }
0x2a3e   :  { %2689 = vadd.xlane.f32.xlu0 %v2688_v19  ;;  %v2691_v44 = vsel %vm210_vm10, %v3559_v41, 0.0 }
0x2a41   :  { %v3561_v45 = vpop.eup %3560 }
0x2a42   :  { %2692 = vadd.xlane.f32.xlu0 %v2691_v44  ;;  %v2697_v46 = vsel %vm210_vm10, %v3561_v45, 0.0 }
0x2a46   :  { %2698 = vadd.xlane.f32.xlu0 %v2697_v46 }
0x2a5c   :  { %737 = vperm.xlu0 %3490, %v734_v47  }
0x2ac7   :  { %v2696_v53 = vpop.xlane.xlu0 %2695 }
0x2acb   :  { %v2690_v52 = vpop.xlane.xlu0 %2689 }
0x2acc   :  { %3562 = vrcp.f32 %v2690_v52 }
0x2acf   :  { %v2693_v55 = vpop.xlane.xlu0 %2692 }
0x2ad0   :  { %3564 = vrcp.f32 %v2693_v55 }
0x2ad1   :  { %3566 = vrcp.f32 %v2696_v53 }
0x2ad3   :  { %v2699_v42 = vpop.xlane.xlu0 %2698 }
0x2ad4   :  { %3568 = vrcp.f32 %v2699_v42 }
0x2ad6   :  { %v3563_v62 = vpop.eup %3562 }
0x2ad7   :  { %v2701_v43 = vmul.f32 %v3563_v62, %v3557_v40 }
0x2ada   :  { %v3565_v63 = vpop.eup %3564 }
0x2adb   :  { %v738_v4 = vpop.permute.xlu0 %737  ;;  %v2703_v49 = vmul.f32 %v3565_v63, %v3559_v41  ;;  %v3567_v57 = vpop.eup %3566 }
0x2adc   :  { %v781_v33 = vadd.f32 %v4101_v39, %v738_v4  ;;  %v2705_v7 = vmul.f32 %v3567_v57, %v3555_v36 }
0x2add   :  { %v3470_v5 = vpack.c.bf16 %v2703_v49, %v2701_v43 }
0x2ade   :  { %v3569_v58 = vpop.eup %3568  ;;  %v787_v6 = vsel %vm786_vm0, %v781_v33, -inf }
0x2adf   :  { %3471 = vmatpush3.bf16.msra.mxu1 %v3470_v5  ;;  %788 = vmax.xlane.f32.xlu1 %v787_v6  ;;  %v2707_v8 = vmul.f32 %v3569_v58, %v3561_v45 }
0x2ae0   :  { %3472 = vmatprep.subr.bf16.mxu1 %v3629_v51 }
0x2ae1   :  { %v3473_v27 = vpack.c.bf16 %v2707_v8, %v2705_v7 }
0x2ae3   :  { %3474 = vmatpush3.bf16.msra.mxu1 %v3473_v27 }
0x2ae6   :  { %3467 = vmatmul.mubr.msk.f32.vlgmr.msra.gmra.mrb[72].mxu1 %vm72_vm3, %v4552_v30 }
0x2b6c   :  { %v789_v9 = vpop.xlane.xlu1 %788 }
0x2b6d   :  { %v790_v3 = vsub.f32 %v781_v33, %v789_v9 }
0x2b6f   :  { %v791_v11 = vmul.f32 1.442695, %v790_v3 }
0x2b71   :  { %3570 = vpow2.f32 %v791_v11 }
0x2b7b   :  { %v3571_v13 = vpop.eup %3570 }
0x2b7c   :  { %v793_v39 = vsel %vm786_vm0, %v3571_v13, 0.0 }
0x2b7d   :  { %794 = vadd.xlane.f32.xlu1 %v793_v39 }
0x2bb9   :  { %v2777_v22 = vpop.f32.mrb[72].mxu1 }
0x2bba   :  { %v2781_v61 = vmul.f32 0.125, %v2777_v22  ;;  %v3468_v14 = vpop.f32.mrb[73].mxu1 }
0x2bbc   :  { %2790 = vst.msk [vmem:[#allocation7 + $0x8] sm:$0xf] %vm1031_vm14, %v2781_v61 }
0x2c0a   :  { %v795_v15 = vpop.xlane.xlu1 %794 }
0x2c0b   :  { %3572 = vrcp.f32 %v795_v15 }
0x2c15   :  { %v3573_v16 = vpop.eup %3572 }
0x2c16   :  { %v797_v30 = vmul.f32 %v3573_v16, %v3571_v13 }
0x2c18   :  { %v2785_v56 = vrot.slane %v797_v30, %v2784_v2 }
0x2c1a   :  { %2786 = vst.msk [vmem:[#allocation7] sm:$0xf] %vm1031_vm14, %v2785_v56 }
0x2c1b   :  { %3607 = shalt.err (!%p3604_p12)
}
0x2c1c   :  { %s3608_s5 = scalar_lea.hbm %s4714_s7, 192 }
0x2c1d   :  { %p3609_p13 = scmp.ne.s32.totalorder %s4714_s7, %s3608_s5  ;;  %p3612_p0 = scmp.lt.u32.totalorder %s3608_s5, %s4714_s7 }
0x2c1f   :  { %p3614_p1 = pnand %p3612_p0, %p3609_p13 }
0x2c21   :  { %3617 = shalt.err (!%p3614_p1)
}
0x2c22   :  { %s3631_s15 = smov 4  }
0x2c23   :  { %2802 = dma.vmem_to_hbm [thread:$0]  %s2797_s8, 192, %s4714_s7, [#allocation6], %s3628_s16, %s3628_s16, %s3631_s15  }
0x2c24   :  { %3620 = dma.done.wait [#allocation6], 192  }
0x2c25   :  { %3621 = vsyncadd [#allocation6], 4294967104 }
0x2c26   :  { %2806 = vsyncpa [#allocation5], 1 }
0x2c27   :  { %2807 = vsyncpa [#allocation6], 1 }

</bundles_post_ra>
